<compile_context>
chip_gen: v7x
topology: tpu7x:2x2x1
jax: 0.10.0
libtpu: 0.0.40
codegen_flags: <defaults>
</compile_context>

<pallas_src>
import functools

import numpy as np
import jax
import jax.numpy as jnp
from jax.experimental import pallas as pl
from jax.experimental.pallas import tpu as pltpu


# ----------------------------------------------------------------------------
# Fused Pallas kernel: all layers + both directions + FC head
# ----------------------------------------------------------------------------
def make_solace_kernel(num_layers, B, T, H):
    def kernel(x_ref, *refs):
        nl = num_layers
        win_refs = [refs[3 * l] for l in range(nl)]      # (Din_l, 8H) bf16
        b_refs = [refs[3 * l + 1] for l in range(nl)]    # (1, 8H)     f32
        whh_refs = [refs[3 * l + 2] for l in range(nl)]  # (2H, 4H)    bf16
        fcw_ref = refs[3 * nl]                           # (1, 2H)     f32
        fcb_ref = refs[3 * nl + 1]                       # (1, 1)      f32
        out_ref = refs[3 * nl + 2]                       # (B, 1)      f32

        f32 = jnp.float32
        bf16 = jnp.bfloat16

        # Static direction mask: fwd rows keep lanes [0:H], bwd rows [H:2H].
        row = jax.lax.broadcasted_iota(jnp.int32, (2 * B, 2 * H), 0)
        col = jax.lax.broadcasted_iota(jnp.int32, (2 * B, 2 * H), 1)
        dir_mask = ((row < B) == (col < H)).astype(f32)

        x_flat = x_ref[...].astype(bf16)                 # (T*B, Din), row t*B+b

        h_last = None
        for l in range(nl):
            w_in = win_refs[l][...]                      # (Din_l, 8H) bf16
            w_hh = whh_refs[l][...]                      # (2H, 4H)    bf16
            bias = b_refs[l][...]                        # (1, 8H)     f32

            # ---- Bulk input projection for BOTH directions (off the chain).
            # cols [0:4H] = x@W_ih_f + b_f ; cols [4H:8H] = x@W_ih_b + b_b
            g_bulk = (jnp.dot(x_flat, w_in, preferred_element_type=f32)
                      + bias)                            # (T*B, 8H) f32

            # Per-step gate-input blocks: rows [0:B] = fwd @ t,
            # rows [B:2B] = bwd @ (T-1-t). Depends only on g_bulk, not on h.
            g_steps = [
                jnp.concatenate(
                    [g_bulk[t * B:(t + 1) * B, 0:4 * H],
                     g_bulk[(T - 1 - t) * B:(T - t) * B, 4 * H:8 * H]],
                    axis=0)
                for t in range(T)
            ]

            # ---- Recurrence: only the (2B,2H)@(2H,4H) h-matmul stays serial.
            h2 = jnp.zeros((2 * B, 2 * H), bf16)         # masked-layout hidden
            c = jnp.zeros((2 * B, H), f32)
            hist = []
            for t in range(T):                           # static, fully unrolled
                gates = g_steps[t] + jnp.dot(
                    h2, w_hh, preferred_element_type=f32)        # (2B, 4H) f32
                sig = jax.nn.sigmoid(gates)              # full-width EUP pass
                th = jnp.tanh(gates)                     # full-width EUP pass
                i_g = sig[:, 0:H]
                f_g = sig[:, H:2 * H]
                g_g = th[:, 2 * H:3 * H]
                o_g = sig[:, 3 * H:4 * H]
                c = f_g * c + i_g * g_g
                h_new = o_g * jnp.tanh(c)                # (2B, H) f32
                hist.append(h_new)
                if t + 1 < T:
                    # Re-pad hidden into the (2B, 2H) masked layout for the
                    # next step's recurrent matmul (one VPU mul + cast).
                    h2 = (jnp.concatenate([h_new, h_new], axis=1)
                          * dir_mask).astype(bf16)
            h_last = hist[-1]

            if l < nl - 1:
                # Assemble next layer's flat input (T*B, 2H), once per layer:
                # row block t = [fwd_h[t] | bwd_h[t]], bwd_h[t]=hist[T-1-t][B:].
                x_flat = jnp.concatenate(
                    [jnp.concatenate(
                        [hist[t][0:B], hist[T - 1 - t][B:2 * B]], axis=1)
                     for t in range(T)],
                    axis=0).astype(bf16)
                # TODO(synk): inter-layer dropout (p=0.5) is stochastic in
                # train mode; eval-mode identity implemented here.

        # hn = cat(hn[-2], hn[-1]) = cat(last-layer fwd final, bwd final)
        hn = jnp.concatenate([h_last[0:B], h_last[B:2 * B]], axis=1)  # (B, 2H)
        # TODO(synk): self.dropout(hn) is stochastic in train mode; eval identity.
        # FC head as VPU multiply + lane reduction (avoids an N=1 MXU matmul).
        out_ref[...] = (jnp.sum(hn * fcw_ref[...], axis=-1, keepdims=True)
                        + fcb_ref[...])

    return kernel


# ----------------------------------------------------------------------------
# One-time weight packing (cache the result; do NOT rebuild per call)
# ----------------------------------------------------------------------------
def pack_params(params, num_layers=3):
    packed = []
    for l in range(num_layers):
        p = params[f"layer{l}"]
        # Input-projection weight, both directions along columns: (Din, 8H)
        w_in = jnp.concatenate([p["w_ih_f"], p["w_ih_b"]],
                               axis=1).astype(jnp.bfloat16)
        # Gate bias row, both directions along columns: (1, 8H)
        b_fb = jnp.concatenate([p["b_f"], p["b_b"]], axis=1).astype(jnp.float32)
        # Recurrent weight, directions stacked along K: (2H, 4H)
        w_hh = jnp.concatenate([p["w_hh_f"], p["w_hh_b"]],
                               axis=0).astype(jnp.bfloat16)
        packed += [w_in, b_fb, w_hh]
    packed += [params["fc_w"].T.astype(jnp.float32),   # (1, 2H)
               params["fc_b"].astype(jnp.float32)]     # (1, 1)
    return tuple(packed)


def solace_lstm_forward(x, packed):
    """x: (B, T, D) batch-first; packed: output of pack_params. Returns (B,)."""
    B, T, D = x.shape
    num_layers = (len(packed) - 2) // 3
    H = packed[2].shape[1] // 4                     # w_hh_0 is (2H, 4H)
    x_flat = jnp.transpose(x, (1, 0, 2)).reshape(T * B, D)  # time-major flat

    vmem = pl.BlockSpec(memory_space=pltpu.MemorySpace.VMEM)
    out = pl.pallas_call(
        make_solace_kernel(num_layers, B, T, H),
        out_shape=jax.ShapeDtypeStruct((B, 1), jnp.float32),
        in_specs=[vmem] * (1 + len(packed)),
        out_specs=vmem,
    )(x_flat, *packed)
    return out.reshape(-1)


# ----------------------------------------------------------------------------
# Pure-JAX f32 reference (lax.scan) for correctness check
# ----------------------------------------------------------------------------
def _ref_lstm_layer(x_tbd, w_ih, w_hh, b):
    H = w_hh.shape[0]
    B = x_tbd.shape[1]

    def step(carry, x_t):
        h, c = carry
        gates = x_t @ w_ih + h @ w_hh + b
        i = jax.nn.sigmoid(gates[:, :H])
        f = jax.nn.sigmoid(gates[:, H:2 * H])
        g = jnp.tanh(gates[:, 2 * H:3 * H])
        o = jax.nn.sigmoid(gates[:, 3 * H:])
        c = f * c + i * g
        h = o * jnp.tanh(c)
        return (h, c), h

    init = (jnp.zeros((B, H), jnp.float32), jnp.zeros((B, H), jnp.float32))
    _, outs = jax.lax.scan(step, init, x_tbd)
    return outs


def ref_forward(x, params, num_layers=3):
    layer_in = jnp.transpose(x, (1, 0, 2))
    hn_f = hn_b = None
    for l in range(num_layers):
        p = params[f"layer{l}"]
        out_f = _ref_lstm_layer(layer_in, p["w_ih_f"], p["w_hh_f"], p["b_f"])
        out_b_rev = _ref_lstm_layer(jnp.flip(layer_in, axis=0),
                                    p["w_ih_b"], p["w_hh_b"], p["b_b"])
        hn_f, hn_b = out_f[-1], out_b_rev[-1]
        layer_in = jnp.concatenate(
            [out_f, jnp.flip(out_b_rev, axis=0)], axis=-1)
    hn = jnp.concatenate([hn_f, hn_b], axis=-1)
    return (hn @ params["fc_w"] + params["fc_b"]).reshape(-1)


# ----------------------------------------------------------------------------
# Deterministic parameter init (shapes mirror nn.LSTM / nn.Linear, transposed)
# ----------------------------------------------------------------------------
def init_params(key, input_size, hidden_size, num_layers):
    H = hidden_size
    bound = 1.0 / np.sqrt(H)
    keys = iter(jax.random.split(key, num_layers * 8 + 2))
    params = {}
    D = input_size
    for l in range(num_layers):
        lp = {}
        for d in ("f", "b"):  # forward / backward direction
            lp[f"w_ih_{d}"] = jax.random.uniform(
                next(keys), (D, 4 * H), jnp.float32, -bound, bound)
            lp[f"w_hh_{d}"] = jax.random.uniform(
                next(keys), (H, 4 * H), jnp.float32, -bound, bound)
            b_ih = jax.random.uniform(
                next(keys), (1, 4 * H), jnp.float32, -bound, bound)
            b_hh = jax.random.uniform(
                next(keys), (1, 4 * H), jnp.float32, -bound, bound)
            lp[f"b_{d}"] = b_ih + b_hh
        params[f"layer{l}"] = lp
        D = 2 * H  # next layer consumes concatenated bidirectional outputs
    fc_bound = 1.0 / np.sqrt(2 * H)
    params["fc_w"] = jax.random.uniform(
        next(keys), (2 * H, 1), jnp.float32, -fc_bound, fc_bound)
    params["fc_b"] = jax.random.uniform(
        next(keys), (1, 1), jnp.float32, -fc_bound, fc_bound)
    return params


if __name__ == "__main__":
    B, T, INPUT_SIZE, HIDDEN_SIZE, NUM_LAYERS = 2, 8, 16, 32, 3

    key = jax.random.PRNGKey(0)
    kx, kp = jax.random.split(key)
    x = jax.random.normal(kx, (B, T, INPUT_SIZE), jnp.float32)
    params = init_params(kp, INPUT_SIZE, HIDDEN_SIZE, NUM_LAYERS)

    # Pack/cast weights ONCE (cached across calls), outside the jitted forward.
    packed = pack_params(params, NUM_LAYERS)
    packed = tuple(jax.block_until_ready(p) for p in packed)

    fwd = jax.jit(solace_lstm_forward)
    out = jax.block_until_ready(fwd(x, packed))
    assert out.shape == (B,)

    ref = jax.block_until_ready(ref_forward(x, params, NUM_LAYERS))
    # Tolerance loosened vs the f32 reference because matmul inputs are bf16
    # (accumulation and all elementwise gate math remain f32).
    np.testing.assert_allclose(np.asarray(out), np.asarray(ref),
                               rtol=2e-2, atol=2e-2)

    print("KERNEL_OK")
</pallas_src>

<mosaic_0001>
module attributes {stable_mosaic.version = 11 : i64} {
  func.func @kernel(%arg0: memref<16x16xf32, #tpu.memory_space<vmem>>, %arg1: memref<16x256xbf16, #tpu.memory_space<vmem>>, %arg2: memref<1x256xf32, #tpu.memory_space<vmem>>, %arg3: memref<64x128xbf16, #tpu.memory_space<vmem>>, %arg4: memref<64x256xbf16, #tpu.memory_space<vmem>>, %arg5: memref<1x256xf32, #tpu.memory_space<vmem>>, %arg6: memref<64x128xbf16, #tpu.memory_space<vmem>>, %arg7: memref<64x256xbf16, #tpu.memory_space<vmem>>, %arg8: memref<1x256xf32, #tpu.memory_space<vmem>>, %arg9: memref<64x128xbf16, #tpu.memory_space<vmem>>, %arg10: memref<1x64xf32, #tpu.memory_space<vmem>>, %arg11: memref<1x1xf32, #tpu.memory_space<vmem>>, %arg12: memref<2x1xf32, #tpu.memory_space<vmem>>) attributes {dimension_semantics = [], scalar_prefetch = 0 : i64, scratch_operands = 0 : i64, tpu.core_type = #tpu.core_type<tc>} {
    %0 = tpu.iota {dimensions = array<i32: 0>} : vector<4x64xi32>
    %1 = tpu.iota {dimensions = array<i32: 1>} : vector<4x64xi32>
    %c2_i32 = arith.constant 2 : i32
    %2 = vector.broadcast %c2_i32 : i32 to vector<4x64xi32>
    %3 = arith.cmpi slt, %0, %2 : vector<4x64xi32>
    %c32_i32 = arith.constant 32 : i32
    %4 = vector.broadcast %c32_i32 : i32 to vector<4x64xi32>
    %5 = arith.cmpi slt, %1, %4 : vector<4x64xi32>
    %6 = arith.xori %3, %5 : vector<4x64xi1>
    %cst = arith.constant dense<true> : vector<4x64xi1>
    %7 = arith.xori %6, %cst : vector<4x64xi1>
    %8 = arith.extui %7 : vector<4x64xi1> to vector<4x64xi32>
    %9 = arith.sitofp %8 : vector<4x64xi32> to vector<4x64xf32>
    %c0 = arith.constant 0 : index
    %c0_0 = arith.constant 0 : index
    %10 = vector.load %arg0[%c0, %c0_0] : memref<16x16xf32, #tpu.memory_space<vmem>>, vector<16x16xf32>
    %11 = arith.truncf %10 : vector<16x16xf32> to vector<16x16xbf16>
    %c0_1 = arith.constant 0 : index
    %c0_2 = arith.constant 0 : index
    %12 = vector.load %arg1[%c0_1, %c0_2] : memref<16x256xbf16, #tpu.memory_space<vmem>>, vector<16x256xbf16>
    %c0_3 = arith.constant 0 : index
    %c0_4 = arith.constant 0 : index
    %13 = vector.load %arg3[%c0_3, %c0_4] : memref<64x128xbf16, #tpu.memory_space<vmem>>, vector<64x128xbf16>
    %c0_5 = arith.constant 0 : index
    %c0_6 = arith.constant 0 : index
    %14 = vector.load %arg2[%c0_5, %c0_6] : memref<1x256xf32, #tpu.memory_space<vmem>>, vector<1x256xf32>
    %cst_7 = arith.constant dense<0.000000e+00> : vector<16x256xf32>
    %15 = tpu.matmul %11, %12, %cst_7 {dimension_numbers = #tpu.dot_dimension_numbers<[1], [0], [0], [1], [0, 0, 1, 1], [], []>} : vector<16x16xbf16>, vector<16x256xbf16>, vector<16x256xf32> -> vector<16x256xf32>
    %16 = vector.broadcast %14 : vector<1x256xf32> to vector<16x256xf32>
    %17 = arith.addf %15, %16 : vector<16x256xf32>
    %18 = vector.extract_strided_slice %17 {offsets = [0, 0], sizes = [2, 128], strides = [1, 1]} : vector<16x256xf32> to vector<2x128xf32>
    %19 = vector.extract_strided_slice %17 {offsets = [14, 128], sizes = [2, 128], strides = [1, 1]} : vector<16x256xf32> to vector<2x128xf32>
    %20 = tpu.concatenate %18, %19 in 0 : vector<2x128xf32>, vector<2x128xf32> -> vector<4x128xf32>
    %21 = vector.extract_strided_slice %17 {offsets = [2, 0], sizes = [2, 128], strides = [1, 1]} : vector<16x256xf32> to vector<2x128xf32>
    %22 = vector.extract_strided_slice %17 {offsets = [12, 128], sizes = [2, 128], strides = [1, 1]} : vector<16x256xf32> to vector<2x128xf32>
    %23 = tpu.concatenate %21, %22 in 0 : vector<2x128xf32>, vector<2x128xf32> -> vector<4x128xf32>
    %24 = vector.extract_strided_slice %17 {offsets = [4, 0], sizes = [2, 128], strides = [1, 1]} : vector<16x256xf32> to vector<2x128xf32>
    %25 = vector.extract_strided_slice %17 {offsets = [10, 128], sizes = [2, 128], strides = [1, 1]} : vector<16x256xf32> to vector<2x128xf32>
    %26 = tpu.concatenate %24, %25 in 0 : vector<2x128xf32>, vector<2x128xf32> -> vector<4x128xf32>
    %27 = vector.extract_strided_slice %17 {offsets = [6, 0], sizes = [2, 128], strides = [1, 1]} : vector<16x256xf32> to vector<2x128xf32>
    %28 = vector.extract_strided_slice %17 {offsets = [8, 128], sizes = [2, 128], strides = [1, 1]} : vector<16x256xf32> to vector<2x128xf32>
    %29 = tpu.concatenate %27, %28 in 0 : vector<2x128xf32>, vector<2x128xf32> -> vector<4x128xf32>
    %30 = vector.extract_strided_slice %17 {offsets = [8, 0], sizes = [2, 128], strides = [1, 1]} : vector<16x256xf32> to vector<2x128xf32>
    %31 = vector.extract_strided_slice %17 {offsets = [6, 128], sizes = [2, 128], strides = [1, 1]} : vector<16x256xf32> to vector<2x128xf32>
    %32 = tpu.concatenate %30, %31 in 0 : vector<2x128xf32>, vector<2x128xf32> -> vector<4x128xf32>
    %33 = vector.extract_strided_slice %17 {offsets = [10, 0], sizes = [2, 128], strides = [1, 1]} : vector<16x256xf32> to vector<2x128xf32>
    %34 = vector.extract_strided_slice %17 {offsets = [4, 128], sizes = [2, 128], strides = [1, 1]} : vector<16x256xf32> to vector<2x128xf32>
    %35 = tpu.concatenate %33, %34 in 0 : vector<2x128xf32>, vector<2x128xf32> -> vector<4x128xf32>
    %36 = vector.extract_strided_slice %17 {offsets = [12, 0], sizes = [2, 128], strides = [1, 1]} : vector<16x256xf32> to vector<2x128xf32>
    %37 = vector.extract_strided_slice %17 {offsets = [2, 128], sizes = [2, 128], strides = [1, 1]} : vector<16x256xf32> to vector<2x128xf32>
    %38 = tpu.concatenate %36, %37 in 0 : vector<2x128xf32>, vector<2x128xf32> -> vector<4x128xf32>
    %39 = vector.extract_strided_slice %17 {offsets = [14, 0], sizes = [2, 128], strides = [1, 1]} : vector<16x256xf32> to vector<2x128xf32>
    %40 = vector.extract_strided_slice %17 {offsets = [0, 128], sizes = [2, 128], strides = [1, 1]} : vector<16x256xf32> to vector<2x128xf32>
    %41 = tpu.concatenate %39, %40 in 0 : vector<2x128xf32>, vector<2x128xf32> -> vector<4x128xf32>
    %cst_8 = arith.constant 0.000000e+00 : bf16
    %42 = vector.broadcast %cst_8 : bf16 to vector<4x64xbf16>
    %cst_9 = arith.constant 0.000000e+00 : f32
    %43 = vector.broadcast %cst_9 : f32 to vector<4x32xf32>
    %cst_10 = arith.constant dense<0.000000e+00> : vector<4x128xf32>
    %44 = tpu.matmul %42, %13, %cst_10 {dimension_numbers = #tpu.dot_dimension_numbers<[1], [0], [0], [1], [0, 0, 1, 1], [], []>} : vector<4x64xbf16>, vector<64x128xbf16>, vector<4x128xf32> -> vector<4x128xf32>
    %45 = arith.addf %20, %44 : vector<4x128xf32>
    %46 = arith.negf %45 : vector<4x128xf32>
    %47 = math.exp %46 : vector<4x128xf32>
    %cst_11 = arith.constant 1.000000e+00 : f32
    %48 = vector.broadcast %cst_11 : f32 to vector<4x128xf32>
    %49 = arith.addf %48, %47 : vector<4x128xf32>
    %50 = arith.divf %48, %49 : vector<4x128xf32>
    %51 = math.tanh %45 : vector<4x128xf32>
    %52 = vector.extract_strided_slice %50 {offsets = [0, 0], sizes = [4, 32], strides = [1, 1]} : vector<4x128xf32> to vector<4x32xf32>
    %53 = vector.extract_strided_slice %50 {offsets = [0, 32], sizes = [4, 32], strides = [1, 1]} : vector<4x128xf32> to vector<4x32xf32>
    %54 = vector.extract_strided_slice %51 {offsets = [0, 64], sizes = [4, 32], strides = [1, 1]} : vector<4x128xf32> to vector<4x32xf32>
    %55 = vector.extract_strided_slice %50 {offsets = [0, 96], sizes = [4, 32], strides = [1, 1]} : vector<4x128xf32> to vector<4x32xf32>
    %56 = arith.mulf %53, %43 : vector<4x32xf32>
    %57 = arith.mulf %52, %54 : vector<4x32xf32>
    %58 = arith.addf %56, %57 : vector<4x32xf32>
    %59 = math.tanh %58 : vector<4x32xf32>
    %60 = arith.mulf %55, %59 : vector<4x32xf32>
    %61 = tpu.concatenate %60, %60 in 1 : vector<4x32xf32>, vector<4x32xf32> -> vector<4x64xf32>
    %62 = arith.mulf %61, %9 : vector<4x64xf32>
    %63 = arith.truncf %62 : vector<4x64xf32> to vector<4x64xbf16>
    %cst_12 = arith.constant dense<0.000000e+00> : vector<4x128xf32>
    %64 = tpu.matmul %63, %13, %cst_12 {dimension_numbers = #tpu.dot_dimension_numbers<[1], [0], [0], [1], [0, 0, 1, 1], [], []>} : vector<4x64xbf16>, vector<64x128xbf16>, vector<4x128xf32> -> vector<4x128xf32>
    %65 = arith.addf %23, %64 : vector<4x128xf32>
    %66 = arith.negf %65 : vector<4x128xf32>
    %67 = math.exp %66 : vector<4x128xf32>
    %cst_13 = arith.constant 1.000000e+00 : f32
    %68 = vector.broadcast %cst_13 : f32 to vector<4x128xf32>
    %69 = arith.addf %68, %67 : vector<4x128xf32>
    %70 = arith.divf %68, %69 : vector<4x128xf32>
    %71 = math.tanh %65 : vector<4x128xf32>
    %72 = vector.extract_strided_slice %70 {offsets = [0, 0], sizes = [4, 32], strides = [1, 1]} : vector<4x128xf32> to vector<4x32xf32>
    %73 = vector.extract_strided_slice %70 {offsets = [0, 32], sizes = [4, 32], strides = [1, 1]} : vector<4x128xf32> to vector<4x32xf32>
    %74 = vector.extract_strided_slice %71 {offsets = [0, 64], sizes = [4, 32], strides = [1, 1]} : vector<4x128xf32> to vector<4x32xf32>
    %75 = vector.extract_strided_slice %70 {offsets = [0, 96], sizes = [4, 32], strides = [1, 1]} : vector<4x128xf32> to vector<4x32xf32>
    %76 = arith.mulf %73, %58 : vector<4x32xf32>
    %77 = arith.mulf %72, %74 : vector<4x32xf32>
    %78 = arith.addf %76, %77 : vector<4x32xf32>
    %79 = math.tanh %78 : vector<4x32xf32>
    %80 = arith.mulf %75, %79 : vector<4x32xf32>
    %81 = tpu.concatenate %80, %80 in 1 : vector<4x32xf32>, vector<4x32xf32> -> vector<4x64xf32>
    %82 = arith.mulf %81, %9 : vector<4x64xf32>
    %83 = arith.truncf %82 : vector<4x64xf32> to vector<4x64xbf16>
    %cst_14 = arith.constant dense<0.000000e+00> : vector<4x128xf32>
    %84 = tpu.matmul %83, %13, %cst_14 {dimension_numbers = #tpu.dot_dimension_numbers<[1], [0], [0], [1], [0, 0, 1, 1], [], []>} : vector<4x64xbf16>, vector<64x128xbf16>, vector<4x128xf32> -> vector<4x128xf32>
    %85 = arith.addf %26, %84 : vector<4x128xf32>
    %86 = arith.negf %85 : vector<4x128xf32>
    %87 = math.exp %86 : vector<4x128xf32>
    %cst_15 = arith.constant 1.000000e+00 : f32
    %88 = vector.broadcast %cst_15 : f32 to vector<4x128xf32>
    %89 = arith.addf %88, %87 : vector<4x128xf32>
    %90 = arith.divf %88, %89 : vector<4x128xf32>
    %91 = math.tanh %85 : vector<4x128xf32>
    %92 = vector.extract_strided_slice %90 {offsets = [0, 0], sizes = [4, 32], strides = [1, 1]} : vector<4x128xf32> to vector<4x32xf32>
    %93 = vector.extract_strided_slice %90 {offsets = [0, 32], sizes = [4, 32], strides = [1, 1]} : vector<4x128xf32> to vector<4x32xf32>
    %94 = vector.extract_strided_slice %91 {offsets = [0, 64], sizes = [4, 32], strides = [1, 1]} : vector<4x128xf32> to vector<4x32xf32>
    %95 = vector.extract_strided_slice %90 {offsets = [0, 96], sizes = [4, 32], strides = [1, 1]} : vector<4x128xf32> to vector<4x32xf32>
    %96 = arith.mulf %93, %78 : vector<4x32xf32>
    %97 = arith.mulf %92, %94 : vector<4x32xf32>
    %98 = arith.addf %96, %97 : vector<4x32xf32>
    %99 = math.tanh %98 : vector<4x32xf32>
    %100 = arith.mulf %95, %99 : vector<4x32xf32>
    %101 = tpu.concatenate %100, %100 in 1 : vector<4x32xf32>, vector<4x32xf32> -> vector<4x64xf32>
    %102 = arith.mulf %101, %9 : vector<4x64xf32>
    %103 = arith.truncf %102 : vector<4x64xf32> to vector<4x64xbf16>
    %cst_16 = arith.constant dense<0.000000e+00> : vector<4x128xf32>
    %104 = tpu.matmul %103, %13, %cst_16 {dimension_numbers = #tpu.dot_dimension_numbers<[1], [0], [0], [1], [0, 0, 1, 1], [], []>} : vector<4x64xbf16>, vector<64x128xbf16>, vector<4x128xf32> -> vector<4x128xf32>
    %105 = arith.addf %29, %104 : vector<4x128xf32>
    %106 = arith.negf %105 : vector<4x128xf32>
    %107 = math.exp %106 : vector<4x128xf32>
    %cst_17 = arith.constant 1.000000e+00 : f32
    %108 = vector.broadcast %cst_17 : f32 to vector<4x128xf32>
    %109 = arith.addf %108, %107 : vector<4x128xf32>
    %110 = arith.divf %108, %109 : vector<4x128xf32>
    %111 = math.tanh %105 : vector<4x128xf32>
    %112 = vector.extract_strided_slice %110 {offsets = [0, 0], sizes = [4, 32], strides = [1, 1]} : vector<4x128xf32> to vector<4x32xf32>
    %113 = vector.extract_strided_slice %110 {offsets = [0, 32], sizes = [4, 32], strides = [1, 1]} : vector<4x128xf32> to vector<4x32xf32>
    %114 = vector.extract_strided_slice %111 {offsets = [0, 64], sizes = [4, 32], strides = [1, 1]} : vector<4x128xf32> to vector<4x32xf32>
    %115 = vector.extract_strided_slice %110 {offsets = [0, 96], sizes = [4, 32], strides = [1, 1]} : vector<4x128xf32> to vector<4x32xf32>
    %116 = arith.mulf %113, %98 : vector<4x32xf32>
    %117 = arith.mulf %112, %114 : vector<4x32xf32>
    %118 = arith.addf %116, %117 : vector<4x32xf32>
    %119 = math.tanh %118 : vector<4x32xf32>
    %120 = arith.mulf %115, %119 : vector<4x32xf32>
    %121 = tpu.concatenate %120, %120 in 1 : vector<4x32xf32>, vector<4x32xf32> -> vector<4x64xf32>
    %122 = arith.mulf %121, %9 : vector<4x64xf32>
    %123 = arith.truncf %122 : vector<4x64xf32> to vector<4x64xbf16>
    %cst_18 = arith.constant dense<0.000000e+00> : vector<4x128xf32>
    %124 = tpu.matmul %123, %13, %cst_18 {dimension_numbers = #tpu.dot_dimension_numbers<[1], [0], [0], [1], [0, 0, 1, 1], [], []>} : vector<4x64xbf16>, vector<64x128xbf16>, vector<4x128xf32> -> vector<4x128xf32>
    %125 = arith.addf %32, %124 : vector<4x128xf32>
    %126 = arith.negf %125 : vector<4x128xf32>
    %127 = math.exp %126 : vector<4x128xf32>
    %cst_19 = arith.constant 1.000000e+00 : f32
    %128 = vector.broadcast %cst_19 : f32 to vector<4x128xf32>
    %129 = arith.addf %128, %127 : vector<4x128xf32>
    %130 = arith.divf %128, %129 : vector<4x128xf32>
    %131 = math.tanh %125 : vector<4x128xf32>
    %132 = vector.extract_strided_slice %130 {offsets = [0, 0], sizes = [4, 32], strides = [1, 1]} : vector<4x128xf32> to vector<4x32xf32>
    %133 = vector.extract_strided_slice %130 {offsets = [0, 32], sizes = [4, 32], strides = [1, 1]} : vector<4x128xf32> to vector<4x32xf32>
    %134 = vector.extract_strided_slice %131 {offsets = [0, 64], sizes = [4, 32], strides = [1, 1]} : vector<4x128xf32> to vector<4x32xf32>
    %135 = vector.extract_strided_slice %130 {offsets = [0, 96], sizes = [4, 32], strides = [1, 1]} : vector<4x128xf32> to vector<4x32xf32>
    %136 = arith.mulf %133, %118 : vector<4x32xf32>
    %137 = arith.mulf %132, %134 : vector<4x32xf32>
    %138 = arith.addf %136, %137 : vector<4x32xf32>
    %139 = math.tanh %138 : vector<4x32xf32>
    %140 = arith.mulf %135, %139 : vector<4x32xf32>
    %141 = tpu.concatenate %140, %140 in 1 : vector<4x32xf32>, vector<4x32xf32> -> vector<4x64xf32>
    %142 = arith.mulf %141, %9 : vector<4x64xf32>
    %143 = arith.truncf %142 : vector<4x64xf32> to vector<4x64xbf16>
    %cst_20 = arith.constant dense<0.000000e+00> : vector<4x128xf32>
    %144 = tpu.matmul %143, %13, %cst_20 {dimension_numbers = #tpu.dot_dimension_numbers<[1], [0], [0], [1], [0, 0, 1, 1], [], []>} : vector<4x64xbf16>, vector<64x128xbf16>, vector<4x128xf32> -> vector<4x128xf32>
    %145 = arith.addf %35, %144 : vector<4x128xf32>
    %146 = arith.negf %145 : vector<4x128xf32>
    %147 = math.exp %146 : vector<4x128xf32>
    %cst_21 = arith.constant 1.000000e+00 : f32
    %148 = vector.broadcast %cst_21 : f32 to vector<4x128xf32>
    %149 = arith.addf %148, %147 : vector<4x128xf32>
    %150 = arith.divf %148, %149 : vector<4x128xf32>
    %151 = math.tanh %145 : vector<4x128xf32>
    %152 = vector.extract_strided_slice %150 {offsets = [0, 0], sizes = [4, 32], strides = [1, 1]} : vector<4x128xf32> to vector<4x32xf32>
    %153 = vector.extract_strided_slice %150 {offsets = [0, 32], sizes = [4, 32], strides = [1, 1]} : vector<4x128xf32> to vector<4x32xf32>
    %154 = vector.extract_strided_slice %151 {offsets = [0, 64], sizes = [4, 32], strides = [1, 1]} : vector<4x128xf32> to vector<4x32xf32>
    %155 = vector.extract_strided_slice %150 {offsets = [0, 96], sizes = [4, 32], strides = [1, 1]} : vector<4x128xf32> to vector<4x32xf32>
    %156 = arith.mulf %153, %138 : vector<4x32xf32>
    %157 = arith.mulf %152, %154 : vector<4x32xf32>
    %158 = arith.addf %156, %157 : vector<4x32xf32>
    %159 = math.tanh %158 : vector<4x32xf32>
    %160 = arith.mulf %155, %159 : vector<4x32xf32>
    %161 = tpu.concatenate %160, %160 in 1 : vector<4x32xf32>, vector<4x32xf32> -> vector<4x64xf32>
    %162 = arith.mulf %161, %9 : vector<4x64xf32>
    %163 = arith.truncf %162 : vector<4x64xf32> to vector<4x64xbf16>
    %cst_22 = arith.constant dense<0.000000e+00> : vector<4x128xf32>
    %164 = tpu.matmul %163, %13, %cst_22 {dimension_numbers = #tpu.dot_dimension_numbers<[1], [0], [0], [1], [0, 0, 1, 1], [], []>} : vector<4x64xbf16>, vector<64x128xbf16>, vector<4x128xf32> -> vector<4x128xf32>
    %165 = arith.addf %38, %164 : vector<4x128xf32>
    %166 = arith.negf %165 : vector<4x128xf32>
    %167 = math.exp %166 : vector<4x128xf32>
    %cst_23 = arith.constant 1.000000e+00 : f32
    %168 = vector.broadcast %cst_23 : f32 to vector<4x128xf32>
    %169 = arith.addf %168, %167 : vector<4x128xf32>
    %170 = arith.divf %168, %169 : vector<4x128xf32>
    %171 = math.tanh %165 : vector<4x128xf32>
    %172 = vector.extract_strided_slice %170 {offsets = [0, 0], sizes = [4, 32], strides = [1, 1]} : vector<4x128xf32> to vector<4x32xf32>
    %173 = vector.extract_strided_slice %170 {offsets = [0, 32], sizes = [4, 32], strides = [1, 1]} : vector<4x128xf32> to vector<4x32xf32>
    %174 = vector.extract_strided_slice %171 {offsets = [0, 64], sizes = [4, 32], strides = [1, 1]} : vector<4x128xf32> to vector<4x32xf32>
    %175 = vector.extract_strided_slice %170 {offsets = [0, 96], sizes = [4, 32], strides = [1, 1]} : vector<4x128xf32> to vector<4x32xf32>
    %176 = arith.mulf %173, %158 : vector<4x32xf32>
    %177 = arith.mulf %172, %174 : vector<4x32xf32>
    %178 = arith.addf %176, %177 : vector<4x32xf32>
    %179 = math.tanh %178 : vector<4x32xf32>
    %180 = arith.mulf %175, %179 : vector<4x32xf32>
    %181 = tpu.concatenate %180, %180 in 1 : vector<4x32xf32>, vector<4x32xf32> -> vector<4x64xf32>
    %182 = arith.mulf %181, %9 : vector<4x64xf32>
    %183 = arith.truncf %182 : vector<4x64xf32> to vector<4x64xbf16>
    %cst_24 = arith.constant dense<0.000000e+00> : vector<4x128xf32>
    %184 = tpu.matmul %183, %13, %cst_24 {dimension_numbers = #tpu.dot_dimension_numbers<[1], [0], [0], [1], [0, 0, 1, 1], [], []>} : vector<4x64xbf16>, vector<64x128xbf16>, vector<4x128xf32> -> vector<4x128xf32>
    %185 = arith.addf %41, %184 : vector<4x128xf32>
    %186 = arith.negf %185 : vector<4x128xf32>
    %187 = math.exp %186 : vector<4x128xf32>
    %cst_25 = arith.constant 1.000000e+00 : f32
    %188 = vector.broadcast %cst_25 : f32 to vector<4x128xf32>
    %189 = arith.addf %188, %187 : vector<4x128xf32>
    %190 = arith.divf %188, %189 : vector<4x128xf32>
    %191 = math.tanh %185 : vector<4x128xf32>
    %192 = vector.extract_strided_slice %190 {offsets = [0, 0], sizes = [4, 32], strides = [1, 1]} : vector<4x128xf32> to vector<4x32xf32>
    %193 = vector.extract_strided_slice %190 {offsets = [0, 32], sizes = [4, 32], strides = [1, 1]} : vector<4x128xf32> to vector<4x32xf32>
    %194 = vector.extract_strided_slice %191 {offsets = [0, 64], sizes = [4, 32], strides = [1, 1]} : vector<4x128xf32> to vector<4x32xf32>
    %195 = vector.extract_strided_slice %190 {offsets = [0, 96], sizes = [4, 32], strides = [1, 1]} : vector<4x128xf32> to vector<4x32xf32>
    %196 = arith.mulf %193, %178 : vector<4x32xf32>
    %197 = arith.mulf %192, %194 : vector<4x32xf32>
    %198 = arith.addf %196, %197 : vector<4x32xf32>
    %199 = math.tanh %198 : vector<4x32xf32>
    %200 = arith.mulf %195, %199 : vector<4x32xf32>
    %201 = vector.extract_strided_slice %60 {offsets = [0, 0], sizes = [2, 32], strides = [1, 1]} : vector<4x32xf32> to vector<2x32xf32>
    %202 = vector.extract_strided_slice %200 {offsets = [2, 0], sizes = [2, 32], strides = [1, 1]} : vector<4x32xf32> to vector<2x32xf32>
    %203 = tpu.concatenate %201, %202 in 1 : vector<2x32xf32>, vector<2x32xf32> -> vector<2x64xf32>
    %204 = vector.extract_strided_slice %80 {offsets = [0, 0], sizes = [2, 32], strides = [1, 1]} : vector<4x32xf32> to vector<2x32xf32>
    %205 = vector.extract_strided_slice %180 {offsets = [2, 0], sizes = [2, 32], strides = [1, 1]} : vector<4x32xf32> to vector<2x32xf32>
    %206 = tpu.concatenate %204, %205 in 1 : vector<2x32xf32>, vector<2x32xf32> -> vector<2x64xf32>
    %207 = vector.extract_strided_slice %100 {offsets = [0, 0], sizes = [2, 32], strides = [1, 1]} : vector<4x32xf32> to vector<2x32xf32>
    %208 = vector.extract_strided_slice %160 {offsets = [2, 0], sizes = [2, 32], strides = [1, 1]} : vector<4x32xf32> to vector<2x32xf32>
    %209 = tpu.concatenate %207, %208 in 1 : vector<2x32xf32>, vector<2x32xf32> -> vector<2x64xf32>
    %210 = vector.extract_strided_slice %120 {offsets = [0, 0], sizes = [2, 32], strides = [1, 1]} : vector<4x32xf32> to vector<2x32xf32>
    %211 = vector.extract_strided_slice %140 {offsets = [2, 0], sizes = [2, 32], strides = [1, 1]} : vector<4x32xf32> to vector<2x32xf32>
    %212 = tpu.concatenate %210, %211 in 1 : vector<2x32xf32>, vector<2x32xf32> -> vector<2x64xf32>
    %213 = vector.extract_strided_slice %140 {offsets = [0, 0], sizes = [2, 32], strides = [1, 1]} : vector<4x32xf32> to vector<2x32xf32>
    %214 = vector.extract_strided_slice %120 {offsets = [2, 0], sizes = [2, 32], strides = [1, 1]} : vector<4x32xf32> to vector<2x32xf32>
    %215 = tpu.concatenate %213, %214 in 1 : vector<2x32xf32>, vector<2x32xf32> -> vector<2x64xf32>
    %216 = vector.extract_strided_slice %160 {offsets = [0, 0], sizes = [2, 32], strides = [1, 1]} : vector<4x32xf32> to vector<2x32xf32>
    %217 = vector.extract_strided_slice %100 {offsets = [2, 0], sizes = [2, 32], strides = [1, 1]} : vector<4x32xf32> to vector<2x32xf32>
    %218 = tpu.concatenate %216, %217 in 1 : vector<2x32xf32>, vector<2x32xf32> -> vector<2x64xf32>
    %219 = vector.extract_strided_slice %180 {offsets = [0, 0], sizes = [2, 32], strides = [1, 1]} : vector<4x32xf32> to vector<2x32xf32>
    %220 = vector.extract_strided_slice %80 {offsets = [2, 0], sizes = [2, 32], strides = [1, 1]} : vector<4x32xf32> to vector<2x32xf32>
    %221 = tpu.concatenate %219, %220 in 1 : vector<2x32xf32>, vector<2x32xf32> -> vector<2x64xf32>
    %222 = vector.extract_strided_slice %200 {offsets = [0, 0], sizes = [2, 32], strides = [1, 1]} : vector<4x32xf32> to vector<2x32xf32>
    %223 = vector.extract_strided_slice %60 {offsets = [2, 0], sizes = [2, 32], strides = [1, 1]} : vector<4x32xf32> to vector<2x32xf32>
    %224 = tpu.concatenate %222, %223 in 1 : vector<2x32xf32>, vector<2x32xf32> -> vector<2x64xf32>
    %225 = tpu.concatenate %203, %206, %209, %212, %215, %218, %221, %224 in 0 : vector<2x64xf32>, vector<2x64xf32>, vector<2x64xf32>, vector<2x64xf32>, vector<2x64xf32>, vector<2x64xf32>, vector<2x64xf32>, vector<2x64xf32> -> vector<16x64xf32>
    %226 = arith.truncf %225 : vector<16x64xf32> to vector<16x64xbf16>
    %c0_26 = arith.constant 0 : index
    %c0_27 = arith.constant 0 : index
    %227 = vector.load %arg4[%c0_26, %c0_27] : memref<64x256xbf16, #tpu.memory_space<vmem>>, vector<64x256xbf16>
    %c0_28 = arith.constant 0 : index
    %c0_29 = arith.constant 0 : index
    %228 = vector.load %arg6[%c0_28, %c0_29] : memref<64x128xbf16, #tpu.memory_space<vmem>>, vector<64x128xbf16>
    %c0_30 = arith.constant 0 : index
    %c0_31 = arith.constant 0 : index
    %229 = vector.load %arg5[%c0_30, %c0_31] : memref<1x256xf32, #tpu.memory_space<vmem>>, vector<1x256xf32>
    %cst_32 = arith.constant dense<0.000000e+00> : vector<16x256xf32>
    %230 = tpu.matmul %226, %227, %cst_32 {dimension_numbers = #tpu.dot_dimension_numbers<[1], [0], [0], [1], [0, 0, 1, 1], [], []>} : vector<16x64xbf16>, vector<64x256xbf16>, vector<16x256xf32> -> vector<16x256xf32>
    %231 = vector.broadcast %229 : vector<1x256xf32> to vector<16x256xf32>
    %232 = arith.addf %230, %231 : vector<16x256xf32>
    %233 = vector.extract_strided_slice %232 {offsets = [0, 0], sizes = [2, 128], strides = [1, 1]} : vector<16x256xf32> to vector<2x128xf32>
    %234 = vector.extract_strided_slice %232 {offsets = [14, 128], sizes = [2, 128], strides = [1, 1]} : vector<16x256xf32> to vector<2x128xf32>
    %235 = tpu.concatenate %233, %234 in 0 : vector<2x128xf32>, vector<2x128xf32> -> vector<4x128xf32>
    %236 = vector.extract_strided_slice %232 {offsets = [2, 0], sizes = [2, 128], strides = [1, 1]} : vector<16x256xf32> to vector<2x128xf32>
    %237 = vector.extract_strided_slice %232 {offsets = [12, 128], sizes = [2, 128], strides = [1, 1]} : vector<16x256xf32> to vector<2x128xf32>
    %238 = tpu.concatenate %236, %237 in 0 : vector<2x128xf32>, vector<2x128xf32> -> vector<4x128xf32>
    %239 = vector.extract_strided_slice %232 {offsets = [4, 0], sizes = [2, 128], strides = [1, 1]} : vector<16x256xf32> to vector<2x128xf32>
    %240 = vector.extract_strided_slice %232 {offsets = [10, 128], sizes = [2, 128], strides = [1, 1]} : vector<16x256xf32> to vector<2x128xf32>
    %241 = tpu.concatenate %239, %240 in 0 : vector<2x128xf32>, vector<2x128xf32> -> vector<4x128xf32>
    %242 = vector.extract_strided_slice %232 {offsets = [6, 0], sizes = [2, 128], strides = [1, 1]} : vector<16x256xf32> to vector<2x128xf32>
    %243 = vector.extract_strided_slice %232 {offsets = [8, 128], sizes = [2, 128], strides = [1, 1]} : vector<16x256xf32> to vector<2x128xf32>
    %244 = tpu.concatenate %242, %243 in 0 : vector<2x128xf32>, vector<2x128xf32> -> vector<4x128xf32>
    %245 = vector.extract_strided_slice %232 {offsets = [8, 0], sizes = [2, 128], strides = [1, 1]} : vector<16x256xf32> to vector<2x128xf32>
    %246 = vector.extract_strided_slice %232 {offsets = [6, 128], sizes = [2, 128], strides = [1, 1]} : vector<16x256xf32> to vector<2x128xf32>
    %247 = tpu.concatenate %245, %246 in 0 : vector<2x128xf32>, vector<2x128xf32> -> vector<4x128xf32>
    %248 = vector.extract_strided_slice %232 {offsets = [10, 0], sizes = [2, 128], strides = [1, 1]} : vector<16x256xf32> to vector<2x128xf32>
    %249 = vector.extract_strided_slice %232 {offsets = [4, 128], sizes = [2, 128], strides = [1, 1]} : vector<16x256xf32> to vector<2x128xf32>
    %250 = tpu.concatenate %248, %249 in 0 : vector<2x128xf32>, vector<2x128xf32> -> vector<4x128xf32>
    %251 = vector.extract_strided_slice %232 {offsets = [12, 0], sizes = [2, 128], strides = [1, 1]} : vector<16x256xf32> to vector<2x128xf32>
    %252 = vector.extract_strided_slice %232 {offsets = [2, 128], sizes = [2, 128], strides = [1, 1]} : vector<16x256xf32> to vector<2x128xf32>
    %253 = tpu.concatenate %251, %252 in 0 : vector<2x128xf32>, vector<2x128xf32> -> vector<4x128xf32>
    %254 = vector.extract_strided_slice %232 {offsets = [14, 0], sizes = [2, 128], strides = [1, 1]} : vector<16x256xf32> to vector<2x128xf32>
    %255 = vector.extract_strided_slice %232 {offsets = [0, 128], sizes = [2, 128], strides = [1, 1]} : vector<16x256xf32> to vector<2x128xf32>
    %256 = tpu.concatenate %254, %255 in 0 : vector<2x128xf32>, vector<2x128xf32> -> vector<4x128xf32>
    %cst_33 = arith.constant 0.000000e+00 : bf16
    %257 = vector.broadcast %cst_33 : bf16 to vector<4x64xbf16>
    %cst_34 = arith.constant 0.000000e+00 : f32
    %258 = vector.broadcast %cst_34 : f32 to vector<4x32xf32>
    %cst_35 = arith.constant dense<0.000000e+00> : vector<4x128xf32>
    %259 = tpu.matmul %257, %228, %cst_35 {dimension_numbers = #tpu.dot_dimension_numbers<[1], [0], [0], [1], [0, 0, 1, 1], [], []>} : vector<4x64xbf16>, vector<64x128xbf16>, vector<4x128xf32> -> vector<4x128xf32>
    %260 = arith.addf %235, %259 : vector<4x128xf32>
    %261 = arith.negf %260 : vector<4x128xf32>
    %262 = math.exp %261 : vector<4x128xf32>
    %cst_36 = arith.constant 1.000000e+00 : f32
    %263 = vector.broadcast %cst_36 : f32 to vector<4x128xf32>
    %264 = arith.addf %263, %262 : vector<4x128xf32>
    %265 = arith.divf %263, %264 : vector<4x128xf32>
    %266 = math.tanh %260 : vector<4x128xf32>
    %267 = vector.extract_strided_slice %265 {offsets = [0, 0], sizes = [4, 32], strides = [1, 1]} : vector<4x128xf32> to vector<4x32xf32>
    %268 = vector.extract_strided_slice %265 {offsets = [0, 32], sizes = [4, 32], strides = [1, 1]} : vector<4x128xf32> to vector<4x32xf32>
    %269 = vector.extract_strided_slice %266 {offsets = [0, 64], sizes = [4, 32], strides = [1, 1]} : vector<4x128xf32> to vector<4x32xf32>
    %270 = vector.extract_strided_slice %265 {offsets = [0, 96], sizes = [4, 32], strides = [1, 1]} : vector<4x128xf32> to vector<4x32xf32>
    %271 = arith.mulf %268, %258 : vector<4x32xf32>
    %272 = arith.mulf %267, %269 : vector<4x32xf32>
    %273 = arith.addf %271, %272 : vector<4x32xf32>
    %274 = math.tanh %273 : vector<4x32xf32>
    %275 = arith.mulf %270, %274 : vector<4x32xf32>
    %276 = tpu.concatenate %275, %275 in 1 : vector<4x32xf32>, vector<4x32xf32> -> vector<4x64xf32>
    %277 = arith.mulf %276, %9 : vector<4x64xf32>
    %278 = arith.truncf %277 : vector<4x64xf32> to vector<4x64xbf16>
    %cst_37 = arith.constant dense<0.000000e+00> : vector<4x128xf32>
    %279 = tpu.matmul %278, %228, %cst_37 {dimension_numbers = #tpu.dot_dimension_numbers<[1], [0], [0], [1], [0, 0, 1, 1], [], []>} : vector<4x64xbf16>, vector<64x128xbf16>, vector<4x128xf32> -> vector<4x128xf32>
    %280 = arith.addf %238, %279 : vector<4x128xf32>
    %281 = arith.negf %280 : vector<4x128xf32>
    %282 = math.exp %281 : vector<4x128xf32>
    %cst_38 = arith.constant 1.000000e+00 : f32
    %283 = vector.broadcast %cst_38 : f32 to vector<4x128xf32>
    %284 = arith.addf %283, %282 : vector<4x128xf32>
    %285 = arith.divf %283, %284 : vector<4x128xf32>
    %286 = math.tanh %280 : vector<4x128xf32>
    %287 = vector.extract_strided_slice %285 {offsets = [0, 0], sizes = [4, 32], strides = [1, 1]} : vector<4x128xf32> to vector<4x32xf32>
    %288 = vector.extract_strided_slice %285 {offsets = [0, 32], sizes = [4, 32], strides = [1, 1]} : vector<4x128xf32> to vector<4x32xf32>
    %289 = vector.extract_strided_slice %286 {offsets = [0, 64], sizes = [4, 32], strides = [1, 1]} : vector<4x128xf32> to vector<4x32xf32>
    %290 = vector.extract_strided_slice %285 {offsets = [0, 96], sizes = [4, 32], strides = [1, 1]} : vector<4x128xf32> to vector<4x32xf32>
    %291 = arith.mulf %288, %273 : vector<4x32xf32>
    %292 = arith.mulf %287, %289 : vector<4x32xf32>
    %293 = arith.addf %291, %292 : vector<4x32xf32>
    %294 = math.tanh %293 : vector<4x32xf32>
    %295 = arith.mulf %290, %294 : vector<4x32xf32>
    %296 = tpu.concatenate %295, %295 in 1 : vector<4x32xf32>, vector<4x32xf32> -> vector<4x64xf32>
    %297 = arith.mulf %296, %9 : vector<4x64xf32>
    %298 = arith.truncf %297 : vector<4x64xf32> to vector<4x64xbf16>
    %cst_39 = arith.constant dense<0.000000e+00> : vector<4x128xf32>
    %299 = tpu.matmul %298, %228, %cst_39 {dimension_numbers = #tpu.dot_dimension_numbers<[1], [0], [0], [1], [0, 0, 1, 1], [], []>} : vector<4x64xbf16>, vector<64x128xbf16>, vector<4x128xf32> -> vector<4x128xf32>
    %300 = arith.addf %241, %299 : vector<4x128xf32>
    %301 = arith.negf %300 : vector<4x128xf32>
    %302 = math.exp %301 : vector<4x128xf32>
    %cst_40 = arith.constant 1.000000e+00 : f32
    %303 = vector.broadcast %cst_40 : f32 to vector<4x128xf32>
    %304 = arith.addf %303, %302 : vector<4x128xf32>
    %305 = arith.divf %303, %304 : vector<4x128xf32>
    %306 = math.tanh %300 : vector<4x128xf32>
    %307 = vector.extract_strided_slice %305 {offsets = [0, 0], sizes = [4, 32], strides = [1, 1]} : vector<4x128xf32> to vector<4x32xf32>
    %308 = vector.extract_strided_slice %305 {offsets = [0, 32], sizes = [4, 32], strides = [1, 1]} : vector<4x128xf32> to vector<4x32xf32>
    %309 = vector.extract_strided_slice %306 {offsets = [0, 64], sizes = [4, 32], strides = [1, 1]} : vector<4x128xf32> to vector<4x32xf32>
    %310 = vector.extract_strided_slice %305 {offsets = [0, 96], sizes = [4, 32], strides = [1, 1]} : vector<4x128xf32> to vector<4x32xf32>
    %311 = arith.mulf %308, %293 : vector<4x32xf32>
    %312 = arith.mulf %307, %309 : vector<4x32xf32>
    %313 = arith.addf %311, %312 : vector<4x32xf32>
    %314 = math.tanh %313 : vector<4x32xf32>
    %315 = arith.mulf %310, %314 : vector<4x32xf32>
    %316 = tpu.concatenate %315, %315 in 1 : vector<4x32xf32>, vector<4x32xf32> -> vector<4x64xf32>
    %317 = arith.mulf %316, %9 : vector<4x64xf32>
    %318 = arith.truncf %317 : vector<4x64xf32> to vector<4x64xbf16>
    %cst_41 = arith.constant dense<0.000000e+00> : vector<4x128xf32>
    %319 = tpu.matmul %318, %228, %cst_41 {dimension_numbers = #tpu.dot_dimension_numbers<[1], [0], [0], [1], [0, 0, 1, 1], [], []>} : vector<4x64xbf16>, vector<64x128xbf16>, vector<4x128xf32> -> vector<4x128xf32>
    %320 = arith.addf %244, %319 : vector<4x128xf32>
    %321 = arith.negf %320 : vector<4x128xf32>
    %322 = math.exp %321 : vector<4x128xf32>
    %cst_42 = arith.constant 1.000000e+00 : f32
    %323 = vector.broadcast %cst_42 : f32 to vector<4x128xf32>
    %324 = arith.addf %323, %322 : vector<4x128xf32>
    %325 = arith.divf %323, %324 : vector<4x128xf32>
    %326 = math.tanh %320 : vector<4x128xf32>
    %327 = vector.extract_strided_slice %325 {offsets = [0, 0], sizes = [4, 32], strides = [1, 1]} : vector<4x128xf32> to vector<4x32xf32>
    %328 = vector.extract_strided_slice %325 {offsets = [0, 32], sizes = [4, 32], strides = [1, 1]} : vector<4x128xf32> to vector<4x32xf32>
    %329 = vector.extract_strided_slice %326 {offsets = [0, 64], sizes = [4, 32], strides = [1, 1]} : vector<4x128xf32> to vector<4x32xf32>
    %330 = vector.extract_strided_slice %325 {offsets = [0, 96], sizes = [4, 32], strides = [1, 1]} : vector<4x128xf32> to vector<4x32xf32>
    %331 = arith.mulf %328, %313 : vector<4x32xf32>
    %332 = arith.mulf %327, %329 : vector<4x32xf32>
    %333 = arith.addf %331, %332 : vector<4x32xf32>
    %334 = math.tanh %333 : vector<4x32xf32>
    %335 = arith.mulf %330, %334 : vector<4x32xf32>
    %336 = tpu.concatenate %335, %335 in 1 : vector<4x32xf32>, vector<4x32xf32> -> vector<4x64xf32>
    %337 = arith.mulf %336, %9 : vector<4x64xf32>
    %338 = arith.truncf %337 : vector<4x64xf32> to vector<4x64xbf16>
    %cst_43 = arith.constant dense<0.000000e+00> : vector<4x128xf32>
    %339 = tpu.matmul %338, %228, %cst_43 {dimension_numbers = #tpu.dot_dimension_numbers<[1], [0], [0], [1], [0, 0, 1, 1], [], []>} : vector<4x64xbf16>, vector<64x128xbf16>, vector<4x128xf32> -> vector<4x128xf32>
    %340 = arith.addf %247, %339 : vector<4x128xf32>
    %341 = arith.negf %340 : vector<4x128xf32>
    %342 = math.exp %341 : vector<4x128xf32>
    %cst_44 = arith.constant 1.000000e+00 : f32
    %343 = vector.broadcast %cst_44 : f32 to vector<4x128xf32>
    %344 = arith.addf %343, %342 : vector<4x128xf32>
    %345 = arith.divf %343, %344 : vector<4x128xf32>
    %346 = math.tanh %340 : vector<4x128xf32>
    %347 = vector.extract_strided_slice %345 {offsets = [0, 0], sizes = [4, 32], strides = [1, 1]} : vector<4x128xf32> to vector<4x32xf32>
    %348 = vector.extract_strided_slice %345 {offsets = [0, 32], sizes = [4, 32], strides = [1, 1]} : vector<4x128xf32> to vector<4x32xf32>
    %349 = vector.extract_strided_slice %346 {offsets = [0, 64], sizes = [4, 32], strides = [1, 1]} : vector<4x128xf32> to vector<4x32xf32>
    %350 = vector.extract_strided_slice %345 {offsets = [0, 96], sizes = [4, 32], strides = [1, 1]} : vector<4x128xf32> to vector<4x32xf32>
    %351 = arith.mulf %348, %333 : vector<4x32xf32>
    %352 = arith.mulf %347, %349 : vector<4x32xf32>
    %353 = arith.addf %351, %352 : vector<4x32xf32>
    %354 = math.tanh %353 : vector<4x32xf32>
    %355 = arith.mulf %350, %354 : vector<4x32xf32>
    %356 = tpu.concatenate %355, %355 in 1 : vector<4x32xf32>, vector<4x32xf32> -> vector<4x64xf32>
    %357 = arith.mulf %356, %9 : vector<4x64xf32>
    %358 = arith.truncf %357 : vector<4x64xf32> to vector<4x64xbf16>
    %cst_45 = arith.constant dense<0.000000e+00> : vector<4x128xf32>
    %359 = tpu.matmul %358, %228, %cst_45 {dimension_numbers = #tpu.dot_dimension_numbers<[1], [0], [0], [1], [0, 0, 1, 1], [], []>} : vector<4x64xbf16>, vector<64x128xbf16>, vector<4x128xf32> -> vector<4x128xf32>
    %360 = arith.addf %250, %359 : vector<4x128xf32>
    %361 = arith.negf %360 : vector<4x128xf32>
    %362 = math.exp %361 : vector<4x128xf32>
    %cst_46 = arith.constant 1.000000e+00 : f32
    %363 = vector.broadcast %cst_46 : f32 to vector<4x128xf32>
    %364 = arith.addf %363, %362 : vector<4x128xf32>
    %365 = arith.divf %363, %364 : vector<4x128xf32>
    %366 = math.tanh %360 : vector<4x128xf32>
    %367 = vector.extract_strided_slice %365 {offsets = [0, 0], sizes = [4, 32], strides = [1, 1]} : vector<4x128xf32> to vector<4x32xf32>
    %368 = vector.extract_strided_slice %365 {offsets = [0, 32], sizes = [4, 32], strides = [1, 1]} : vector<4x128xf32> to vector<4x32xf32>
    %369 = vector.extract_strided_slice %366 {offsets = [0, 64], sizes = [4, 32], strides = [1, 1]} : vector<4x128xf32> to vector<4x32xf32>
    %370 = vector.extract_strided_slice %365 {offsets = [0, 96], sizes = [4, 32], strides = [1, 1]} : vector<4x128xf32> to vector<4x32xf32>
    %371 = arith.mulf %368, %353 : vector<4x32xf32>
    %372 = arith.mulf %367, %369 : vector<4x32xf32>
    %373 = arith.addf %371, %372 : vector<4x32xf32>
    %374 = math.tanh %373 : vector<4x32xf32>
    %375 = arith.mulf %370, %374 : vector<4x32xf32>
    %376 = tpu.concatenate %375, %375 in 1 : vector<4x32xf32>, vector<4x32xf32> -> vector<4x64xf32>
    %377 = arith.mulf %376, %9 : vector<4x64xf32>
    %378 = arith.truncf %377 : vector<4x64xf32> to vector<4x64xbf16>
    %cst_47 = arith.constant dense<0.000000e+00> : vector<4x128xf32>
    %379 = tpu.matmul %378, %228, %cst_47 {dimension_numbers = #tpu.dot_dimension_numbers<[1], [0], [0], [1], [0, 0, 1, 1], [], []>} : vector<4x64xbf16>, vector<64x128xbf16>, vector<4x128xf32> -> vector<4x128xf32>
    %380 = arith.addf %253, %379 : vector<4x128xf32>
    %381 = arith.negf %380 : vector<4x128xf32>
    %382 = math.exp %381 : vector<4x128xf32>
    %cst_48 = arith.constant 1.000000e+00 : f32
    %383 = vector.broadcast %cst_48 : f32 to vector<4x128xf32>
    %384 = arith.addf %383, %382 : vector<4x128xf32>
    %385 = arith.divf %383, %384 : vector<4x128xf32>
    %386 = math.tanh %380 : vector<4x128xf32>
    %387 = vector.extract_strided_slice %385 {offsets = [0, 0], sizes = [4, 32], strides = [1, 1]} : vector<4x128xf32> to vector<4x32xf32>
    %388 = vector.extract_strided_slice %385 {offsets = [0, 32], sizes = [4, 32], strides = [1, 1]} : vector<4x128xf32> to vector<4x32xf32>
    %389 = vector.extract_strided_slice %386 {offsets = [0, 64], sizes = [4, 32], strides = [1, 1]} : vector<4x128xf32> to vector<4x32xf32>
    %390 = vector.extract_strided_slice %385 {offsets = [0, 96], sizes = [4, 32], strides = [1, 1]} : vector<4x128xf32> to vector<4x32xf32>
    %391 = arith.mulf %388, %373 : vector<4x32xf32>
    %392 = arith.mulf %387, %389 : vector<4x32xf32>
    %393 = arith.addf %391, %392 : vector<4x32xf32>
    %394 = math.tanh %393 : vector<4x32xf32>
    %395 = arith.mulf %390, %394 : vector<4x32xf32>
    %396 = tpu.concatenate %395, %395 in 1 : vector<4x32xf32>, vector<4x32xf32> -> vector<4x64xf32>
    %397 = arith.mulf %396, %9 : vector<4x64xf32>
    %398 = arith.truncf %397 : vector<4x64xf32> to vector<4x64xbf16>
    %cst_49 = arith.constant dense<0.000000e+00> : vector<4x128xf32>
    %399 = tpu.matmul %398, %228, %cst_49 {dimension_numbers = #tpu.dot_dimension_numbers<[1], [0], [0], [1], [0, 0, 1, 1], [], []>} : vector<4x64xbf16>, vector<64x128xbf16>, vector<4x128xf32> -> vector<4x128xf32>
    %400 = arith.addf %256, %399 : vector<4x128xf32>
    %401 = arith.negf %400 : vector<4x128xf32>
    %402 = math.exp %401 : vector<4x128xf32>
    %cst_50 = arith.constant 1.000000e+00 : f32
    %403 = vector.broadcast %cst_50 : f32 to vector<4x128xf32>
    %404 = arith.addf %403, %402 : vector<4x128xf32>
    %405 = arith.divf %403, %404 : vector<4x128xf32>
    %406 = math.tanh %400 : vector<4x128xf32>
    %407 = vector.extract_strided_slice %405 {offsets = [0, 0], sizes = [4, 32], strides = [1, 1]} : vector<4x128xf32> to vector<4x32xf32>
    %408 = vector.extract_strided_slice %405 {offsets = [0, 32], sizes = [4, 32], strides = [1, 1]} : vector<4x128xf32> to vector<4x32xf32>
    %409 = vector.extract_strided_slice %406 {offsets = [0, 64], sizes = [4, 32], strides = [1, 1]} : vector<4x128xf32> to vector<4x32xf32>
    %410 = vector.extract_strided_slice %405 {offsets = [0, 96], sizes = [4, 32], strides = [1, 1]} : vector<4x128xf32> to vector<4x32xf32>
    %411 = arith.mulf %408, %393 : vector<4x32xf32>
    %412 = arith.mulf %407, %409 : vector<4x32xf32>
    %413 = arith.addf %411, %412 : vector<4x32xf32>
    %414 = math.tanh %413 : vector<4x32xf32>
    %415 = arith.mulf %410, %414 : vector<4x32xf32>
    %416 = vector.extract_strided_slice %275 {offsets = [0, 0], sizes = [2, 32], strides = [1, 1]} : vector<4x32xf32> to vector<2x32xf32>
    %417 = vector.extract_strided_slice %415 {offsets = [2, 0], sizes = [2, 32], strides = [1, 1]} : vector<4x32xf32> to vector<2x32xf32>
    %418 = tpu.concatenate %416, %417 in 1 : vector<2x32xf32>, vector<2x32xf32> -> vector<2x64xf32>
    %419 = vector.extract_strided_slice %295 {offsets = [0, 0], sizes = [2, 32], strides = [1, 1]} : vector<4x32xf32> to vector<2x32xf32>
    %420 = vector.extract_strided_slice %395 {offsets = [2, 0], sizes = [2, 32], strides = [1, 1]} : vector<4x32xf32> to vector<2x32xf32>
    %421 = tpu.concatenate %419, %420 in 1 : vector<2x32xf32>, vector<2x32xf32> -> vector<2x64xf32>
    %422 = vector.extract_strided_slice %315 {offsets = [0, 0], sizes = [2, 32], strides = [1, 1]} : vector<4x32xf32> to vector<2x32xf32>
    %423 = vector.extract_strided_slice %375 {offsets = [2, 0], sizes = [2, 32], strides = [1, 1]} : vector<4x32xf32> to vector<2x32xf32>
    %424 = tpu.concatenate %422, %423 in 1 : vector<2x32xf32>, vector<2x32xf32> -> vector<2x64xf32>
    %425 = vector.extract_strided_slice %335 {offsets = [0, 0], sizes = [2, 32], strides = [1, 1]} : vector<4x32xf32> to vector<2x32xf32>
    %426 = vector.extract_strided_slice %355 {offsets = [2, 0], sizes = [2, 32], strides = [1, 1]} : vector<4x32xf32> to vector<2x32xf32>
    %427 = tpu.concatenate %425, %426 in 1 : vector<2x32xf32>, vector<2x32xf32> -> vector<2x64xf32>
    %428 = vector.extract_strided_slice %355 {offsets = [0, 0], sizes = [2, 32], strides = [1, 1]} : vector<4x32xf32> to vector<2x32xf32>
    %429 = vector.extract_strided_slice %335 {offsets = [2, 0], sizes = [2, 32], strides = [1, 1]} : vector<4x32xf32> to vector<2x32xf32>
    %430 = tpu.concatenate %428, %429 in 1 : vector<2x32xf32>, vector<2x32xf32> -> vector<2x64xf32>
    %431 = vector.extract_strided_slice %375 {offsets = [0, 0], sizes = [2, 32], strides = [1, 1]} : vector<4x32xf32> to vector<2x32xf32>
    %432 = vector.extract_strided_slice %315 {offsets = [2, 0], sizes = [2, 32], strides = [1, 1]} : vector<4x32xf32> to vector<2x32xf32>
    %433 = tpu.concatenate %431, %432 in 1 : vector<2x32xf32>, vector<2x32xf32> -> vector<2x64xf32>
    %434 = vector.extract_strided_slice %395 {offsets = [0, 0], sizes = [2, 32], strides = [1, 1]} : vector<4x32xf32> to vector<2x32xf32>
    %435 = vector.extract_strided_slice %295 {offsets = [2, 0], sizes = [2, 32], strides = [1, 1]} : vector<4x32xf32> to vector<2x32xf32>
    %436 = tpu.concatenate %434, %435 in 1 : vector<2x32xf32>, vector<2x32xf32> -> vector<2x64xf32>
    %437 = vector.extract_strided_slice %415 {offsets = [0, 0], sizes = [2, 32], strides = [1, 1]} : vector<4x32xf32> to vector<2x32xf32>
    %438 = vector.extract_strided_slice %275 {offsets = [2, 0], sizes = [2, 32], strides = [1, 1]} : vector<4x32xf32> to vector<2x32xf32>
    %439 = tpu.concatenate %437, %438 in 1 : vector<2x32xf32>, vector<2x32xf32> -> vector<2x64xf32>
    %440 = tpu.concatenate %418, %421, %424, %427, %430, %433, %436, %439 in 0 : vector<2x64xf32>, vector<2x64xf32>, vector<2x64xf32>, vector<2x64xf32>, vector<2x64xf32>, vector<2x64xf32>, vector<2x64xf32>, vector<2x64xf32> -> vector<16x64xf32>
    %441 = arith.truncf %440 : vector<16x64xf32> to vector<16x64xbf16>
    %c0_51 = arith.constant 0 : index
    %c0_52 = arith.constant 0 : index
    %442 = vector.load %arg7[%c0_51, %c0_52] : memref<64x256xbf16, #tpu.memory_space<vmem>>, vector<64x256xbf16>
    %c0_53 = arith.constant 0 : index
    %c0_54 = arith.constant 0 : index
    %443 = vector.load %arg9[%c0_53, %c0_54] : memref<64x128xbf16, #tpu.memory_space<vmem>>, vector<64x128xbf16>
    %c0_55 = arith.constant 0 : index
    %c0_56 = arith.constant 0 : index
    %444 = vector.load %arg8[%c0_55, %c0_56] : memref<1x256xf32, #tpu.memory_space<vmem>>, vector<1x256xf32>
    %cst_57 = arith.constant dense<0.000000e+00> : vector<16x256xf32>
    %445 = tpu.matmul %441, %442, %cst_57 {dimension_numbers = #tpu.dot_dimension_numbers<[1], [0], [0], [1], [0, 0, 1, 1], [], []>} : vector<16x64xbf16>, vector<64x256xbf16>, vector<16x256xf32> -> vector<16x256xf32>
    %446 = vector.broadcast %444 : vector<1x256xf32> to vector<16x256xf32>
    %447 = arith.addf %445, %446 : vector<16x256xf32>
    %448 = vector.extract_strided_slice %447 {offsets = [0, 0], sizes = [2, 128], strides = [1, 1]} : vector<16x256xf32> to vector<2x128xf32>
    %449 = vector.extract_strided_slice %447 {offsets = [14, 128], sizes = [2, 128], strides = [1, 1]} : vector<16x256xf32> to vector<2x128xf32>
    %450 = tpu.concatenate %448, %449 in 0 : vector<2x128xf32>, vector<2x128xf32> -> vector<4x128xf32>
    %451 = vector.extract_strided_slice %447 {offsets = [2, 0], sizes = [2, 128], strides = [1, 1]} : vector<16x256xf32> to vector<2x128xf32>
    %452 = vector.extract_strided_slice %447 {offsets = [12, 128], sizes = [2, 128], strides = [1, 1]} : vector<16x256xf32> to vector<2x128xf32>
    %453 = tpu.concatenate %451, %452 in 0 : vector<2x128xf32>, vector<2x128xf32> -> vector<4x128xf32>
    %454 = vector.extract_strided_slice %447 {offsets = [4, 0], sizes = [2, 128], strides = [1, 1]} : vector<16x256xf32> to vector<2x128xf32>
    %455 = vector.extract_strided_slice %447 {offsets = [10, 128], sizes = [2, 128], strides = [1, 1]} : vector<16x256xf32> to vector<2x128xf32>
    %456 = tpu.concatenate %454, %455 in 0 : vector<2x128xf32>, vector<2x128xf32> -> vector<4x128xf32>
    %457 = vector.extract_strided_slice %447 {offsets = [6, 0], sizes = [2, 128], strides = [1, 1]} : vector<16x256xf32> to vector<2x128xf32>
    %458 = vector.extract_strided_slice %447 {offsets = [8, 128], sizes = [2, 128], strides = [1, 1]} : vector<16x256xf32> to vector<2x128xf32>
    %459 = tpu.concatenate %457, %458 in 0 : vector<2x128xf32>, vector<2x128xf32> -> vector<4x128xf32>
    %460 = vector.extract_strided_slice %447 {offsets = [8, 0], sizes = [2, 128], strides = [1, 1]} : vector<16x256xf32> to vector<2x128xf32>
    %461 = vector.extract_strided_slice %447 {offsets = [6, 128], sizes = [2, 128], strides = [1, 1]} : vector<16x256xf32> to vector<2x128xf32>
    %462 = tpu.concatenate %460, %461 in 0 : vector<2x128xf32>, vector<2x128xf32> -> vector<4x128xf32>
    %463 = vector.extract_strided_slice %447 {offsets = [10, 0], sizes = [2, 128], strides = [1, 1]} : vector<16x256xf32> to vector<2x128xf32>
    %464 = vector.extract_strided_slice %447 {offsets = [4, 128], sizes = [2, 128], strides = [1, 1]} : vector<16x256xf32> to vector<2x128xf32>
    %465 = tpu.concatenate %463, %464 in 0 : vector<2x128xf32>, vector<2x128xf32> -> vector<4x128xf32>
    %466 = vector.extract_strided_slice %447 {offsets = [12, 0], sizes = [2, 128], strides = [1, 1]} : vector<16x256xf32> to vector<2x128xf32>
    %467 = vector.extract_strided_slice %447 {offsets = [2, 128], sizes = [2, 128], strides = [1, 1]} : vector<16x256xf32> to vector<2x128xf32>
    %468 = tpu.concatenate %466, %467 in 0 : vector<2x128xf32>, vector<2x128xf32> -> vector<4x128xf32>
    %469 = vector.extract_strided_slice %447 {offsets = [14, 0], sizes = [2, 128], strides = [1, 1]} : vector<16x256xf32> to vector<2x128xf32>
    %470 = vector.extract_strided_slice %447 {offsets = [0, 128], sizes = [2, 128], strides = [1, 1]} : vector<16x256xf32> to vector<2x128xf32>
    %471 = tpu.concatenate %469, %470 in 0 : vector<2x128xf32>, vector<2x128xf32> -> vector<4x128xf32>
    %cst_58 = arith.constant 0.000000e+00 : bf16
    %472 = vector.broadcast %cst_58 : bf16 to vector<4x64xbf16>
    %cst_59 = arith.constant 0.000000e+00 : f32
    %473 = vector.broadcast %cst_59 : f32 to vector<4x32xf32>
    %cst_60 = arith.constant dense<0.000000e+00> : vector<4x128xf32>
    %474 = tpu.matmul %472, %443, %cst_60 {dimension_numbers = #tpu.dot_dimension_numbers<[1], [0], [0], [1], [0, 0, 1, 1], [], []>} : vector<4x64xbf16>, vector<64x128xbf16>, vector<4x128xf32> -> vector<4x128xf32>
    %475 = arith.addf %450, %474 : vector<4x128xf32>
    %476 = arith.negf %475 : vector<4x128xf32>
    %477 = math.exp %476 : vector<4x128xf32>
    %cst_61 = arith.constant 1.000000e+00 : f32
    %478 = vector.broadcast %cst_61 : f32 to vector<4x128xf32>
    %479 = arith.addf %478, %477 : vector<4x128xf32>
    %480 = arith.divf %478, %479 : vector<4x128xf32>
    %481 = math.tanh %475 : vector<4x128xf32>
    %482 = vector.extract_strided_slice %480 {offsets = [0, 0], sizes = [4, 32], strides = [1, 1]} : vector<4x128xf32> to vector<4x32xf32>
    %483 = vector.extract_strided_slice %480 {offsets = [0, 32], sizes = [4, 32], strides = [1, 1]} : vector<4x128xf32> to vector<4x32xf32>
    %484 = vector.extract_strided_slice %481 {offsets = [0, 64], sizes = [4, 32], strides = [1, 1]} : vector<4x128xf32> to vector<4x32xf32>
    %485 = vector.extract_strided_slice %480 {offsets = [0, 96], sizes = [4, 32], strides = [1, 1]} : vector<4x128xf32> to vector<4x32xf32>
    %486 = arith.mulf %483, %473 : vector<4x32xf32>
    %487 = arith.mulf %482, %484 : vector<4x32xf32>
    %488 = arith.addf %486, %487 : vector<4x32xf32>
    %489 = math.tanh %488 : vector<4x32xf32>
    %490 = arith.mulf %485, %489 : vector<4x32xf32>
    %491 = tpu.concatenate %490, %490 in 1 : vector<4x32xf32>, vector<4x32xf32> -> vector<4x64xf32>
    %492 = arith.mulf %491, %9 : vector<4x64xf32>
    %493 = arith.truncf %492 : vector<4x64xf32> to vector<4x64xbf16>
    %cst_62 = arith.constant dense<0.000000e+00> : vector<4x128xf32>
    %494 = tpu.matmul %493, %443, %cst_62 {dimension_numbers = #tpu.dot_dimension_numbers<[1], [0], [0], [1], [0, 0, 1, 1], [], []>} : vector<4x64xbf16>, vector<64x128xbf16>, vector<4x128xf32> -> vector<4x128xf32>
    %495 = arith.addf %453, %494 : vector<4x128xf32>
    %496 = arith.negf %495 : vector<4x128xf32>
    %497 = math.exp %496 : vector<4x128xf32>
    %cst_63 = arith.constant 1.000000e+00 : f32
    %498 = vector.broadcast %cst_63 : f32 to vector<4x128xf32>
    %499 = arith.addf %498, %497 : vector<4x128xf32>
    %500 = arith.divf %498, %499 : vector<4x128xf32>
    %501 = math.tanh %495 : vector<4x128xf32>
    %502 = vector.extract_strided_slice %500 {offsets = [0, 0], sizes = [4, 32], strides = [1, 1]} : vector<4x128xf32> to vector<4x32xf32>
    %503 = vector.extract_strided_slice %500 {offsets = [0, 32], sizes = [4, 32], strides = [1, 1]} : vector<4x128xf32> to vector<4x32xf32>
    %504 = vector.extract_strided_slice %501 {offsets = [0, 64], sizes = [4, 32], strides = [1, 1]} : vector<4x128xf32> to vector<4x32xf32>
    %505 = vector.extract_strided_slice %500 {offsets = [0, 96], sizes = [4, 32], strides = [1, 1]} : vector<4x128xf32> to vector<4x32xf32>
    %506 = arith.mulf %503, %488 : vector<4x32xf32>
    %507 = arith.mulf %502, %504 : vector<4x32xf32>
    %508 = arith.addf %506, %507 : vector<4x32xf32>
    %509 = math.tanh %508 : vector<4x32xf32>
    %510 = arith.mulf %505, %509 : vector<4x32xf32>
    %511 = tpu.concatenate %510, %510 in 1 : vector<4x32xf32>, vector<4x32xf32> -> vector<4x64xf32>
    %512 = arith.mulf %511, %9 : vector<4x64xf32>
    %513 = arith.truncf %512 : vector<4x64xf32> to vector<4x64xbf16>
    %cst_64 = arith.constant dense<0.000000e+00> : vector<4x128xf32>
    %514 = tpu.matmul %513, %443, %cst_64 {dimension_numbers = #tpu.dot_dimension_numbers<[1], [0], [0], [1], [0, 0, 1, 1], [], []>} : vector<4x64xbf16>, vector<64x128xbf16>, vector<4x128xf32> -> vector<4x128xf32>
    %515 = arith.addf %456, %514 : vector<4x128xf32>
    %516 = arith.negf %515 : vector<4x128xf32>
    %517 = math.exp %516 : vector<4x128xf32>
    %cst_65 = arith.constant 1.000000e+00 : f32
    %518 = vector.broadcast %cst_65 : f32 to vector<4x128xf32>
    %519 = arith.addf %518, %517 : vector<4x128xf32>
    %520 = arith.divf %518, %519 : vector<4x128xf32>
    %521 = math.tanh %515 : vector<4x128xf32>
    %522 = vector.extract_strided_slice %520 {offsets = [0, 0], sizes = [4, 32], strides = [1, 1]} : vector<4x128xf32> to vector<4x32xf32>
    %523 = vector.extract_strided_slice %520 {offsets = [0, 32], sizes = [4, 32], strides = [1, 1]} : vector<4x128xf32> to vector<4x32xf32>
    %524 = vector.extract_strided_slice %521 {offsets = [0, 64], sizes = [4, 32], strides = [1, 1]} : vector<4x128xf32> to vector<4x32xf32>
    %525 = vector.extract_strided_slice %520 {offsets = [0, 96], sizes = [4, 32], strides = [1, 1]} : vector<4x128xf32> to vector<4x32xf32>
    %526 = arith.mulf %523, %508 : vector<4x32xf32>
    %527 = arith.mulf %522, %524 : vector<4x32xf32>
    %528 = arith.addf %526, %527 : vector<4x32xf32>
    %529 = math.tanh %528 : vector<4x32xf32>
    %530 = arith.mulf %525, %529 : vector<4x32xf32>
    %531 = tpu.concatenate %530, %530 in 1 : vector<4x32xf32>, vector<4x32xf32> -> vector<4x64xf32>
    %532 = arith.mulf %531, %9 : vector<4x64xf32>
    %533 = arith.truncf %532 : vector<4x64xf32> to vector<4x64xbf16>
    %cst_66 = arith.constant dense<0.000000e+00> : vector<4x128xf32>
    %534 = tpu.matmul %533, %443, %cst_66 {dimension_numbers = #tpu.dot_dimension_numbers<[1], [0], [0], [1], [0, 0, 1, 1], [], []>} : vector<4x64xbf16>, vector<64x128xbf16>, vector<4x128xf32> -> vector<4x128xf32>
    %535 = arith.addf %459, %534 : vector<4x128xf32>
    %536 = arith.negf %535 : vector<4x128xf32>
    %537 = math.exp %536 : vector<4x128xf32>
    %cst_67 = arith.constant 1.000000e+00 : f32
    %538 = vector.broadcast %cst_67 : f32 to vector<4x128xf32>
    %539 = arith.addf %538, %537 : vector<4x128xf32>
    %540 = arith.divf %538, %539 : vector<4x128xf32>
    %541 = math.tanh %535 : vector<4x128xf32>
    %542 = vector.extract_strided_slice %540 {offsets = [0, 0], sizes = [4, 32], strides = [1, 1]} : vector<4x128xf32> to vector<4x32xf32>
    %543 = vector.extract_strided_slice %540 {offsets = [0, 32], sizes = [4, 32], strides = [1, 1]} : vector<4x128xf32> to vector<4x32xf32>
    %544 = vector.extract_strided_slice %541 {offsets = [0, 64], sizes = [4, 32], strides = [1, 1]} : vector<4x128xf32> to vector<4x32xf32>
    %545 = vector.extract_strided_slice %540 {offsets = [0, 96], sizes = [4, 32], strides = [1, 1]} : vector<4x128xf32> to vector<4x32xf32>
    %546 = arith.mulf %543, %528 : vector<4x32xf32>
    %547 = arith.mulf %542, %544 : vector<4x32xf32>
    %548 = arith.addf %546, %547 : vector<4x32xf32>
    %549 = math.tanh %548 : vector<4x32xf32>
    %550 = arith.mulf %545, %549 : vector<4x32xf32>
    %551 = tpu.concatenate %550, %550 in 1 : vector<4x32xf32>, vector<4x32xf32> -> vector<4x64xf32>
    %552 = arith.mulf %551, %9 : vector<4x64xf32>
    %553 = arith.truncf %552 : vector<4x64xf32> to vector<4x64xbf16>
    %cst_68 = arith.constant dense<0.000000e+00> : vector<4x128xf32>
    %554 = tpu.matmul %553, %443, %cst_68 {dimension_numbers = #tpu.dot_dimension_numbers<[1], [0], [0], [1], [0, 0, 1, 1], [], []>} : vector<4x64xbf16>, vector<64x128xbf16>, vector<4x128xf32> -> vector<4x128xf32>
    %555 = arith.addf %462, %554 : vector<4x128xf32>
    %556 = arith.negf %555 : vector<4x128xf32>
    %557 = math.exp %556 : vector<4x128xf32>
    %cst_69 = arith.constant 1.000000e+00 : f32
    %558 = vector.broadcast %cst_69 : f32 to vector<4x128xf32>
    %559 = arith.addf %558, %557 : vector<4x128xf32>
    %560 = arith.divf %558, %559 : vector<4x128xf32>
    %561 = math.tanh %555 : vector<4x128xf32>
    %562 = vector.extract_strided_slice %560 {offsets = [0, 0], sizes = [4, 32], strides = [1, 1]} : vector<4x128xf32> to vector<4x32xf32>
    %563 = vector.extract_strided_slice %560 {offsets = [0, 32], sizes = [4, 32], strides = [1, 1]} : vector<4x128xf32> to vector<4x32xf32>
    %564 = vector.extract_strided_slice %561 {offsets = [0, 64], sizes = [4, 32], strides = [1, 1]} : vector<4x128xf32> to vector<4x32xf32>
    %565 = vector.extract_strided_slice %560 {offsets = [0, 96], sizes = [4, 32], strides = [1, 1]} : vector<4x128xf32> to vector<4x32xf32>
    %566 = arith.mulf %563, %548 : vector<4x32xf32>
    %567 = arith.mulf %562, %564 : vector<4x32xf32>
    %568 = arith.addf %566, %567 : vector<4x32xf32>
    %569 = math.tanh %568 : vector<4x32xf32>
    %570 = arith.mulf %565, %569 : vector<4x32xf32>
    %571 = tpu.concatenate %570, %570 in 1 : vector<4x32xf32>, vector<4x32xf32> -> vector<4x64xf32>
    %572 = arith.mulf %571, %9 : vector<4x64xf32>
    %573 = arith.truncf %572 : vector<4x64xf32> to vector<4x64xbf16>
    %cst_70 = arith.constant dense<0.000000e+00> : vector<4x128xf32>
    %574 = tpu.matmul %573, %443, %cst_70 {dimension_numbers = #tpu.dot_dimension_numbers<[1], [0], [0], [1], [0, 0, 1, 1], [], []>} : vector<4x64xbf16>, vector<64x128xbf16>, vector<4x128xf32> -> vector<4x128xf32>
    %575 = arith.addf %465, %574 : vector<4x128xf32>
    %576 = arith.negf %575 : vector<4x128xf32>
    %577 = math.exp %576 : vector<4x128xf32>
    %cst_71 = arith.constant 1.000000e+00 : f32
    %578 = vector.broadcast %cst_71 : f32 to vector<4x128xf32>
    %579 = arith.addf %578, %577 : vector<4x128xf32>
    %580 = arith.divf %578, %579 : vector<4x128xf32>
    %581 = math.tanh %575 : vector<4x128xf32>
    %582 = vector.extract_strided_slice %580 {offsets = [0, 0], sizes = [4, 32], strides = [1, 1]} : vector<4x128xf32> to vector<4x32xf32>
    %583 = vector.extract_strided_slice %580 {offsets = [0, 32], sizes = [4, 32], strides = [1, 1]} : vector<4x128xf32> to vector<4x32xf32>
    %584 = vector.extract_strided_slice %581 {offsets = [0, 64], sizes = [4, 32], strides = [1, 1]} : vector<4x128xf32> to vector<4x32xf32>
    %585 = vector.extract_strided_slice %580 {offsets = [0, 96], sizes = [4, 32], strides = [1, 1]} : vector<4x128xf32> to vector<4x32xf32>
    %586 = arith.mulf %583, %568 : vector<4x32xf32>
    %587 = arith.mulf %582, %584 : vector<4x32xf32>
    %588 = arith.addf %586, %587 : vector<4x32xf32>
    %589 = math.tanh %588 : vector<4x32xf32>
    %590 = arith.mulf %585, %589 : vector<4x32xf32>
    %591 = tpu.concatenate %590, %590 in 1 : vector<4x32xf32>, vector<4x32xf32> -> vector<4x64xf32>
    %592 = arith.mulf %591, %9 : vector<4x64xf32>
    %593 = arith.truncf %592 : vector<4x64xf32> to vector<4x64xbf16>
    %cst_72 = arith.constant dense<0.000000e+00> : vector<4x128xf32>
    %594 = tpu.matmul %593, %443, %cst_72 {dimension_numbers = #tpu.dot_dimension_numbers<[1], [0], [0], [1], [0, 0, 1, 1], [], []>} : vector<4x64xbf16>, vector<64x128xbf16>, vector<4x128xf32> -> vector<4x128xf32>
    %595 = arith.addf %468, %594 : vector<4x128xf32>
    %596 = arith.negf %595 : vector<4x128xf32>
    %597 = math.exp %596 : vector<4x128xf32>
    %cst_73 = arith.constant 1.000000e+00 : f32
    %598 = vector.broadcast %cst_73 : f32 to vector<4x128xf32>
    %599 = arith.addf %598, %597 : vector<4x128xf32>
    %600 = arith.divf %598, %599 : vector<4x128xf32>
    %601 = math.tanh %595 : vector<4x128xf32>
    %602 = vector.extract_strided_slice %600 {offsets = [0, 0], sizes = [4, 32], strides = [1, 1]} : vector<4x128xf32> to vector<4x32xf32>
    %603 = vector.extract_strided_slice %600 {offsets = [0, 32], sizes = [4, 32], strides = [1, 1]} : vector<4x128xf32> to vector<4x32xf32>
    %604 = vector.extract_strided_slice %601 {offsets = [0, 64], sizes = [4, 32], strides = [1, 1]} : vector<4x128xf32> to vector<4x32xf32>
    %605 = vector.extract_strided_slice %600 {offsets = [0, 96], sizes = [4, 32], strides = [1, 1]} : vector<4x128xf32> to vector<4x32xf32>
    %606 = arith.mulf %603, %588 : vector<4x32xf32>
    %607 = arith.mulf %602, %604 : vector<4x32xf32>
    %608 = arith.addf %606, %607 : vector<4x32xf32>
    %609 = math.tanh %608 : vector<4x32xf32>
    %610 = arith.mulf %605, %609 : vector<4x32xf32>
    %611 = tpu.concatenate %610, %610 in 1 : vector<4x32xf32>, vector<4x32xf32> -> vector<4x64xf32>
    %612 = arith.mulf %611, %9 : vector<4x64xf32>
    %613 = arith.truncf %612 : vector<4x64xf32> to vector<4x64xbf16>
    %cst_74 = arith.constant dense<0.000000e+00> : vector<4x128xf32>
    %614 = tpu.matmul %613, %443, %cst_74 {dimension_numbers = #tpu.dot_dimension_numbers<[1], [0], [0], [1], [0, 0, 1, 1], [], []>} : vector<4x64xbf16>, vector<64x128xbf16>, vector<4x128xf32> -> vector<4x128xf32>
    %615 = arith.addf %471, %614 : vector<4x128xf32>
    %616 = arith.negf %615 : vector<4x128xf32>
    %617 = math.exp %616 : vector<4x128xf32>
    %cst_75 = arith.constant 1.000000e+00 : f32
    %618 = vector.broadcast %cst_75 : f32 to vector<4x128xf32>
    %619 = arith.addf %618, %617 : vector<4x128xf32>
    %620 = arith.divf %618, %619 : vector<4x128xf32>
    %621 = math.tanh %615 : vector<4x128xf32>
    %622 = vector.extract_strided_slice %620 {offsets = [0, 0], sizes = [4, 32], strides = [1, 1]} : vector<4x128xf32> to vector<4x32xf32>
    %623 = vector.extract_strided_slice %620 {offsets = [0, 32], sizes = [4, 32], strides = [1, 1]} : vector<4x128xf32> to vector<4x32xf32>
    %624 = vector.extract_strided_slice %621 {offsets = [0, 64], sizes = [4, 32], strides = [1, 1]} : vector<4x128xf32> to vector<4x32xf32>
    %625 = vector.extract_strided_slice %620 {offsets = [0, 96], sizes = [4, 32], strides = [1, 1]} : vector<4x128xf32> to vector<4x32xf32>
    %626 = arith.mulf %623, %608 : vector<4x32xf32>
    %627 = arith.mulf %622, %624 : vector<4x32xf32>
    %628 = arith.addf %626, %627 : vector<4x32xf32>
    %629 = math.tanh %628 : vector<4x32xf32>
    %630 = arith.mulf %625, %629 : vector<4x32xf32>
    %631 = vector.extract_strided_slice %630 {offsets = [0, 0], sizes = [2, 32], strides = [1, 1]} : vector<4x32xf32> to vector<2x32xf32>
    %632 = vector.extract_strided_slice %630 {offsets = [2, 0], sizes = [2, 32], strides = [1, 1]} : vector<4x32xf32> to vector<2x32xf32>
    %633 = tpu.concatenate %631, %632 in 1 : vector<2x32xf32>, vector<2x32xf32> -> vector<2x64xf32>
    %c0_76 = arith.constant 0 : index
    %c0_77 = arith.constant 0 : index
    %634 = vector.load %arg10[%c0_76, %c0_77] : memref<1x64xf32, #tpu.memory_space<vmem>>, vector<1x64xf32>
    %635 = vector.broadcast %634 : vector<1x64xf32> to vector<2x64xf32>
    %636 = arith.mulf %633, %635 : vector<2x64xf32>
    %cst_78 = arith.constant dense<0.000000e+00> : vector<2xf32>
    %637 = vector.multi_reduction <add>, %636, %cst_78 [1] : vector<2x64xf32> to vector<2xf32>
    %638 = vector.shape_cast %637 : vector<2xf32> to vector<2x1xf32>
    %c0_79 = arith.constant 0 : index
    %c0_80 = arith.constant 0 : index
    %639 = vector.load %arg11[%c0_79, %c0_80] : memref<1x1xf32, #tpu.memory_space<vmem>>, vector<1x1xf32>
    %640 = vector.broadcast %639 : vector<1x1xf32> to vector<2x1xf32>
    %641 = arith.addf %638, %640 : vector<2x1xf32>
    %c0_81 = arith.constant 0 : index
    %c0_82 = arith.constant 0 : index
    %642 = vector.load %arg12[%c0_81, %c0_82] : memref<2x1xf32, #tpu.memory_space<vmem>>, vector<2x1xf32>
    tpu.vector_store %arg12[%c0_81, %c0_82], %641 {strides = array<i32>} : memref<2x1xf32, #tpu.memory_space<vmem>>, vector<2x1xf32>,
    return
  }
}

</mosaic_0001>

<bundles_post_ra>
// kernel: solace_lstm_forward.1
= control target key start
LH: loop header
LB: loop body
LE: loop exit
PB: predicated region body
PF: predicated region fallthrough
CT: control target
= control target key end

     0   :  { %s4411_s0 = inlined_call_operand.vmem [shape: f32[16,16], index: 0, kind: input, shape index: {}]   ;;  %s4412_s1 = inlined_call_operand.hbm [shape: bf16[16,256], index: 1, kind: input, shape index: {}]   ;;  %s4413_s2 = inlined_call_operand.vmem [shape: f32[1,256], index: 2, kind: input, shape index: {}]   ;;  %s4414_s3 = inlined_call_operand.hbm [shape: bf16[64,128], index: 3, kind: input, shape index: {}]   ;;  %s4415_s4 = inlined_call_operand.hbm [shape: bf16[64,256], index: 4, kind: input, shape index: {}]   ;;  %s4416_s5 = inlined_call_operand.vmem [shape: f32[1,256], index: 5, kind: input, shape index: {}]   ;;  %s4417_s6 = inlined_call_operand.hbm [shape: bf16[64,128], index: 6, kind: input, shape index: {}]   ;;  %s4418_s7 = inlined_call_operand.vmem [shape: bf16[64,256], index: 7, kind: input, shape index: {}]   ;;  %s4419_s8 = inlined_call_operand.vmem [shape: f32[1,256], index: 8, kind: input, shape index: {}]   ;;  %s4420_s9 = inlined_call_operand.hbm [shape: bf16[64,128], index: 9, kind: input, shape index: {}]   ;;  %s4421_s10 = inlined_call_operand.vmem [shape: f32[1,64], index: 10, kind: input, shape index: {}]   ;;  %s4422_s11 = inlined_call_operand.<no memory space> [shape: f32[1,1], index: 11, kind: input, shape index: {}]   ;;  %s4423_s12 = inlined_call_operand.vmem [shape: f32[2,1], index: 12, kind: output, shape index: {}]  }
   0x1   :  { %v17_v0 = vstv %s4422_s11 }
   0x2   :  { %18 = vst [vmem:[#allocation2] sm:$0x1] %v17_v0 }
   0x3   :  { %19 = vsyncpa [#allocation4], 0 }
   0x4   :  { %20 = vsyncpa [#allocation6], 0 }
   0x5   :  { %21 = vsyncpa [#allocation9], 0  ;;  %s3519_s23 = smov [#allocation5]   ;;  %s3403_s27 = scalar_lea.hbm %s4414_s3, 512 }
   0x6   :  { %s43_s24 = sshll.u32 %s3519_s23, 4  ;;  %p3404_p0 = scmp.ne.s32.totalorder %s4414_s3, %s3403_s27  ;;  %s44_s24 = int_to_ptr.vmem [resolvable:$true] %s43_s24 }
   0x7   :  { %p3407_p1 = scmp.lt.u32.totalorder %s3403_s27, %s4414_s3 }
   0x9   :  { %p3409_p2 = pnand %p3407_p1, %p3404_p0 }
   0xb   :  { %3412 = shalt.err (!%p3409_p2)
}
   0xc   :  { %s3413_s11 = scalar_lea.vmem %s44_s24, 512  ;;  %p3418_p4 = scmp.lt.s32.totalorder %s44_s24, %s44_s24 }
   0xd   :  { %p3414_p3 = scmp.ne.s32.totalorder %s44_s24, %s3413_s11  ;;  %p3419_p5 = scmp.lt.s32.totalorder %s3413_s11, %s3413_s11 }
   0xf   :  { %p3420_p6 = por %p3419_p5, %p3418_p4 }
  0x11   :  { %p3421_p7 = pnand %p3420_p6, %p3414_p3 }
  0x13   :  { %3424 = shalt.err (!%p3421_p7)
}
  0x14   :  { %s3520_s14 = smov 64   ;;  %s3521_s15 = smov 4  }
  0x15   :  { %49 = dma.hbm_to_vmem [thread:$0]  %s4414_s3, 512, %s44_s24, [#allocation6], %s3520_s14, %s3520_s14, %s3521_s15  }
  0x16   :  { %s3522_s18 = smov [#allocation8]   ;;  %s3523_s20 = smov [#allocation3]  }
  0x17   :  { %s69_s19 = sshll.u32 %s3522_s18, 4  ;;  %s29_s21 = sshll.u32 %s3523_s20, 4  ;;  %s70_s19 = int_to_ptr.vmem [resolvable:$true] %s69_s19  ;;  %s30_s21 = int_to_ptr.vmem [resolvable:$true] %s29_s21 }
  0x18   :  { %s3425_s25 = scalar_lea.hbm %s4417_s6, 512 }
  0x19   :  { %p3426_p8 = scmp.ne.s32.totalorder %s4417_s6, %s3425_s25  ;;  %p3429_p9 = scmp.lt.u32.totalorder %s3425_s25, %s4417_s6 }
  0x1b   :  { %p3431_p10 = pnand %p3429_p9, %p3426_p8 }
  0x1d   :  { %3434 = shalt.err (!%p3431_p10)
}
  0x1e   :  { %s3435_s3 = scalar_lea.vmem %s70_s19, 512  ;;  %p3440_p12 = scmp.lt.s32.totalorder %s70_s19, %s70_s19 }
  0x1f   :  { %p3436_p11 = scmp.ne.s32.totalorder %s70_s19, %s3435_s3  ;;  %p3441_p13 = scmp.lt.s32.totalorder %s3435_s3, %s3435_s3 }
  0x21   :  { %p3442_p0 = por %p3441_p13, %p3440_p12 }
  0x23   :  { %p3443_p1 = pnand %p3442_p0, %p3436_p11 }
  0x25   :  { %3446 = shalt.err (!%p3443_p1)
}
  0x26   :  { %75 = dma.hbm_to_vmem [thread:$0]  %s4417_s6, 512, %s70_s19, [#allocation9], %s3520_s14, %s3520_s14, %s3521_s15  }
  0x27   :  { %s3447_s16 = scalar_lea.hbm %s4412_s1, 256 }
  0x28   :  { %p3448_p2 = scmp.ne.s32.totalorder %s4412_s1, %s3447_s16  ;;  %p3451_p3 = scmp.lt.u32.totalorder %s3447_s16, %s4412_s1 }
  0x2a   :  { %p3453_p4 = pnand %p3451_p3, %p3448_p2 }
  0x2c   :  { %3456 = shalt.err (!%p3453_p4)
}
  0x2d   :  { %s3457_s23 = scalar_lea.vmem %s30_s21, 256  ;;  %p3462_p6 = scmp.lt.s32.totalorder %s30_s21, %s30_s21 }
  0x2e   :  { %p3458_p5 = scmp.ne.s32.totalorder %s30_s21, %s3457_s23  ;;  %p3463_p7 = scmp.lt.s32.totalorder %s3457_s23, %s3457_s23 }
  0x30   :  { %p3464_p8 = por %p3463_p7, %p3462_p6 }
  0x32   :  { %p3465_p9 = pnand %p3464_p8, %p3458_p5 }
  0x34   :  { %3468 = shalt.err (!%p3465_p9)
}
  0x35   :  { %s3524_s6 = smov 128   ;;  %s3525_s19 = smov 8  }
  0x36   :  { %35 = dma.hbm_to_vmem [thread:$0]  %s4412_s1, 256, %s30_s21, [#allocation4], %s3524_s6, %s3524_s6, %s3525_s19  }
  0x37   :  { %s3526_s27 = smov [#allocation7]   ;;  %s3527_s29 = smov [#allocation10]  }
  0x38   :  { %s55_s28 = sshll.u32 %s3526_s27, 4  ;;  %s85_s3 = sshll.u32 %s3527_s29, 4  ;;  %s56_s28 = int_to_ptr.vmem [resolvable:$true] %s55_s28  ;;  %s86_s3 = int_to_ptr.vmem [resolvable:$true] %s85_s3 }
  0x39   :  { %s3469_s13 = scalar_lea.hbm %s4415_s4, 1024 }
  0x3a   :  { %p3470_p10 = scmp.ne.s32.totalorder %s4415_s4, %s3469_s13  ;;  %p3473_p11 = scmp.lt.u32.totalorder %s3469_s13, %s4415_s4 }
  0x3c   :  { %p3475_p12 = pnand %p3473_p11, %p3470_p10 }
  0x3e   :  { %3478 = shalt.err (!%p3475_p12)
}
  0x3f   :  { %s3479_s1 = scalar_lea.vmem %s56_s28, 1024  ;;  %p3484_p0 = scmp.lt.s32.totalorder %s56_s28, %s56_s28 }
  0x40   :  { %p3480_p13 = scmp.ne.s32.totalorder %s56_s28, %s3479_s1  ;;  %p3485_p1 = scmp.lt.s32.totalorder %s3479_s1, %s3479_s1 }
  0x42   :  { %p3486_p2 = por %p3485_p1, %p3484_p0 }
  0x44   :  { %p3487_p3 = pnand %p3486_p2, %p3480_p13 }
  0x46   :  { %3490 = shalt.err (!%p3487_p3)
}
  0x47   :  { %61 = dma.hbm_to_vmem [thread:$0]  %s4415_s4, 1024, %s56_s28, [#allocation6], %s3524_s6, %s3524_s6, %s3525_s19  }
  0x48   :  { %s3491_s25 = scalar_lea.hbm %s4420_s9, 512 }
  0x49   :  { %p3492_p4 = scmp.ne.s32.totalorder %s4420_s9, %s3491_s25  ;;  %p3495_p5 = scmp.lt.u32.totalorder %s3491_s25, %s4420_s9 }
  0x4b   :  { %p3497_p6 = pnand %p3495_p5, %p3492_p4 }
  0x4d   :  { %3500 = shalt.err (!%p3497_p6)
}
  0x4e   :  { %s3501_s30 = scalar_lea.vmem %s86_s3, 512  ;;  %p3506_p8 = scmp.lt.s32.totalorder %s86_s3, %s86_s3 }
  0x4f   :  { %p3502_p7 = scmp.ne.s32.totalorder %s86_s3, %s3501_s30  ;;  %p3507_p9 = scmp.lt.s32.totalorder %s3501_s30, %s3501_s30 }
  0x51   :  { %p3508_p10 = por %p3507_p9, %p3506_p8 }
  0x53   :  { %p3509_p11 = pnand %p3508_p10, %p3502_p7 }
  0x55   :  { %3512 = shalt.err (!%p3509_p11)
}
  0x56   :  { %91 = dma.hbm_to_vmem [thread:$0]  %s4420_s9, 512, %s86_s3, [#allocation9], %s3520_s14, %s3520_s14, %s3521_s15  }
  0x57   :  { %3513 = dma.done.wait [#allocation4], 256  }
  0x58   :  { %3514 = vsyncadd [#allocation4], 4294967040 }
  0x59   :  { %3515 = dma.done.wait [#allocation6], 1536  }
  0x5a   :  { %3516 = vsyncadd [#allocation6], 4294965760 }
  0x5b   :  { %3517 = dma.done.wait [#allocation9], 1024  }
  0x5c   :  { %3518 = vsyncadd [#allocation9], 4294966272  ;;  %v3528_v1 = vmov 0.0   ;;  %v3529_v2 = vmov 0   ;;  %vm3530_vm0 = vmmov 0   ;;  %v3674_v4 = vld [vmem:[#allocation5] sm:$0xff]   ;;  %v112_v12 = vlaneseq }
  0x5d   :  { %2830 = vmatprep.subr.bf16.mxu1 %v3528_v1  ;;  %193 = vmatprep.mubr.bf16.mxu0 %v3529_v2  ;;  %v3172_v3 = vld [vmem:[#allocation3 + $0x4] ss:$8 sps:$4 sm:$0xff]   ;;  %v3175_v5 = vld [vmem:[#allocation3] ss:$8 sps:$4 sm:$0xff]   ;;  %v3683_v9 = vld [vmem:[#allocation5 + $0x8] sm:$0xff]   ;;  %vm157_vm1 = vcmask 130048  }
  0x5e   :  { %2838 = vmatprep.mubr.msk.bf16.mxu1 %vm3530_vm0, %v3528_v1  ;;  %161 = vmatprep.subr.bf16.mxu0 %v3172_v3  ;;  %v122_v6 = vld [vmem:[%s4411_s0] sm:$0xff]  ;;  %v123_v7 = vld [vmem:[%s4411_s0 + $0x8] sm:$0xff]  ;;  %v3719_v13 = vshrl.u32 %v112_v12, 7  ;;  %vm207_vm2 = vcmask 1041408   ;;  %v115_v3 = vand.u32 127, %v112_v12  ;;  %vm3532_vm6 = vmmov 1  }
  0x5f   :  { %2831 = vmatpush3.bf16.msra.mxu1 %v3674_v4  ;;  %v124_v8 = vpack.c.bf16 %v123_v7, %v122_v6  ;;  %162 = vmatpush1.bf16.msra.mxu0 %v3175_v5  ;;  %v3687_v10 = vld [vmem:[#allocation5 + $0x10] sm:$0xff]   ;;  %v3692_v11 = vld [vmem:[#allocation5 + $0x18] sm:$0xff]   ;;  %vm341_vm8 = vcmask 261120   ;;  %vm265_vm9 = vcmask 523264   ;;  %vm944_vm10 = vcmask 1043456  }
  0x60   :  { %2832 = vmatprep.subr.bf16.mxu1 %v3528_v1  ;;  %2842 = vmatprep.subr.bf16.mxu0 %v3528_v1  ;;  %v3722_v14 = vsub.s32 0, %v3719_v13  ;;  %v135_v15 = vld [vmem:[%s4413_s2] sm:$0x3]  ;;  %v3728_v16 = vsub.s32 1, %v3719_v13  ;;  %s3531_s2 = smov 32   ;;  %vm116_vm3 = vcmp.lt.s32.totalorder %v3719_v13, 2 }
  0x61   :  { %vm117_vm4 = vcmp.lt.s32.totalorder %v115_v3, 32  ;;  %vm946_vm11 = vcmask 1045504   ;;  %vm2608_vm12 = vcmask 517120   ;;  %vm2620_vm13 = vcmask 1024  }
  0x62   :  { %2632 = vmatmul.mubr.msk.bf16.vlgmr.msra.gmra.mrb[0].mxu0 %vm157_vm1, %v124_v8  ;;  %v140_v17 = vrot.slane %v135_v15, %v3722_v14  ;;  %v144_v18 = vrot.slane %v135_v15, %v3728_v16  ;;  %vm118_vm5 = vmxor %vm116_vm3, %vm117_vm4 }
  0x63   :  { %2833 = vmatpush3.bf16.msra.mxu1 %v3683_v9  ;;  %2843 = vmatpush3.bf16.msra.mxu0 %v3674_v4  ;;  %vm119_vm7 = vmxor %vm118_vm5, %vm3532_vm6 }
  0x64   :  { %2834 = vmatprep.subr.bf16.mxu1 %v3528_v1  ;;  %2844 = vmatprep.subr.bf16.mxu0 %v3528_v1  ;;  %v3764_v5 = vsel %vm119_vm7, 1.0, %v3528_v1 }
  0x65   :  { %2850 = vmatprep.mubr.msk.bf16.mxu0 %vm3530_vm0, %v3528_v1 }
  0x67   :  { %2835 = vmatpush3.bf16.msra.mxu1 %v3687_v10  ;;  %2845 = vmatpush3.bf16.msra.mxu0 %v3683_v9 }
  0x68   :  { %2836 = vmatprep.subr.bf16.mxu1 %v3528_v1  ;;  %2846 = vmatprep.subr.bf16.mxu0 %v3528_v1 }
  0x6b   :  { %2837 = vmatpush3.bf16.msra.mxu1 %v3692_v11  ;;  %2847 = vmatpush3.bf16.msra.mxu0 %v3687_v10 }
  0x6c   :  { %2854 = vmatprep.subr.bf16.mxu1 %v3528_v1  ;;  %2848 = vmatprep.subr.bf16.mxu0 %v3528_v1 }
  0x6e   :  { %2839 = vmatmul.mubr.bf16.vlgmr.msra.gmra.mrb[0].mxu1 %v3529_v2 }
  0x6f   :  { %2855 = vmatpush3.bf16.msra.mxu1 %v3674_v4  ;;  %2862 = vmatprep.mubr.msk.bf16.mxu1 %vm3530_vm0, %v3528_v1 }
  0x70   :  { %2849 = vmatpush3.bf16.msra.mxu0 %v3692_v11  ;;  %2856 = vmatprep.subr.bf16.mxu1 %v3528_v1 }
  0x71   :  { %2866 = vmatprep.subr.bf16.mxu0 %v3528_v1 }
  0x73   :  { %2857 = vmatpush3.bf16.msra.mxu1 %v3683_v9 }
  0x74   :  { %2858 = vmatprep.subr.bf16.mxu1 %v3528_v1 }
  0x77   :  { %2859 = vmatpush3.bf16.msra.mxu1 %v3687_v10 }
  0x78   :  { %2860 = vmatprep.subr.bf16.mxu1 %v3528_v1 }
  0x7b   :  { %2861 = vmatpush3.bf16.msra.mxu1 %v3692_v11 }
  0x7c   :  { %2878 = vmatprep.subr.bf16.mxu1 %v3528_v1 }
 0x135   :  { %v195_v19 = vpop.f32.mrb[0].mxu0 }
 0x136   :  { %v196_v20 = vadd.f32 %v195_v19, %v140_v17  ;;  %v197_v21 = vpop.f32.mrb[1].mxu0 }
 0x137   :  { %v198_v22 = vadd.f32 %v197_v21, %v144_v18  ;;  %v199_v23 = vpop.f32.mrb[2].mxu0 }
 0x138   :  { %v200_v24 = vadd.f32 %v199_v23, %v140_v17  ;;  %v201_v25 = vpop.f32.mrb[3].mxu0  ;;  %v210_v26 = vrot.slane %v196_v20, 2  ;;  %v215_v27 = vrot.slane %v196_v20, 4  ;;  %v218_v28 = vrot.slane %v196_v20, 6 }
 0x139   :  { %v202_v29 = vadd.f32 %v201_v25, %v144_v18  ;;  %v224_v30 = vrot.slane %v198_v22, 4  ;;  %v230_v31 = vrot.slane %v198_v22, 2  ;;  %v238_v32 = vrot.slane %v198_v22, 6 }
 0x13a   :  { %v228_v33 = vrot.slane %v200_v24, 2  ;;  %v233_v34 = vrot.slane %v200_v24, 4  ;;  %v236_v35 = vrot.slane %v200_v24, 6 }
 0x13b   :  { %v205_v36 = vrot.slane %v202_v29, 4  ;;  %v212_v37 = vrot.slane %v202_v29, 2  ;;  %v3733_v38 = vsel %vm207_vm2, %v215_v27, %v202_v29  ;;  %v220_v39 = vrot.slane %v202_v29, 6 }
 0x13c   :  { %v3736_v40 = vsel %vm207_vm2, %v200_v24, %v224_v30  ;;  %v3739_v41 = vsel %vm207_vm2, %v228_v33, %v230_v31  ;;  %v3742_v42 = vsel %vm207_vm2, %v233_v34, %v198_v22  ;;  %v3745_v43 = vsel %vm207_vm2, %v236_v35, %v238_v32 }
 0x13d   :  { %v208_v44 = vsel %vm207_vm2, %v196_v20, %v205_v36  ;;  %v214_v45 = vsel %vm207_vm2, %v210_v26, %v212_v37  ;;  %v3750_v46 = vsel %vm207_vm2, %v218_v28, %v220_v39 }
 0x141   :  { %v303_v47 = vpop.f32.mrb[0].mxu1 }
 0x142   :  { %v309_v48 = vadd.f32 %v303_v47, %v208_v44  ;;  %v2840_v49 = vpop.f32.mrb[1].mxu1 }
 0x143   :  { %v306_v50 = vpop.f32.mrb[2].mxu1 }
 0x144   :  { %v2841_v51 = vpop.f32.mrb[3].mxu1  ;;  %3211 = vtanh.f32 %v309_v48  ;;  %v2637_v53 = vmul.f32 -1.442695, %v309_v48 }
 0x146   :  { %3213 = vpow2.f32 %v2637_v53 }
 0x14e   :  { %v3212_v52 = vpop.eup %3211 }
 0x14f   :  { %319 = vrot.lane.b32.xlu0 %v3212_v52, %s3520_s14 }
 0x150   :  { %v3214_v54 = vpop.eup %3213 }
 0x151   :  { %v313_v55 = vadd.f32 1.0, %v3214_v54 }
 0x153   :  { %3215 = vrcp.f32 %v313_v55 }
 0x15d   :  { %v3216_v56 = vpop.eup %3215 }
 0x15e   :  { %v317_v59 = vmul.f32 0.0, %v3216_v56 }
 0x1c1   :  { %v320_v57 = vpop.permute.xlu0 %319 }
 0x1c2   :  { %v322_v58 = vmul.f32 %v3216_v56, %v320_v57 }
 0x1c4   :  { %324 = vrot.lane.b32.xlu0 %v322_v58, %s3531_s2 }
 0x236   :  { %v325_v60 = vpop.permute.xlu0 %324 }
 0x237   :  { %v327_v61 = vadd.f32 %v325_v60, %v317_v59 }
 0x239   :  { %3217 = vtanh.f32 %v327_v61 }
 0x243   :  { %v3218_v62 = vpop.eup %3217 }
 0x244   :  { %330 = vrot.lane.b32.xlu1 %v3218_v62, %s3520_s14 }
 0x2b6   :  { %v331_v63 = vpop.permute.xlu1 %330 }
 0x2b7   :  { %v3755_v0 = vmul.f32 %v3216_v56, %v331_v63 }
 0x2b9   :  { %338 = vrot.lane.b32.xlu0 %v3755_v0, %s3520_s14  ;;  %335 = vrot.lane.b32.xlu1 %v3755_v0, %s3531_s2 }
 0x32b   :  { %v339_v6 = vpop.permute.xlu0 %338  ;;  %v3766_v7 = vpop.permute.xlu1 %335 }
 0x32c   :  { %v342_v8 = vsel %vm341_vm8, %v3766_v7, %v339_v6 }
 0x32d   :  { %v343_v15 = vmul.f32 %v3764_v5, %v342_v8 }
 0x32f   :  { %v344_v12 = vpack.c.bf16 %v343_v15, %v343_v15 }
 0x331   :  { %2851 = vmatmul.mubr.msk.bf16.vlgmr.msra.gmra.mrb[4].mxu0 %vm265_vm9, %v344_v12 }
 0x332   :  { %2867 = vmatpush3.bf16.msra.mxu0 %v3674_v4  ;;  %2874 = vmatprep.mubr.msk.bf16.mxu0 %vm3530_vm0, %v3528_v1 }
 0x333   :  { %2868 = vmatprep.subr.bf16.mxu0 %v3528_v1 }
 0x336   :  { %2869 = vmatpush3.bf16.msra.mxu0 %v3683_v9 }
 0x337   :  { %2870 = vmatprep.subr.bf16.mxu0 %v3528_v1 }
 0x33a   :  { %2871 = vmatpush3.bf16.msra.mxu0 %v3687_v10 }
 0x33b   :  { %2872 = vmatprep.subr.bf16.mxu0 %v3528_v1 }
 0x33e   :  { %2873 = vmatpush3.bf16.msra.mxu0 %v3692_v11 }
 0x33f   :  { %2890 = vmatprep.subr.bf16.mxu0 %v3528_v1 }
 0x404   :  { %v382_v13 = vpop.f32.mrb[4].mxu0 }
 0x405   :  { %v388_v17 = vadd.f32 %v382_v13, %v214_v45  ;;  %v2852_v18 = vpop.f32.mrb[5].mxu0 }
 0x406   :  { %v385_v19 = vpop.f32.mrb[6].mxu0 }
 0x407   :  { %3219 = vtanh.f32 %v388_v17  ;;  %v2853_v20 = vpop.f32.mrb[7].mxu0  ;;  %v2639_v22 = vmul.f32 -1.442695, %v388_v17 }
 0x409   :  { %3221 = vpow2.f32 %v2639_v22 }
 0x411   :  { %v3220_v21 = vpop.eup %3219 }
 0x412   :  { %398 = vrot.lane.b32.xlu1 %v3220_v21, %s3520_s14 }
 0x413   :  { %v3222_v23 = vpop.eup %3221 }
 0x414   :  { %v392_v24 = vadd.f32 1.0, %v3222_v23 }
 0x416   :  { %3223 = vrcp.f32 %v392_v24 }
 0x420   :  { %v3224_v25 = vpop.eup %3223 }
 0x421   :  { %v396_v28 = vmul.f32 %v3224_v25, %v327_v61 }
 0x484   :  { %v399_v26 = vpop.permute.xlu1 %398 }
 0x485   :  { %v401_v27 = vmul.f32 %v3224_v25, %v399_v26 }
 0x487   :  { %403 = vrot.lane.b32.xlu0 %v401_v27, %s3531_s2 }
 0x4f9   :  { %v404_v29 = vpop.permute.xlu0 %403 }
 0x4fa   :  { %v406_v30 = vadd.f32 %v404_v29, %v396_v28 }
 0x4fc   :  { %3225 = vtanh.f32 %v406_v30 }
 0x506   :  { %v3226_v31 = vpop.eup %3225 }
 0x507   :  { %409 = vrot.lane.b32.xlu1 %v3226_v31, %s3520_s14 }
 0x579   :  { %v410_v32 = vpop.permute.xlu1 %409 }
 0x57a   :  { %v3785_v33 = vmul.f32 %v3224_v25, %v410_v32  ;;  %v920_v32 = vrot.slane %v3755_v0, 2 }
 0x57c   :  { %417 = vrot.lane.b32.xlu1 %v3785_v33, %s3520_s14  ;;  %414 = vrot.lane.b32.xlu0 %v3785_v33, %s3531_s2 }
 0x5ee   :  { %v418_v34 = vpop.permute.xlu1 %417  ;;  %v3791_v35 = vpop.permute.xlu0 %414 }
 0x5ef   :  { %v420_v36 = vsel %vm341_vm8, %v3791_v35, %v418_v34 }
 0x5f0   :  { %v421_v37 = vmul.f32 %v3764_v5, %v420_v36 }
 0x5f2   :  { %v422_v39 = vpack.c.bf16 %v421_v37, %v421_v37 }
 0x5f4   :  { %2863 = vmatmul.mubr.msk.bf16.vlgmr.msra.gmra.mrb[4].mxu1 %vm265_vm9, %v422_v39 }
 0x5f5   :  { %2879 = vmatpush3.bf16.msra.mxu1 %v3674_v4  ;;  %2886 = vmatprep.mubr.msk.bf16.mxu1 %vm3530_vm0, %v3528_v1 }
 0x5f6   :  { %2880 = vmatprep.subr.bf16.mxu1 %v3528_v1 }
 0x5f9   :  { %2881 = vmatpush3.bf16.msra.mxu1 %v3683_v9 }
 0x5fa   :  { %2882 = vmatprep.subr.bf16.mxu1 %v3528_v1 }
 0x5fd   :  { %2883 = vmatpush3.bf16.msra.mxu1 %v3687_v10 }
 0x5fe   :  { %2884 = vmatprep.subr.bf16.mxu1 %v3528_v1 }
 0x601   :  { %2885 = vmatpush3.bf16.msra.mxu1 %v3692_v11 }
 0x602   :  { %2902 = vmatprep.subr.bf16.mxu1 %v3528_v1 }
 0x6c7   :  { %v460_v44 = vpop.f32.mrb[4].mxu1 }
 0x6c8   :  { %v466_v45 = vadd.f32 %v460_v44, %v3733_v38  ;;  %v2864_v47 = vpop.f32.mrb[5].mxu1 }
 0x6c9   :  { %v463_v48 = vpop.f32.mrb[6].mxu1 }
 0x6ca   :  { %3227 = vtanh.f32 %v466_v45  ;;  %v2865_v49 = vpop.f32.mrb[7].mxu1  ;;  %v2641_v51 = vmul.f32 -1.442695, %v466_v45 }
 0x6cc   :  { %3229 = vpow2.f32 %v2641_v51 }
 0x6d4   :  { %v3228_v50 = vpop.eup %3227 }
 0x6d5   :  { %476 = vrot.lane.b32.xlu0 %v3228_v50, %s3520_s14 }
 0x6d6   :  { %v3230_v52 = vpop.eup %3229 }
 0x6d7   :  { %v470_v53 = vadd.f32 1.0, %v3230_v52 }
 0x6d9   :  { %3231 = vrcp.f32 %v470_v53 }
 0x6e3   :  { %v3232_v54 = vpop.eup %3231 }
 0x6e4   :  { %v474_v57 = vmul.f32 %v3232_v54, %v406_v30 }
 0x747   :  { %v477_v55 = vpop.permute.xlu0 %476 }
 0x748   :  { %v479_v56 = vmul.f32 %v3232_v54, %v477_v55 }
 0x74a   :  { %481 = vrot.lane.b32.xlu1 %v479_v56, %s3531_s2 }
 0x7bc   :  { %v482_v58 = vpop.permute.xlu1 %481 }
 0x7bd   :  { %v484_v38 = vadd.f32 %v482_v58, %v474_v57 }
 0x7bf   :  { %3233 = vtanh.f32 %v484_v38 }
 0x7c9   :  { %v3234_v59 = vpop.eup %3233 }
 0x7ca   :  { %487 = vrot.lane.b32.xlu0 %v3234_v59, %s3520_s14 }
 0x83c   :  { %v488_v60 = vpop.permute.xlu0 %487 }
 0x83d   :  { %v3811_v61 = vmul.f32 %v3232_v54, %v488_v60 }
 0x83f   :  { %495 = vrot.lane.b32.xlu0 %v3811_v61, %s3520_s14  ;;  %492 = vrot.lane.b32.xlu1 %v3811_v61, %s3531_s2 }
 0x8b1   :  { %v496_v62 = vpop.permute.xlu0 %495  ;;  %v3817_v63 = vpop.permute.xlu1 %492 }
 0x8b2   :  { %v498_v3 = vsel %vm341_vm8, %v3817_v63, %v496_v62 }
 0x8b3   :  { %v499_v6 = vmul.f32 %v3764_v5, %v498_v3 }
 0x8b5   :  { %v500_v8 = vpack.c.bf16 %v499_v6, %v499_v6 }
 0x8b7   :  { %2875 = vmatmul.mubr.msk.bf16.vlgmr.msra.gmra.mrb[8].mxu0 %vm265_vm9, %v500_v8 }
 0x8b8   :  { %2891 = vmatpush3.bf16.msra.mxu0 %v3674_v4  ;;  %2898 = vmatprep.mubr.msk.bf16.mxu0 %vm3530_vm0, %v3528_v1 }
 0x8b9   :  { %2892 = vmatprep.subr.bf16.mxu0 %v3528_v1 }
 0x8bc   :  { %2893 = vmatpush3.bf16.msra.mxu0 %v3683_v9 }
 0x8bd   :  { %2894 = vmatprep.subr.bf16.mxu0 %v3528_v1 }
 0x8c0   :  { %2895 = vmatpush3.bf16.msra.mxu0 %v3687_v10 }
 0x8c1   :  { %2896 = vmatprep.subr.bf16.mxu0 %v3528_v1 }
 0x8c4   :  { %2897 = vmatpush3.bf16.msra.mxu0 %v3692_v11 }
 0x8c5   :  { %2914 = vmatprep.subr.bf16.mxu0 %v3528_v1 }
 0x98a   :  { %v538_v15 = vpop.f32.mrb[8].mxu0 }
 0x98b   :  { %v544_v12 = vadd.f32 %v538_v15, %v3750_v46  ;;  %v2876_v13 = vpop.f32.mrb[9].mxu0 }
 0x98c   :  { %v541_v17 = vpop.f32.mrb[10].mxu0 }
 0x98d   :  { %3235 = vtanh.f32 %v544_v12  ;;  %v2877_v18 = vpop.f32.mrb[11].mxu0  ;;  %v2643_v20 = vmul.f32 -1.442695, %v544_v12 }
 0x98f   :  { %3237 = vpow2.f32 %v2643_v20 }
 0x997   :  { %v3236_v19 = vpop.eup %3235 }
 0x998   :  { %554 = vrot.lane.b32.xlu1 %v3236_v19, %s3520_s14 }
 0x999   :  { %v3238_v21 = vpop.eup %3237 }
 0x99a   :  { %v548_v22 = vadd.f32 1.0, %v3238_v21 }
 0x99c   :  { %3239 = vrcp.f32 %v548_v22 }
 0x9a6   :  { %v3240_v23 = vpop.eup %3239 }
 0x9a7   :  { %v552_v26 = vmul.f32 %v3240_v23, %v484_v38 }
 0xa0a   :  { %v555_v24 = vpop.permute.xlu1 %554 }
 0xa0b   :  { %v557_v25 = vmul.f32 %v3240_v23, %v555_v24 }
 0xa0d   :  { %559 = vrot.lane.b32.xlu0 %v557_v25, %s3531_s2 }
 0xa7f   :  { %v560_v27 = vpop.permute.xlu0 %559 }
 0xa80   :  { %v562_v46 = vadd.f32 %v560_v27, %v552_v26 }
 0xa82   :  { %3241 = vtanh.f32 %v562_v46 }
 0xa8c   :  { %v3242_v28 = vpop.eup %3241 }
 0xa8d   :  { %565 = vrot.lane.b32.xlu1 %v3242_v28, %s3520_s14 }
 0xaff   :  { %v566_v29 = vpop.permute.xlu1 %565 }
 0xb00   :  { %v568_v30 = vmul.f32 %v3240_v23, %v566_v29  ;;  %v912_v29 = vrot.slane %v3785_v33, 2 }
 0xb02   :  { %573 = vrot.lane.b32.xlu1 %v568_v30, %s3520_s14  ;;  %570 = vrot.lane.b32.xlu0 %v568_v30, %s3531_s2  ;;  %v902_v31 = vrot.slane %v568_v30, 2 }
 0xb04   :  { %v3840_v34 = vpack.i.bf16 %v920_v32, %v902_v31 }
 0xb74   :  { %v574_v36 = vpop.permute.xlu1 %573  ;;  %v3842_v37 = vpop.permute.xlu0 %570 }
 0xb75   :  { %v576_v39 = vsel %vm341_vm8, %v3842_v37, %v574_v36 }
 0xb76   :  { %v577_v44 = vmul.f32 %v3764_v5, %v576_v39 }
 0xb78   :  { %v578_v45 = vpack.c.bf16 %v577_v44, %v577_v44 }
 0xb7a   :  { %2887 = vmatmul.mubr.msk.bf16.vlgmr.msra.gmra.mrb[8].mxu1 %vm265_vm9, %v578_v45 }
 0xb7b   :  { %2903 = vmatpush3.bf16.msra.mxu1 %v3674_v4  ;;  %2910 = vmatprep.mubr.msk.bf16.mxu1 %vm3530_vm0, %v3528_v1 }
 0xb7c   :  { %2904 = vmatprep.subr.bf16.mxu1 %v3528_v1 }
 0xb7f   :  { %2905 = vmatpush3.bf16.msra.mxu1 %v3683_v9 }
 0xb80   :  { %2906 = vmatprep.subr.bf16.mxu1 %v3528_v1 }
 0xb83   :  { %2907 = vmatpush3.bf16.msra.mxu1 %v3687_v10 }
 0xb84   :  { %2908 = vmatprep.subr.bf16.mxu1 %v3528_v1 }
 0xb87   :  { %2909 = vmatpush3.bf16.msra.mxu1 %v3692_v11 }
 0xc4d   :  { %v616_v0 = vpop.f32.mrb[8].mxu1 }
 0xc4e   :  { %v622_v47 = vadd.f32 %v616_v0, %v3736_v40  ;;  %v2888_v48 = vpop.f32.mrb[9].mxu1 }
 0xc4f   :  { %v619_v49 = vpop.f32.mrb[10].mxu1 }
 0xc50   :  { %3243 = vtanh.f32 %v622_v47  ;;  %v2889_v50 = vpop.f32.mrb[11].mxu1  ;;  %v2645_v52 = vmul.f32 -1.442695, %v622_v47 }
 0xc52   :  { %3245 = vpow2.f32 %v2645_v52 }
 0xc5a   :  { %v3244_v51 = vpop.eup %3243 }
 0xc5b   :  { %632 = vrot.lane.b32.xlu0 %v3244_v51, %s3520_s14 }
 0xc5c   :  { %v3246_v53 = vpop.eup %3245 }
 0xc5d   :  { %v626_v54 = vadd.f32 1.0, %v3246_v53 }
 0xc5f   :  { %3247 = vrcp.f32 %v626_v54 }
 0xc69   :  { %v3248_v55 = vpop.eup %3247 }
 0xc6a   :  { %v630_v58 = vmul.f32 %v3248_v55, %v562_v46 }
 0xccd   :  { %v633_v56 = vpop.permute.xlu0 %632 }
 0xcce   :  { %v635_v57 = vmul.f32 %v3248_v55, %v633_v56 }
 0xcd0   :  { %637 = vrot.lane.b32.xlu1 %v635_v57, %s3531_s2 }
 0xd42   :  { %v638_v38 = vpop.permute.xlu1 %637 }
 0xd43   :  { %v640_v40 = vadd.f32 %v638_v38, %v630_v58 }
 0xd45   :  { %3249 = vtanh.f32 %v640_v40 }
 0xd4f   :  { %v3250_v59 = vpop.eup %3249 }
 0xd50   :  { %643 = vrot.lane.b32.xlu0 %v3250_v59, %s3520_s14 }
 0xdc2   :  { %v644_v60 = vpop.permute.xlu0 %643 }
 0xdc3   :  { %v3861_v62 = vmul.f32 %v3248_v55, %v644_v60  ;;  %v907_v60 = vrot.slane %v3811_v61, 2 }
 0xdc5   :  { %651 = vrot.lane.b32.xlu0 %v3861_v62, %s3520_s14  ;;  %648 = vrot.lane.b32.xlu1 %v3861_v62, %s3531_s2 }
 0xe37   :  { %v652_v3 = vpop.permute.xlu0 %651  ;;  %v3867_v6 = vpop.permute.xlu1 %648 }
 0xe38   :  { %v654_v8 = vsel %vm341_vm8, %v3867_v6, %v652_v3 }
 0xe39   :  { %v655_v15 = vmul.f32 %v3764_v5, %v654_v8 }
 0xe3b   :  { %v656_v12 = vpack.c.bf16 %v655_v15, %v655_v15 }
 0xe3d   :  { %2899 = vmatmul.mubr.msk.bf16.vlgmr.msra.gmra.mrb[12].mxu0 %vm265_vm9, %v656_v12 }
 0xe3e   :  { %2915 = vmatpush3.bf16.msra.mxu0 %v3674_v4  ;;  %2922 = vmatprep.mubr.msk.bf16.mxu0 %vm3530_vm0, %v3528_v1 }
 0xe3f   :  { %2916 = vmatprep.subr.bf16.mxu0 %v3528_v1 }
 0xe42   :  { %2917 = vmatpush3.bf16.msra.mxu0 %v3683_v9 }
 0xe43   :  { %2918 = vmatprep.subr.bf16.mxu0 %v3528_v1 }
 0xe46   :  { %2919 = vmatpush3.bf16.msra.mxu0 %v3687_v10 }
 0xe47   :  { %2920 = vmatprep.subr.bf16.mxu0 %v3528_v1 }
 0xe4a   :  { %2921 = vmatpush3.bf16.msra.mxu0 %v3692_v11 }
 0xe4b   :  { %2926 = vmatprep.subr.bf16.mxu0 %v3528_v1 }
 0xf10   :  { %v694_v13 = vpop.f32.mrb[12].mxu0 }
 0xf11   :  { %v700_v4 = vadd.f32 %v694_v13, %v3739_v41  ;;  %v2900_v17 = vpop.f32.mrb[13].mxu0 }
 0xf12   :  { %v697_v18 = vpop.f32.mrb[14].mxu0 }
 0xf13   :  { %3251 = vtanh.f32 %v700_v4  ;;  %v2901_v19 = vpop.f32.mrb[15].mxu0  ;;  %v2647_v9 = vmul.f32 -1.442695, %v700_v4 }
 0xf15   :  { %3253 = vpow2.f32 %v2647_v9 }
 0xf1d   :  { %v3252_v20 = vpop.eup %3251 }
 0xf1e   :  { %710 = vrot.lane.b32.xlu1 %v3252_v20, %s3520_s14 }
 0xf1f   :  { %v3254_v21 = vpop.eup %3253 }
 0xf20   :  { %v704_v10 = vadd.f32 1.0, %v3254_v21 }
 0xf22   :  { %3255 = vrcp.f32 %v704_v10 }
 0xf2c   :  { %v3256_v22 = vpop.eup %3255 }
 0xf2d   :  { %v708_v24 = vmul.f32 %v3256_v22, %v640_v40 }
 0xf90   :  { %v711_v23 = vpop.permute.xlu1 %710 }
 0xf91   :  { %v713_v11 = vmul.f32 %v3256_v22, %v711_v23 }
 0xf93   :  { %715 = vrot.lane.b32.xlu0 %v713_v11, %s3531_s2 }
0x1005   :  { %v716_v25 = vpop.permute.xlu0 %715 }
0x1006   :  { %v718_v41 = vadd.f32 %v716_v25, %v708_v24 }
0x1008   :  { %3257 = vtanh.f32 %v718_v41 }
0x1012   :  { %v3258_v26 = vpop.eup %3257 }
0x1013   :  { %721 = vrot.lane.b32.xlu1 %v3258_v26, %s3520_s14  ;;  %v3179_v26 = vld [vmem:[#allocation7] ss:$8 sps:$4 sm:$0xff]  }
0x1085   :  { %v722_v27 = vpop.permute.xlu1 %721 }
0x1086   :  { %v724_v46 = vmul.f32 %v3256_v22, %v722_v27  ;;  %v3181_v27 = vld [vmem:[#allocation7 + $0x4] ss:$8 sps:$4 sm:$0xff]  }
0x1087   :  { %1023 = vmatprep.subr.bf16.mxu1 %v3181_v27 }
0x1088   :  { %729 = vrot.lane.b32.xlu1 %v724_v46, %s3520_s14  ;;  %726 = vrot.lane.b32.xlu0 %v724_v46, %s3531_s2  ;;  %v892_v28 = vrot.slane %v724_v46, 2 }
0x108a   :  { %v3890_v30 = vpack.i.bf16 %v912_v29, %v892_v28  ;;  %v3184_v28 = vld [vmem:[#allocation7 + $0x14] ss:$8 sps:$4 sm:$0xff]   ;;  %v3182_v29 = vld [vmem:[#allocation7 + $0x10] ss:$8 sps:$4 sm:$0xff]  }
0x10fa   :  { %v730_v31 = vpop.permute.xlu1 %729  ;;  %v3892_v32 = vpop.permute.xlu0 %726 }
0x10fb   :  { %v732_v36 = vsel %vm341_vm8, %v3892_v32, %v730_v31  ;;  %v3923_v31 = vld [vmem:[#allocation8] sm:$0xff]  }
0x10fc   :  { %v733_v39 = vmul.f32 %v3764_v5, %v732_v36  ;;  %v3188_v36 = vld [vmem:[#allocation7 + $0x24] ss:$8 sps:$4 sm:$0xff]  }
0x10fe   :  { %v734_v44 = vpack.c.bf16 %v733_v39, %v733_v39  ;;  %v3186_v39 = vld [vmem:[#allocation7 + $0x20] ss:$8 sps:$4 sm:$0xff]  }
0x1100   :  { %2911 = vmatmul.mubr.msk.bf16.vlgmr.msra.gmra.mrb[12].mxu1 %vm265_vm9, %v734_v44  ;;  %v3927_v44 = vld [vmem:[#allocation8 + $0x8] sm:$0xff]  }
0x1101   :  { %1055 = vmatprep.mubr.bf16.mxu1 %v3529_v2  ;;  %1024 = vmatpush1.bf16.msra.mxu1 %v3179_v26 }
0x1102   :  { %1025 = vmatprep.subr.bf16.mxu1 %v3184_v28 }
0x1105   :  { %1026 = vmatpush1.bf16.msra.mxu1 %v3182_v29 }
0x1106   :  { %1027 = vmatprep.subr.bf16.mxu1 %v3188_v36 }
0x1109   :  { %1028 = vmatpush1.bf16.msra.mxu1 %v3186_v39 }
0x11d3   :  { %v772_v45 = vpop.f32.mrb[12].mxu1 }
0x11d4   :  { %v778_v0 = vadd.f32 %v772_v45, %v3742_v42  ;;  %v2912_v47 = vpop.f32.mrb[13].mxu1  ;;  %v3192_v45 = vld [vmem:[#allocation7 + $0x34] ss:$8 sps:$4 sm:$0xff]  }
0x11d5   :  { %v775_v33 = vpop.f32.mrb[14].mxu1  ;;  %1029 = vmatprep.subr.bf16.mxu1 %v3192_v45  ;;  %v3931_v47 = vld [vmem:[#allocation8 + $0x10] sm:$0xff]  }
0x11d6   :  { %3259 = vtanh.f32 %v778_v0  ;;  %v2913_v48 = vpop.f32.mrb[15].mxu1  ;;  %v2649_v50 = vmul.f32 -1.442695, %v778_v0  ;;  %v3190_v0 = vld [vmem:[#allocation7 + $0x30] ss:$8 sps:$4 sm:$0xff]  }
0x11d7   :  { %1030 = vmatpush1.bf16.msra.mxu1 %v3190_v0  ;;  %v897_v48 = vrot.slane %v3861_v62, 2 }
0x11d8   :  { %3261 = vpow2.f32 %v2649_v50  ;;  %2938 = vmatprep.subr.bf16.mxu1 %v3528_v1 }
0x11e0   :  { %v3260_v49 = vpop.eup %3259 }
0x11e1   :  { %788 = vrot.lane.b32.xlu0 %v3260_v49, %s3520_s14  ;;  %v3937_v49 = vld [vmem:[#allocation8 + $0x18] sm:$0xff]  }
0x11e2   :  { %v3262_v51 = vpop.eup %3261 }
0x11e3   :  { %v782_v52 = vadd.f32 1.0, %v3262_v51 }
0x11e5   :  { %3263 = vrcp.f32 %v782_v52 }
0x11ef   :  { %v3264_v53 = vpop.eup %3263 }
0x11f0   :  { %v786_v56 = vmul.f32 %v3264_v53, %v718_v41 }
0x1253   :  { %v789_v54 = vpop.permute.xlu0 %788 }
0x1254   :  { %v791_v55 = vmul.f32 %v3264_v53, %v789_v54 }
0x1256   :  { %793 = vrot.lane.b32.xlu1 %v791_v55, %s3531_s2 }
0x12c8   :  { %v794_v57 = vpop.permute.xlu1 %793 }
0x12c9   :  { %v796_v42 = vadd.f32 %v794_v57, %v786_v56 }
0x12cb   :  { %3265 = vtanh.f32 %v796_v42 }
0x12d5   :  { %v3266_v58 = vpop.eup %3265 }
0x12d6   :  { %799 = vrot.lane.b32.xlu0 %v3266_v58, %s3520_s14 }
0x1348   :  { %v800_v38 = vpop.permute.xlu0 %799 }
0x1349   :  { %v802_v40 = vmul.f32 %v3264_v53, %v800_v38 }
0x134b   :  { %807 = vrot.lane.b32.xlu0 %v802_v40, %s3520_s14  ;;  %804 = vrot.lane.b32.xlu1 %v802_v40, %s3531_s2  ;;  %v887_v59 = vrot.slane %v802_v40, 2 }
0x134d   :  { %v3132_v3 = vpack.i.bf16 %v907_v60, %v887_v59 }
0x13bd   :  { %v808_v8 = vpop.permute.xlu0 %807  ;;  %v3906_v15 = vpop.permute.xlu1 %804 }
0x13be   :  { %v810_v12 = vsel %vm341_vm8, %v3906_v15, %v808_v8 }
0x13bf   :  { %v811_v13 = vmul.f32 %v3764_v5, %v810_v12 }
0x13c1   :  { %v812_v4 = vpack.c.bf16 %v811_v13, %v811_v13 }
0x13c3   :  { %2923 = vmatmul.mubr.msk.bf16.vlgmr.msra.gmra.mrb[16].mxu0 %vm265_vm9, %v812_v4 }
0x13c4   :  { %2934 = vmatprep.mubr.msk.bf16.mxu0 %vm3530_vm0, %v3528_v1  ;;  %2927 = vmatpush3.bf16.msra.mxu0 %v3923_v31 }
0x13c5   :  { %2928 = vmatprep.subr.bf16.mxu0 %v3528_v1 }
0x13c8   :  { %2929 = vmatpush3.bf16.msra.mxu0 %v3927_v44 }
0x13c9   :  { %2930 = vmatprep.subr.bf16.mxu0 %v3528_v1 }
0x13cc   :  { %2931 = vmatpush3.bf16.msra.mxu0 %v3931_v47 }
0x13cd   :  { %2932 = vmatprep.subr.bf16.mxu0 %v3528_v1 }
0x13d0   :  { %2933 = vmatpush3.bf16.msra.mxu0 %v3937_v49 }
0x13d1   :  { %2950 = vmatprep.subr.bf16.mxu0 %v3528_v1 }
0x13d3   :  { %2935 = vmatmul.mubr.bf16.vlgmr.msra.gmra.mrb[20].mxu0 %v3529_v2 }
0x13d4   :  { %2951 = vmatpush3.bf16.msra.mxu0 %v3923_v31  ;;  %2958 = vmatprep.mubr.msk.bf16.mxu0 %vm3530_vm0, %v3528_v1 }
0x13d5   :  { %2952 = vmatprep.subr.bf16.mxu0 %v3528_v1 }
0x13d8   :  { %2953 = vmatpush3.bf16.msra.mxu0 %v3927_v44 }
0x13d9   :  { %2954 = vmatprep.subr.bf16.mxu0 %v3528_v1 }
0x13dc   :  { %2955 = vmatpush3.bf16.msra.mxu0 %v3931_v47 }
0x13dd   :  { %2956 = vmatprep.subr.bf16.mxu0 %v3528_v1 }
0x13e0   :  { %2957 = vmatpush3.bf16.msra.mxu0 %v3937_v49 }
0x13e1   :  { %2974 = vmatprep.subr.bf16.mxu0 %v3528_v1 }
0x1496   :  { %v850_v17 = vpop.f32.mrb[16].mxu0 }
0x1497   :  { %v856_v18 = vadd.f32 %v850_v17, %v3745_v43  ;;  %v2924_v19 = vpop.f32.mrb[17].mxu0 }
0x1498   :  { %v853_v61 = vpop.f32.mrb[18].mxu0 }
0x1499   :  { %3267 = vtanh.f32 %v856_v18  ;;  %v2925_v20 = vpop.f32.mrb[19].mxu0  ;;  %v2651_v21 = vmul.f32 -1.442695, %v856_v18 }
0x149b   :  { %3269 = vpow2.f32 %v2651_v21 }
0x14a3   :  { %v3268_v9 = vpop.eup %3267 }
0x14a4   :  { %866 = vrot.lane.b32.xlu1 %v3268_v9, %s3520_s14 }
0x14a5   :  { %v3270_v10 = vpop.eup %3269 }
0x14a6   :  { %v860_v22 = vadd.f32 1.0, %v3270_v10 }
0x14a8   :  { %3271 = vrcp.f32 %v860_v22  ;;  %v1160_v22 = vpop.f32.mrb[20].mxu0 }
0x14b2   :  { %v3272_v23 = vpop.eup %3271 }
0x14b3   :  { %v864_v43 = vmul.f32 %v3272_v23, %v796_v42 }
0x1516   :  { %v867_v11 = vpop.permute.xlu1 %866 }
0x1517   :  { %v869_v24 = vmul.f32 %v3272_v23, %v867_v11 }
0x1519   :  { %871 = vrot.lane.b32.xlu0 %v869_v24, %s3531_s2 }
0x151d   :  { %3133 = vrot.lane.b32.xlu0 %v3132_v3, %s3520_s14 }
0x158b   :  { %v872_v25 = vpop.permute.xlu0 %871 }
0x158c   :  { %v874_v41 = vadd.f32 %v872_v25, %v864_v43  ;;  %v968_v43 = vld [vmem:[%s4416_s5] sm:$0x3] }
0x158d   :  { %v973_v25 = vrot.slane %v968_v43, %v3722_v14 }
0x158e   :  { %3273 = vtanh.f32 %v874_v41  ;;  %v977_v41 = vrot.slane %v968_v43, %v3728_v16 }
0x158f   :  { %v3134_v51 = vpop.permute.xlu0 %3133 }
0x1590   :  { %v3136_v53 = vunpack.i.h.bf16 %v3134_v51  ;;  %v3135_v54 = vunpack.i.l.bf16 %v3134_v51 }
0x1592   :  { %v911_v42 = vsel %vm341_vm8, %v3892_v32, %v3136_v53  ;;  %v891_v58 = vsel %vm341_vm8, %v3791_v35, %v3135_v54 }
0x1593   :  { %v935_v8 = vrot.slane %v911_v42, 6  ;;  %v926_v12 = vrot.slane %v891_v58, 6 }
0x1598   :  { %v3274_v46 = vpop.eup %3273 }
0x1599   :  { %877 = vrot.lane.b32.xlu1 %v3274_v46, %s3520_s14 }
0x159d   :  { %3138 = vrot.lane.b32.xlu1 %v3890_v30, %s3520_s14 }
0x15a1   :  { %3143 = vrot.lane.b32.xlu1 %v3840_v34, %s3520_s14 }
0x160b   :  { %v878_v30 = vpop.permute.xlu1 %877 }
0x160c   :  { %v880_v34 = vmul.f32 %v3272_v23, %v878_v30  ;;  %v2936_v23 = vpop.f32.mrb[21].mxu0 }
0x160d   :  { %v1163_v11 = vpop.f32.mrb[22].mxu0 }
0x160e   :  { %v882_v33 = vrot.slane %v880_v34, 2  ;;  %v2937_v24 = vpop.f32.mrb[23].mxu0 }
0x160f   :  { %v3139_v62 = vpop.permute.xlu1 %3138 }
0x1610   :  { %v3147_v50 = vpack.i.bf16 %v897_v48, %v882_v33  ;;  %v3140_v55 = vunpack.i.l.bf16 %v3139_v62  ;;  %v3141_v57 = vunpack.i.h.bf16 %v3139_v62 }
0x1612   :  { %3148 = vrot.lane.b32.xlu0 %v3147_v50, %s3520_s14  ;;  %v896_v38 = vsel %vm341_vm8, %v3817_v63, %v3140_v55  ;;  %v916_v13 = vsel %vm341_vm8, %v3906_v15, %v3141_v57 }
0x1613   :  { %v3144_v52 = vpop.permute.xlu1 %3143  ;;  %v929_v4 = vrot.slane %v896_v38, 4  ;;  %v938_v61 = vrot.slane %v916_v13, 4 }
0x1614   :  { %v3145_v56 = vunpack.i.l.bf16 %v3144_v52  ;;  %v3146_v17 = vunpack.i.h.bf16 %v3144_v52 }
0x1616   :  { %917 = vrot.lane.b32.xlu0 %v880_v34, %s3531_s2  ;;  %v906_v59 = vsel %vm341_vm8, %v3867_v6, %v3145_v56 }
0x1617   :  { %v948_v63 = vsel %vm207_vm2, %v906_v59, %v935_v8 }
0x1618   :  { %v949_v21 = vsel %vm944_vm10, %v948_v63, %v938_v61 }
0x1684   :  { %v3149_v40 = vpop.permute.xlu0 %3148 }
0x1685   :  { %v3151_v60 = vunpack.i.h.bf16 %v3149_v40  ;;  %v3150_v3 = vunpack.i.l.bf16 %v3149_v40 }
0x1687   :  { %v901_v32 = vsel %vm341_vm8, %v3842_v37, %v3151_v60  ;;  %v886_v35 = vsel %vm341_vm8, %v3766_v7, %v3150_v3 }
0x1688   :  { %v932_v18 = vrot.slane %v901_v32, 2  ;;  %v943_v6 = vsel %vm207_vm2, %v886_v35, %v926_v12  ;;  %v918_v19 = vpop.permute.xlu0 %917 }
0x1689   :  { %v924_v20 = vsel %vm341_vm8, %v918_v19, %v3146_v17  ;;  %v945_v15 = vsel %vm944_vm10, %v943_v6, %v929_v4 }
0x168a   :  { %v941_v9 = vrot.slane %v924_v20, 2  ;;  %v947_v37 = vsel %vm946_vm11, %v945_v15, %v932_v18 }
0x168c   :  { %v950_v7 = vsel %vm946_vm11, %v949_v21, %v941_v9 }
0x168d   :  { %v951_v10 = vpack.c.bf16 %v950_v7, %v947_v37 }
0x168f   :  { %2660 = vmatmul.mubr.msk.bf16.vlgmr.msra.gmra.mrb[16].mxu1 %vm265_vm9, %v951_v10 }
0x1690   :  { %2939 = vmatpush3.bf16.msra.mxu1 %v3923_v31  ;;  %2946 = vmatprep.mubr.msk.bf16.mxu1 %vm3530_vm0, %v3528_v1 }
0x1691   :  { %2940 = vmatprep.subr.bf16.mxu1 %v3528_v1 }
0x1694   :  { %2941 = vmatpush3.bf16.msra.mxu1 %v3927_v44 }
0x1695   :  { %2942 = vmatprep.subr.bf16.mxu1 %v3528_v1 }
0x1698   :  { %2943 = vmatpush3.bf16.msra.mxu1 %v3931_v47 }
0x1699   :  { %2944 = vmatprep.subr.bf16.mxu1 %v3528_v1 }
0x169c   :  { %2945 = vmatpush3.bf16.msra.mxu1 %v3937_v49 }
0x169d   :  { %2962 = vmatprep.subr.bf16.mxu1 %v3528_v1 }
0x1762   :  { %v1057_v26 = vpop.f32.mrb[16].mxu1 }
0x1763   :  { %v1058_v27 = vadd.f32 %v1057_v26, %v973_v25  ;;  %v1059_v46 = vpop.f32.mrb[17].mxu1 }
0x1764   :  { %v1060_v28 = vadd.f32 %v1059_v46, %v977_v41  ;;  %v1061_v29 = vpop.f32.mrb[18].mxu1 }
0x1765   :  { %v1062_v36 = vadd.f32 %v1061_v29, %v973_v25  ;;  %v1063_v39 = vpop.f32.mrb[19].mxu1  ;;  %v1071_v45 = vrot.slane %v1058_v27, 2  ;;  %v1076_v30 = vrot.slane %v1058_v27, 4  ;;  %v1079_v50 = vrot.slane %v1058_v27, 6 }
0x1766   :  { %v1064_v0 = vadd.f32 %v1063_v39, %v977_v41  ;;  %v1085_v34 = vrot.slane %v1060_v28, 4  ;;  %v1091_v33 = vrot.slane %v1060_v28, 2  ;;  %v1099_v48 = vrot.slane %v1060_v28, 6 }
0x1767   :  { %v1089_v62 = vrot.slane %v1062_v36, 2  ;;  %v1094_v51 = vrot.slane %v1062_v36, 4  ;;  %v1097_v52 = vrot.slane %v1062_v36, 6 }
0x1768   :  { %v1067_v53 = vrot.slane %v1064_v0, 4  ;;  %v1073_v54 = vrot.slane %v1064_v0, 2  ;;  %v3992_v55 = vsel %vm207_vm2, %v1076_v30, %v1064_v0  ;;  %v1081_v56 = vrot.slane %v1064_v0, 6 }
0x1769   :  { %v3995_v57 = vsel %vm207_vm2, %v1062_v36, %v1085_v34  ;;  %v3998_v42 = vsel %vm207_vm2, %v1089_v62, %v1091_v33  ;;  %v4001_v58 = vsel %vm207_vm2, %v1094_v51, %v1060_v28  ;;  %v4004_v38 = vsel %vm207_vm2, %v1097_v52, %v1099_v48 }
0x176a   :  { %v1069_v40 = vsel %vm207_vm2, %v1058_v27, %v1067_v53  ;;  %v1075_v59 = vsel %vm207_vm2, %v1071_v45, %v1073_v54  ;;  %v4009_v60 = vsel %vm207_vm2, %v1079_v50, %v1081_v56 }
0x176b   :  { %v1166_v3 = vadd.f32 %v1160_v22, %v1069_v40 }
0x176d   :  { %3275 = vtanh.f32 %v1166_v3  ;;  %v2665_v12 = vmul.f32 -1.442695, %v1166_v3 }
0x176f   :  { %3277 = vpow2.f32 %v2665_v12 }
0x1777   :  { %v3276_v8 = vpop.eup %3275 }
0x1778   :  { %1176 = vrot.lane.b32.xlu1 %v3276_v8, %s3520_s14 }
0x1779   :  { %v3278_v13 = vpop.eup %3277 }
0x177a   :  { %v1170_v4 = vadd.f32 1.0, %v3278_v13 }
0x177c   :  { %3279 = vrcp.f32 %v1170_v4 }
0x1786   :  { %v3280_v17 = vpop.eup %3279 }
0x1787   :  { %v1174_v63 = vmul.f32 0.0, %v3280_v17 }
0x17ea   :  { %v1177_v32 = vpop.permute.xlu1 %1176 }
0x17eb   :  { %v1179_v35 = vmul.f32 %v3280_v17, %v1177_v32 }
0x17ed   :  { %1181 = vrot.lane.b32.xlu0 %v1179_v35, %s3531_s2 }
0x185f   :  { %v1182_v18 = vpop.permute.xlu0 %1181 }
0x1860   :  { %v1184_v6 = vadd.f32 %v1182_v18, %v1174_v63 }
0x1862   :  { %3281 = vtanh.f32 %v1184_v6 }
0x186c   :  { %v3282_v19 = vpop.eup %3281 }
0x186d   :  { %1187 = vrot.lane.b32.xlu1 %v3282_v19, %s3520_s14 }
0x18df   :  { %v1188_v61 = vpop.permute.xlu1 %1187 }
0x18e0   :  { %v4014_v20 = vmul.f32 %v3280_v17, %v1188_v61 }
0x18e2   :  { %1195 = vrot.lane.b32.xlu1 %v4014_v20, %s3520_s14  ;;  %1192 = vrot.lane.b32.xlu0 %v4014_v20, %s3531_s2 }
0x1954   :  { %v1196_v15 = vpop.permute.xlu1 %1195  ;;  %v4020_v9 = vpop.permute.xlu0 %1192 }
0x1955   :  { %v1198_v21 = vsel %vm341_vm8, %v4020_v9, %v1196_v15 }
0x1956   :  { %v1199_v37 = vmul.f32 %v3764_v5, %v1198_v21 }
0x1958   :  { %v1200_v7 = vpack.c.bf16 %v1199_v37, %v1199_v37 }
0x195a   :  { %2947 = vmatmul.mubr.msk.bf16.vlgmr.msra.gmra.mrb[20].mxu1 %vm265_vm9, %v1200_v7 }
0x195b   :  { %2963 = vmatpush3.bf16.msra.mxu1 %v3923_v31  ;;  %2970 = vmatprep.mubr.msk.bf16.mxu1 %vm3530_vm0, %v3528_v1 }
0x195c   :  { %2964 = vmatprep.subr.bf16.mxu1 %v3528_v1 }
0x195f   :  { %2965 = vmatpush3.bf16.msra.mxu1 %v3927_v44 }
0x1960   :  { %2966 = vmatprep.subr.bf16.mxu1 %v3528_v1 }
0x1963   :  { %2967 = vmatpush3.bf16.msra.mxu1 %v3931_v47 }
0x1964   :  { %2968 = vmatprep.subr.bf16.mxu1 %v3528_v1 }
0x1967   :  { %2969 = vmatpush3.bf16.msra.mxu1 %v3937_v49 }
0x1968   :  { %2986 = vmatprep.subr.bf16.mxu1 %v3528_v1 }
0x1a2d   :  { %v1238_v10 = vpop.f32.mrb[20].mxu1 }
0x1a2e   :  { %v1244_v22 = vadd.f32 %v1238_v10, %v1075_v59  ;;  %v2948_v23 = vpop.f32.mrb[21].mxu1 }
0x1a2f   :  { %v1241_v11 = vpop.f32.mrb[22].mxu1 }
0x1a30   :  { %3283 = vtanh.f32 %v1244_v22  ;;  %v2949_v24 = vpop.f32.mrb[23].mxu1  ;;  %v2667_v25 = vmul.f32 -1.442695, %v1244_v22 }
0x1a32   :  { %3285 = vpow2.f32 %v2667_v25 }
0x1a3a   :  { %v3284_v43 = vpop.eup %3283 }
0x1a3b   :  { %1254 = vrot.lane.b32.xlu0 %v3284_v43, %s3520_s14 }
0x1a3c   :  { %v3286_v41 = vpop.eup %3285 }
0x1a3d   :  { %v1248_v26 = vadd.f32 1.0, %v3286_v41 }
0x1a3f   :  { %3287 = vrcp.f32 %v1248_v26 }
0x1a49   :  { %v3288_v27 = vpop.eup %3287 }
0x1a4a   :  { %v1252_v29 = vmul.f32 %v3288_v27, %v1184_v6 }
0x1aad   :  { %v1255_v46 = vpop.permute.xlu0 %1254 }
0x1aae   :  { %v1257_v28 = vmul.f32 %v3288_v27, %v1255_v46 }
0x1ab0   :  { %1259 = vrot.lane.b32.xlu1 %v1257_v28, %s3531_s2 }
0x1b22   :  { %v1260_v36 = vpop.permute.xlu1 %1259 }
0x1b23   :  { %v1262_v39 = vadd.f32 %v1260_v36, %v1252_v29 }
0x1b25   :  { %3289 = vtanh.f32 %v1262_v39 }
0x1b2f   :  { %v3290_v45 = vpop.eup %3289 }
0x1b30   :  { %1265 = vrot.lane.b32.xlu0 %v3290_v45, %s3520_s14 }
0x1ba2   :  { %v1266_v30 = vpop.permute.xlu0 %1265 }
0x1ba3   :  { %v4039_v0 = vmul.f32 %v3288_v27, %v1266_v30  ;;  %v1776_v30 = vrot.slane %v4014_v20, 2 }
0x1ba5   :  { %1273 = vrot.lane.b32.xlu0 %v4039_v0, %s3520_s14  ;;  %1270 = vrot.lane.b32.xlu1 %v4039_v0, %s3531_s2 }
0x1c17   :  { %v1274_v34 = vpop.permute.xlu0 %1273  ;;  %v4045_v33 = vpop.permute.xlu1 %1270 }
0x1c18   :  { %v1276_v48 = vsel %vm341_vm8, %v4045_v33, %v1274_v34 }
0x1c19   :  { %v1277_v50 = vmul.f32 %v3764_v5, %v1276_v48 }
0x1c1b   :  { %v1278_v62 = vpack.c.bf16 %v1277_v50, %v1277_v50 }
0x1c1d   :  { %2959 = vmatmul.mubr.msk.bf16.vlgmr.msra.gmra.mrb[24].mxu0 %vm265_vm9, %v1278_v62 }
0x1c1e   :  { %2975 = vmatpush3.bf16.msra.mxu0 %v3923_v31  ;;  %2982 = vmatprep.mubr.msk.bf16.mxu0 %vm3530_vm0, %v3528_v1 }
0x1c1f   :  { %2976 = vmatprep.subr.bf16.mxu0 %v3528_v1 }
0x1c22   :  { %2977 = vmatpush3.bf16.msra.mxu0 %v3927_v44 }
0x1c23   :  { %2978 = vmatprep.subr.bf16.mxu0 %v3528_v1 }
0x1c26   :  { %2979 = vmatpush3.bf16.msra.mxu0 %v3931_v47 }
0x1c27   :  { %2980 = vmatprep.subr.bf16.mxu0 %v3528_v1 }
0x1c2a   :  { %2981 = vmatpush3.bf16.msra.mxu0 %v3937_v49 }
0x1c2b   :  { %2998 = vmatprep.subr.bf16.mxu0 %v3528_v1 }
0x1cf0   :  { %v1316_v51 = vpop.f32.mrb[24].mxu0 }
0x1cf1   :  { %v1322_v52 = vadd.f32 %v1316_v51, %v3992_v55  ;;  %v2960_v53 = vpop.f32.mrb[25].mxu0 }
0x1cf2   :  { %v1319_v54 = vpop.f32.mrb[26].mxu0 }
0x1cf3   :  { %3291 = vtanh.f32 %v1322_v52  ;;  %v2961_v56 = vpop.f32.mrb[27].mxu0  ;;  %v2669_v59 = vmul.f32 -1.442695, %v1322_v52 }
0x1cf5   :  { %3293 = vpow2.f32 %v2669_v59 }
0x1cfd   :  { %v3292_v40 = vpop.eup %3291 }
0x1cfe   :  { %1332 = vrot.lane.b32.xlu1 %v3292_v40, %s3520_s14 }
0x1cff   :  { %v3294_v3 = vpop.eup %3293 }
0x1d00   :  { %v1326_v8 = vadd.f32 1.0, %v3294_v3 }
0x1d02   :  { %3295 = vrcp.f32 %v1326_v8 }
0x1d0c   :  { %v3296_v12 = vpop.eup %3295 }
0x1d0d   :  { %v1330_v17 = vmul.f32 %v3296_v12, %v1262_v39 }
0x1d70   :  { %v1333_v13 = vpop.permute.xlu1 %1332 }
0x1d71   :  { %v1335_v4 = vmul.f32 %v3296_v12, %v1333_v13 }
0x1d73   :  { %1337 = vrot.lane.b32.xlu0 %v1335_v4, %s3531_s2 }
0x1de5   :  { %v1338_v32 = vpop.permute.xlu0 %1337 }
0x1de6   :  { %v1340_v55 = vadd.f32 %v1338_v32, %v1330_v17 }
0x1de8   :  { %3297 = vtanh.f32 %v1340_v55 }
0x1df2   :  { %v3298_v35 = vpop.eup %3297 }
0x1df3   :  { %1343 = vrot.lane.b32.xlu1 %v3298_v35, %s3520_s14 }
0x1e65   :  { %v1344_v63 = vpop.permute.xlu1 %1343 }
0x1e66   :  { %v4065_v18 = vmul.f32 %v3296_v12, %v1344_v63 }
0x1e68   :  { %1351 = vrot.lane.b32.xlu1 %v4065_v18, %s3520_s14  ;;  %1348 = vrot.lane.b32.xlu0 %v4065_v18, %s3531_s2 }
0x1eda   :  { %v1352_v6 = vpop.permute.xlu1 %1351  ;;  %v4071_v19 = vpop.permute.xlu0 %1348 }
0x1edb   :  { %v1354_v61 = vsel %vm341_vm8, %v4071_v19, %v1352_v6 }
0x1edc   :  { %v1355_v15 = vmul.f32 %v3764_v5, %v1354_v61 }
0x1ede   :  { %v1356_v21 = vpack.c.bf16 %v1355_v15, %v1355_v15 }
0x1ee0   :  { %2971 = vmatmul.mubr.msk.bf16.vlgmr.msra.gmra.mrb[24].mxu1 %vm265_vm9, %v1356_v21 }
0x1ee1   :  { %2987 = vmatpush3.bf16.msra.mxu1 %v3923_v31  ;;  %2994 = vmatprep.mubr.msk.bf16.mxu1 %vm3530_vm0, %v3528_v1 }
0x1ee2   :  { %2988 = vmatprep.subr.bf16.mxu1 %v3528_v1 }
0x1ee5   :  { %2989 = vmatpush3.bf16.msra.mxu1 %v3927_v44 }
0x1ee6   :  { %2990 = vmatprep.subr.bf16.mxu1 %v3528_v1 }
0x1ee9   :  { %2991 = vmatpush3.bf16.msra.mxu1 %v3931_v47 }
0x1eea   :  { %2992 = vmatprep.subr.bf16.mxu1 %v3528_v1 }
0x1eed   :  { %2993 = vmatpush3.bf16.msra.mxu1 %v3937_v49 }
0x1eee   :  { %3010 = vmatprep.subr.bf16.mxu1 %v3528_v1 }
0x1fb3   :  { %v1394_v37 = vpop.f32.mrb[24].mxu1 }
0x1fb4   :  { %v1400_v7 = vadd.f32 %v1394_v37, %v4009_v60  ;;  %v2972_v10 = vpop.f32.mrb[25].mxu1 }
0x1fb5   :  { %v1397_v22 = vpop.f32.mrb[26].mxu1 }
0x1fb6   :  { %3299 = vtanh.f32 %v1400_v7  ;;  %v2973_v23 = vpop.f32.mrb[27].mxu1  ;;  %v2671_v24 = vmul.f32 -1.442695, %v1400_v7 }
0x1fb8   :  { %3301 = vpow2.f32 %v2671_v24 }
0x1fc0   :  { %v3300_v11 = vpop.eup %3299 }
0x1fc1   :  { %1410 = vrot.lane.b32.xlu0 %v3300_v11, %s3520_s14 }
0x1fc2   :  { %v3302_v43 = vpop.eup %3301 }
0x1fc3   :  { %v1404_v25 = vadd.f32 1.0, %v3302_v43 }
0x1fc5   :  { %3303 = vrcp.f32 %v1404_v25 }
0x1fcf   :  { %v3304_v41 = vpop.eup %3303 }
0x1fd0   :  { %v1408_v46 = vmul.f32 %v3304_v41, %v1340_v55 }
0x2033   :  { %v1411_v26 = vpop.permute.xlu0 %1410 }
0x2034   :  { %v1413_v27 = vmul.f32 %v3304_v41, %v1411_v26 }
0x2036   :  { %1415 = vrot.lane.b32.xlu1 %v1413_v27, %s3531_s2 }
0x20a8   :  { %v1416_v28 = vpop.permute.xlu1 %1415 }
0x20a9   :  { %v1418_v60 = vadd.f32 %v1416_v28, %v1408_v46 }
0x20ab   :  { %3305 = vtanh.f32 %v1418_v60 }
0x20b5   :  { %v3306_v29 = vpop.eup %3305 }
0x20b6   :  { %1421 = vrot.lane.b32.xlu0 %v3306_v29, %s3520_s14 }
0x2128   :  { %v1422_v36 = vpop.permute.xlu0 %1421 }
0x2129   :  { %v1424_v39 = vmul.f32 %v3304_v41, %v1422_v36  ;;  %v1768_v36 = vrot.slane %v4039_v0, 2 }
0x212b   :  { %1429 = vrot.lane.b32.xlu0 %v1424_v39, %s3520_s14  ;;  %1426 = vrot.lane.b32.xlu1 %v1424_v39, %s3531_s2  ;;  %v1758_v45 = vrot.slane %v1424_v39, 2 }
0x212d   :  { %v4094_v34 = vpack.i.bf16 %v1776_v30, %v1758_v45 }
0x219d   :  { %v1430_v48 = vpop.permute.xlu0 %1429  ;;  %v4096_v50 = vpop.permute.xlu1 %1426 }
0x219e   :  { %v1432_v62 = vsel %vm341_vm8, %v4096_v50, %v1430_v48 }
0x219f   :  { %v1433_v51 = vmul.f32 %v3764_v5, %v1432_v62 }
0x21a1   :  { %v1434_v52 = vpack.c.bf16 %v1433_v51, %v1433_v51 }
0x21a3   :  { %2983 = vmatmul.mubr.msk.bf16.vlgmr.msra.gmra.mrb[28].mxu0 %vm265_vm9, %v1434_v52 }
0x21a4   :  { %2999 = vmatpush3.bf16.msra.mxu0 %v3923_v31  ;;  %3006 = vmatprep.mubr.msk.bf16.mxu0 %vm3530_vm0, %v3528_v1 }
0x21a5   :  { %3000 = vmatprep.subr.bf16.mxu0 %v3528_v1 }
0x21a8   :  { %3001 = vmatpush3.bf16.msra.mxu0 %v3927_v44 }
0x21a9   :  { %3002 = vmatprep.subr.bf16.mxu0 %v3528_v1 }
0x21ac   :  { %3003 = vmatpush3.bf16.msra.mxu0 %v3931_v47 }
0x21ad   :  { %3004 = vmatprep.subr.bf16.mxu0 %v3528_v1 }
0x21b0   :  { %3005 = vmatpush3.bf16.msra.mxu0 %v3937_v49 }
0x2276   :  { %v1472_v20 = vpop.f32.mrb[28].mxu0 }
0x2277   :  { %v1478_v53 = vadd.f32 %v1472_v20, %v3995_v57  ;;  %v2984_v54 = vpop.f32.mrb[29].mxu0 }
0x2278   :  { %v1475_v56 = vpop.f32.mrb[30].mxu0 }
0x2279   :  { %3307 = vtanh.f32 %v1478_v53  ;;  %v2985_v40 = vpop.f32.mrb[31].mxu0  ;;  %v2673_v3 = vmul.f32 -1.442695, %v1478_v53 }
0x227b   :  { %3309 = vpow2.f32 %v2673_v3 }
0x2283   :  { %v3308_v59 = vpop.eup %3307 }
0x2284   :  { %1488 = vrot.lane.b32.xlu1 %v3308_v59, %s3520_s14 }
0x2285   :  { %v3310_v8 = vpop.eup %3309 }
0x2286   :  { %v1482_v12 = vadd.f32 1.0, %v3310_v8 }
0x2288   :  { %3311 = vrcp.f32 %v1482_v12 }
0x2292   :  { %v3312_v13 = vpop.eup %3311 }
0x2293   :  { %v1486_v32 = vmul.f32 %v3312_v13, %v1418_v60 }
0x22f6   :  { %v1489_v4 = vpop.permute.xlu1 %1488 }
0x22f7   :  { %v1491_v17 = vmul.f32 %v3312_v13, %v1489_v4 }
0x22f9   :  { %1493 = vrot.lane.b32.xlu0 %v1491_v17, %s3531_s2 }
0x236b   :  { %v1494_v55 = vpop.permute.xlu0 %1493 }
0x236c   :  { %v1496_v57 = vadd.f32 %v1494_v55, %v1486_v32 }
0x236e   :  { %3313 = vtanh.f32 %v1496_v57 }
0x2378   :  { %v3314_v35 = vpop.eup %3313 }
0x2379   :  { %1499 = vrot.lane.b32.xlu1 %v3314_v35, %s3520_s14 }
0x23eb   :  { %v1500_v63 = vpop.permute.xlu1 %1499 }
0x23ec   :  { %v4115_v6 = vmul.f32 %v3312_v13, %v1500_v63  ;;  %v1763_v63 = vrot.slane %v4065_v18, 2 }
0x23ee   :  { %1507 = vrot.lane.b32.xlu1 %v4115_v6, %s3520_s14  ;;  %1504 = vrot.lane.b32.xlu0 %v4115_v6, %s3531_s2 }
0x2460   :  { %v1508_v61 = vpop.permute.xlu1 %1507  ;;  %v4121_v15 = vpop.permute.xlu0 %1504 }
0x2461   :  { %v1510_v21 = vsel %vm341_vm8, %v4121_v15, %v1508_v61 }
0x2462   :  { %v1511_v37 = vmul.f32 %v3764_v5, %v1510_v21 }
0x2464   :  { %v1512_v7 = vpack.c.bf16 %v1511_v37, %v1511_v37 }
0x2466   :  { %2995 = vmatmul.mubr.msk.bf16.vlgmr.msra.gmra.mrb[28].mxu1 %vm265_vm9, %v1512_v7 }
0x2467   :  { %3011 = vmatpush3.bf16.msra.mxu1 %v3923_v31  ;;  %3018 = vmatprep.mubr.msk.bf16.mxu1 %vm3530_vm0, %v3528_v1 }
0x2468   :  { %3012 = vmatprep.subr.bf16.mxu1 %v3528_v1 }
0x246b   :  { %3013 = vmatpush3.bf16.msra.mxu1 %v3927_v44 }
0x246c   :  { %3014 = vmatprep.subr.bf16.mxu1 %v3528_v1 }
0x246f   :  { %3015 = vmatpush3.bf16.msra.mxu1 %v3931_v47 }
0x2470   :  { %3016 = vmatprep.subr.bf16.mxu1 %v3528_v1 }
0x2473   :  { %3017 = vmatpush3.bf16.msra.mxu1 %v3937_v49 }
0x2474   :  { %3022 = vmatprep.subr.bf16.mxu1 %v3528_v1 }
0x2539   :  { %v1550_v10 = vpop.f32.mrb[28].mxu1 }
0x253a   :  { %v1556_v31 = vadd.f32 %v1550_v10, %v3998_v42  ;;  %v2996_v22 = vpop.f32.mrb[29].mxu1 }
0x253b   :  { %v1553_v23 = vpop.f32.mrb[30].mxu1 }
0x253c   :  { %3315 = vtanh.f32 %v1556_v31  ;;  %v2997_v11 = vpop.f32.mrb[31].mxu1  ;;  %v2675_v44 = vmul.f32 -1.442695, %v1556_v31 }
0x253e   :  { %3317 = vpow2.f32 %v2675_v44 }
0x2546   :  { %v3316_v24 = vpop.eup %3315 }
0x2547   :  { %1566 = vrot.lane.b32.xlu0 %v3316_v24, %s3520_s14 }
0x2548   :  { %v3318_v43 = vpop.eup %3317 }
0x2549   :  { %v1560_v47 = vadd.f32 1.0, %v3318_v43 }
0x254b   :  { %3319 = vrcp.f32 %v1560_v47 }
0x2555   :  { %v3320_v25 = vpop.eup %3319 }
0x2556   :  { %v1564_v26 = vmul.f32 %v3320_v25, %v1496_v57 }
0x25b9   :  { %v1567_v41 = vpop.permute.xlu0 %1566 }
0x25ba   :  { %v1569_v49 = vmul.f32 %v3320_v25, %v1567_v41 }
0x25bc   :  { %1571 = vrot.lane.b32.xlu1 %v1569_v49, %s3531_s2 }
0x262e   :  { %v1572_v27 = vpop.permute.xlu1 %1571 }
0x262f   :  { %v1574_v42 = vadd.f32 %v1572_v27, %v1564_v26 }
0x2631   :  { %3321 = vtanh.f32 %v1574_v42 }
0x263b   :  { %v3322_v46 = vpop.eup %3321 }
0x263c   :  { %1577 = vrot.lane.b32.xlu0 %v3322_v46, %s3520_s14  ;;  %v3195_v46 = vld [vmem:[%s4418_s7] ss:$8 sps:$4 sm:$0xff]  }
0x26ae   :  { %v1578_v28 = vpop.permute.xlu0 %1577 }
0x26af   :  { %v1580_v60 = vmul.f32 %v3320_v25, %v1578_v28  ;;  %v3197_v28 = vld [vmem:[%s4418_s7 + $0x4] ss:$8 sps:$4 sm:$0xff]  }
0x26b0   :  { %1877 = vmatprep.subr.bf16.mxu0 %v3197_v28 }
0x26b1   :  { %1585 = vrot.lane.b32.xlu0 %v1580_v60, %s3520_s14  ;;  %1582 = vrot.lane.b32.xlu1 %v1580_v60, %s3531_s2  ;;  %v1748_v29 = vrot.slane %v1580_v60, 2 }
0x26b3   :  { %v4144_v39 = vpack.i.bf16 %v1768_v36, %v1748_v29  ;;  %v3200_v29 = vld [vmem:[%s4418_s7 + $0x14] ss:$8 sps:$4 sm:$0xff]   ;;  %v3198_v36 = vld [vmem:[%s4418_s7 + $0x10] ss:$8 sps:$4 sm:$0xff]  }
0x2723   :  { %v1586_v45 = vpop.permute.xlu0 %1585  ;;  %v4146_v30 = vpop.permute.xlu1 %1582 }
0x2724   :  { %v1588_v48 = vsel %vm341_vm8, %v4146_v30, %v1586_v45  ;;  %v4189_v45 = vld [vmem:[#allocation10] sm:$0xff]  }
0x2725   :  { %v1589_v62 = vmul.f32 %v3764_v5, %v1588_v48  ;;  %v3204_v48 = vld [vmem:[%s4418_s7 + $0x24] ss:$8 sps:$4 sm:$0xff]  }
0x2727   :  { %v1590_v51 = vpack.c.bf16 %v1589_v62, %v1589_v62  ;;  %v3202_v62 = vld [vmem:[%s4418_s7 + $0x20] ss:$8 sps:$4 sm:$0xff]  }
0x2729   :  { %3007 = vmatmul.mubr.msk.bf16.vlgmr.msra.gmra.mrb[32].mxu0 %vm265_vm9, %v1590_v51 }
0x272a   :  { %1909 = vmatprep.mubr.bf16.mxu0 %v3529_v2  ;;  %1878 = vmatpush1.bf16.msra.mxu0 %v3195_v46 }
0x272b   :  { %1879 = vmatprep.subr.bf16.mxu0 %v3200_v29 }
0x272e   :  { %1880 = vmatpush1.bf16.msra.mxu0 %v3198_v36 }
0x272f   :  { %1881 = vmatprep.subr.bf16.mxu0 %v3204_v48 }
0x2732   :  { %1882 = vmatpush1.bf16.msra.mxu0 %v3202_v62 }
0x27fc   :  { %v1628_v52 = vpop.f32.mrb[32].mxu0 }
0x27fd   :  { %v1634_v20 = vadd.f32 %v1628_v52, %v4001_v58  ;;  %v3008_v53 = vpop.f32.mrb[33].mxu0  ;;  %v3206_v52 = vld [vmem:[%s4418_s7 + $0x30] ss:$8 sps:$4 sm:$0xff]  }
0x27fe   :  { %v1631_v0 = vpop.f32.mrb[34].mxu0  ;;  %v4209_v53 = vld [vmem:[#allocation10 + $0x10] sm:$0xff]  }
0x27ff   :  { %3323 = vtanh.f32 %v1634_v20  ;;  %v3009_v54 = vpop.f32.mrb[35].mxu0  ;;  %v2677_v40 = vmul.f32 -1.442695, %v1634_v20 }
0x2800   :  { %v1753_v54 = vrot.slane %v4115_v6, 2 }
0x2801   :  { %3325 = vpow2.f32 %v2677_v40 }
0x2809   :  { %v3324_v56 = vpop.eup %3323 }
0x280a   :  { %1644 = vrot.lane.b32.xlu1 %v3324_v56, %s3520_s14  ;;  %v4215_v56 = vld [vmem:[#allocation10 + $0x18] sm:$0xff]  }
0x280b   :  { %v3326_v59 = vpop.eup %3325 }
0x280c   :  { %v1638_v3 = vadd.f32 1.0, %v3326_v59 }
0x280e   :  { %3327 = vrcp.f32 %v1638_v3 }
0x2818   :  { %v3328_v8 = vpop.eup %3327 }
0x2819   :  { %v1642_v4 = vmul.f32 %v3328_v8, %v1574_v42 }
0x287c   :  { %v1645_v12 = vpop.permute.xlu1 %1644 }
0x287d   :  { %v1647_v13 = vmul.f32 %v3328_v8, %v1645_v12 }
0x287f   :  { %1649 = vrot.lane.b32.xlu0 %v1647_v13, %s3531_s2 }
0x28f1   :  { %v1650_v17 = vpop.permute.xlu0 %1649 }
0x28f2   :  { %v1652_v58 = vadd.f32 %v1650_v17, %v1642_v4 }
0x28f4   :  { %3329 = vtanh.f32 %v1652_v58 }
0x28fe   :  { %v3330_v32 = vpop.eup %3329 }
0x28ff   :  { %1655 = vrot.lane.b32.xlu1 %v3330_v32, %s3520_s14 }
0x2971   :  { %v1656_v55 = vpop.permute.xlu1 %1655 }
0x2972   :  { %v1658_v57 = vmul.f32 %v3328_v8, %v1656_v55 }
0x2974   :  { %1663 = vrot.lane.b32.xlu1 %v1658_v57, %s3520_s14  ;;  %1660 = vrot.lane.b32.xlu0 %v1658_v57, %s3531_s2  ;;  %v1743_v35 = vrot.slane %v1658_v57, 2 }
0x2976   :  { %v3152_v61 = vpack.i.bf16 %v1763_v63, %v1743_v35 }
0x29e6   :  { %v1664_v21 = vpop.permute.xlu1 %1663  ;;  %v4160_v37 = vpop.permute.xlu0 %1660 }
0x29e7   :  { %v1666_v7 = vsel %vm341_vm8, %v4160_v37, %v1664_v21 }
0x29e8   :  { %v1667_v10 = vmul.f32 %v3764_v5, %v1666_v7 }
0x29ea   :  { %v1668_v31 = vpack.c.bf16 %v1667_v10, %v1667_v10 }
0x29ec   :  { %3019 = vmatmul.mubr.msk.bf16.vlgmr.msra.gmra.mrb[32].mxu1 %vm265_vm9, %v1668_v31 }
0x29ed   :  { %3030 = vmatprep.mubr.msk.bf16.mxu1 %vm3530_vm0, %v3528_v1  ;;  %3023 = vmatpush3.bf16.msra.mxu1 %v4189_v45 }
0x29ee   :  { %3024 = vmatprep.subr.bf16.mxu1 %v3528_v1 }
0x2abf   :  { %v1706_v22 = vpop.f32.mrb[32].mxu1 }
0x2ac0   :  { %v1712_v23 = vadd.f32 %v1706_v22, %v4004_v38  ;;  %v3020_v11 = vpop.f32.mrb[33].mxu1 }
0x2ac1   :  { %v1709_v18 = vpop.f32.mrb[34].mxu1 }
0x2ac2   :  { %3331 = vtanh.f32 %v1712_v23  ;;  %v3021_v24 = vpop.f32.mrb[35].mxu1  ;;  %v2679_v43 = vmul.f32 -1.442695, %v1712_v23 }
0x2ac4   :  { %3333 = vpow2.f32 %v2679_v43 }
0x2acc   :  { %v3332_v44 = vpop.eup %3331 }
0x2acd   :  { %1722 = vrot.lane.b32.xlu0 %v3332_v44, %s3520_s14 }
0x2ace   :  { %v3334_v47 = vpop.eup %3333 }
0x2acf   :  { %v1716_v25 = vadd.f32 1.0, %v3334_v47 }
0x2ad1   :  { %3335 = vrcp.f32 %v1716_v25 }
0x2adb   :  { %v3336_v41 = vpop.eup %3335 }
0x2adc   :  { %v1720_v38 = vmul.f32 %v3336_v41, %v1652_v58 }
0x2b3f   :  { %v1723_v49 = vpop.permute.xlu0 %1722 }
0x2b40   :  { %v1725_v26 = vmul.f32 %v3336_v41, %v1723_v49 }
0x2b42   :  { %1727 = vrot.lane.b32.xlu1 %v1725_v26, %s3531_s2  ;;  %v1822_v26 = vld [vmem:[%s4419_s8] sm:$0x3] }
0x2b46   :  { %3153 = vrot.lane.b32.xlu1 %v3152_v61, %s3520_s14 }
0x2bb4   :  { %v1728_v27 = vpop.permute.xlu1 %1727 }
0x2bb5   :  { %v1730_v42 = vadd.f32 %v1728_v27, %v1720_v38  ;;  %v1827_v38 = vrot.slane %v1822_v26, %v3722_v14  ;;  %v1831_v27 = vrot.slane %v1822_v26, %v3728_v16 }
0x2bb7   :  { %3337 = vtanh.f32 %v1730_v42 }
0x2bb8   :  { %v3154_v6 = vpop.permute.xlu1 %3153 }
0x2bb9   :  { %v3156_v3 = vunpack.i.h.bf16 %v3154_v6  ;;  %v3155_v8 = vunpack.i.l.bf16 %v3154_v6 }
0x2bbb   :  { %v1767_v17 = vsel %vm341_vm8, %v4146_v30, %v3156_v3  ;;  %v1747_v58 = vsel %vm341_vm8, %v4045_v33, %v3155_v8 }
0x2bbc   :  { %v1791_v61 = vrot.slane %v1767_v17, 6  ;;  %v1782_v21 = vrot.slane %v1747_v58, 6 }
0x2bc1   :  { %v3338_v60 = vpop.eup %3337 }
0x2bc2   :  { %1733 = vrot.lane.b32.xlu0 %v3338_v60, %s3520_s14 }
0x2bc6   :  { %3158 = vrot.lane.b32.xlu0 %v4144_v39, %s3520_s14  ;;  %v4199_v39 = vld [vmem:[#allocation10 + $0x8] sm:$0xff]  }
0x2bc7   :  { %3025 = vmatpush3.bf16.msra.mxu1 %v4199_v39 }
0x2bc8   :  { %3026 = vmatprep.subr.bf16.mxu1 %v3528_v1 }
0x2bca   :  { %3163 = vrot.lane.b32.xlu0 %v4094_v34, %s3520_s14  ;;  %v3208_v34 = vld [vmem:[%s4418_s7 + $0x34] ss:$8 sps:$4 sm:$0xff]  }
0x2bcb   :  { %1883 = vmatprep.subr.bf16.mxu0 %v3208_v34  ;;  %3027 = vmatpush3.bf16.msra.mxu1 %v4209_v53 }
0x2bcc   :  { %1884 = vmatpush1.bf16.msra.mxu0 %v3206_v52  ;;  %3028 = vmatprep.subr.bf16.mxu1 %v3528_v1 }
0x2bcd   :  { %3034 = vmatprep.subr.bf16.mxu0 %v3528_v1 }
0x2bcf   :  { %3029 = vmatpush3.bf16.msra.mxu1 %v4215_v56 }
0x2bd0   :  { %3046 = vmatprep.subr.bf16.mxu1 %v3528_v1 }
0x2bd2   :  { %3031 = vmatmul.mubr.bf16.vlgmr.msra.gmra.mrb[36].mxu1 %v3529_v2 }
0x2bd3   :  { %3047 = vmatpush3.bf16.msra.mxu1 %v4189_v45  ;;  %3054 = vmatprep.mubr.msk.bf16.mxu1 %vm3530_vm0, %v3528_v1 }
0x2bd4   :  { %3048 = vmatprep.subr.bf16.mxu1 %v3528_v1 }
0x2bd7   :  { %3049 = vmatpush3.bf16.msra.mxu1 %v4199_v39 }
0x2bd8   :  { %3050 = vmatprep.subr.bf16.mxu1 %v3528_v1 }
0x2bdb   :  { %3051 = vmatpush3.bf16.msra.mxu1 %v4209_v53 }
0x2bdc   :  { %3052 = vmatprep.subr.bf16.mxu1 %v3528_v1 }
0x2bdf   :  { %3053 = vmatpush3.bf16.msra.mxu1 %v4215_v56 }
0x2be0   :  { %3070 = vmatprep.subr.bf16.mxu1 %v3528_v1 }
0x2c34   :  { %v1734_v51 = vpop.permute.xlu0 %1733 }
0x2c35   :  { %v1736_v20 = vmul.f32 %v3336_v41, %v1734_v51 }
0x2c37   :  { %v1738_v0 = vrot.slane %v1736_v20, 2 }
0x2c38   :  { %v3159_v2 = vpop.permute.xlu0 %3158 }
0x2c39   :  { %v3167_v40 = vpack.i.bf16 %v1753_v54, %v1738_v0  ;;  %v3160_v12 = vunpack.i.l.bf16 %v3159_v2  ;;  %v3161_v4 = vunpack.i.h.bf16 %v3159_v2 }
0x2c3b   :  { %3168 = vrot.lane.b32.xlu1 %v3167_v40, %s3520_s14  ;;  %v1752_v32 = vsel %vm341_vm8, %v4071_v19, %v3160_v12  ;;  %v1772_v7 = vsel %vm341_vm8, %v4160_v37, %v3161_v4 }
0x2c3c   :  { %v3164_v59 = vpop.permute.xlu0 %3163  ;;  %v1785_v10 = vrot.slane %v1752_v32, 4  ;;  %v1794_v11 = vrot.slane %v1772_v7, 4 }
0x2c3d   :  { %v3165_v13 = vunpack.i.l.bf16 %v3164_v59  ;;  %v3166_v31 = vunpack.i.h.bf16 %v3164_v59 }
0x2c3f   :  { %1773 = vrot.lane.b32.xlu1 %v1736_v20, %s3531_s2  ;;  %v1762_v57 = vsel %vm341_vm8, %v4121_v15, %v3165_v13 }
0x2c40   :  { %v1802_v19 = vsel %vm207_vm2, %v1762_v57, %v1791_v61 }
0x2c41   :  { %v1803_v44 = vsel %vm944_vm10, %v1802_v19, %v1794_v11 }
0x2cad   :  { %v3169_v55 = vpop.permute.xlu1 %3168 }
0x2cae   :  { %v3171_v35 = vunpack.i.h.bf16 %v3169_v55  ;;  %v3170_v63 = vunpack.i.l.bf16 %v3169_v55 }
0x2cb0   :  { %v1757_v30 = vsel %vm341_vm8, %v4096_v50, %v3171_v35  ;;  %v1742_v33 = vsel %vm341_vm8, %v4020_v9, %v3170_v63  ;;  %v2014_v9 = vpop.f32.mrb[36].mxu1 }
0x2cb1   :  { %v1788_v22 = vrot.slane %v1757_v30, 2  ;;  %v1799_v15 = vsel %vm207_vm2, %v1742_v33, %v1782_v21  ;;  %v1774_v23 = vpop.permute.xlu1 %1773  ;;  %v3032_v25 = vpop.f32.mrb[37].mxu1 }
0x2cb2   :  { %v1780_v18 = vsel %vm341_vm8, %v1774_v23, %v3166_v31  ;;  %v1800_v24 = vsel %vm944_vm10, %v1799_v15, %v1785_v10  ;;  %v2017_v41 = vpop.f32.mrb[38].mxu1 }
0x2cb3   :  { %v1797_v37 = vrot.slane %v1780_v18, 2  ;;  %v1801_v43 = vsel %vm946_vm11, %v1800_v24, %v1788_v22  ;;  %v3033_v49 = vpop.f32.mrb[39].mxu1 }
0x2cb5   :  { %v1804_v50 = vsel %vm946_vm11, %v1803_v44, %v1797_v37 }
0x2cb6   :  { %v1805_v47 = vpack.c.bf16 %v1804_v50, %v1801_v43 }
0x2cb8   :  { %2688 = vmatmul.mubr.msk.bf16.vlgmr.msra.gmra.mrb[36].mxu0 %vm265_vm9, %v1805_v47 }
0x2cb9   :  { %3035 = vmatpush3.bf16.msra.mxu0 %v4189_v45  ;;  %3042 = vmatprep.mubr.msk.bf16.mxu0 %vm3530_vm0, %v3528_v1 }
0x2cba   :  { %3036 = vmatprep.subr.bf16.mxu0 %v3528_v1 }
0x2cbd   :  { %3037 = vmatpush3.bf16.msra.mxu0 %v4199_v39 }
0x2cbe   :  { %3038 = vmatprep.subr.bf16.mxu0 %v3528_v1 }
0x2cc1   :  { %3039 = vmatpush3.bf16.msra.mxu0 %v4209_v53 }
0x2cc2   :  { %3040 = vmatprep.subr.bf16.mxu0 %v3528_v1 }
0x2cc5   :  { %3041 = vmatpush3.bf16.msra.mxu0 %v4215_v56 }
0x2cc6   :  { %3058 = vmatprep.subr.bf16.mxu0 %v3528_v1 }
0x2d8b   :  { %v1911_v42 = vpop.f32.mrb[36].mxu0 }
0x2d8c   :  { %v1912_v46 = vadd.f32 %v1911_v42, %v1827_v38  ;;  %v1913_v28 = vpop.f32.mrb[37].mxu0 }
0x2d8d   :  { %v1914_v60 = vadd.f32 %v1913_v28, %v1831_v27  ;;  %v1915_v29 = vpop.f32.mrb[38].mxu0 }
0x2d8e   :  { %v1916_v36 = vadd.f32 %v1915_v29, %v1827_v38  ;;  %v1917_v48 = vpop.f32.mrb[39].mxu0  ;;  %v1925_v62 = vrot.slane %v1912_v46, 2  ;;  %v1930_v34 = vrot.slane %v1912_v46, 4  ;;  %v1933_v54 = vrot.slane %v1912_v46, 6 }
0x2d8f   :  { %v1918_v51 = vadd.f32 %v1917_v48, %v1831_v27  ;;  %v1939_v52 = vrot.slane %v1914_v60, 4  ;;  %v1945_v20 = vrot.slane %v1914_v60, 2  ;;  %v1953_v0 = vrot.slane %v1914_v60, 6 }
0x2d90   :  { %v1943_v40 = vrot.slane %v1916_v36, 2  ;;  %v1948_v2 = vrot.slane %v1916_v36, 4  ;;  %v1951_v6 = vrot.slane %v1916_v36, 6 }
0x2d91   :  { %v1921_v14 = vrot.slane %v1918_v51, 4  ;;  %v1927_v59 = vrot.slane %v1918_v51, 2  ;;  %v4270_v16 = vsel %vm207_vm2, %v1930_v34, %v1918_v51  ;;  %v1935_v3 = vrot.slane %v1918_v51, 6 }
0x2d92   :  { %v4273_v8 = vsel %vm207_vm2, %v1916_v36, %v1939_v52  ;;  %v4276_v12 = vsel %vm207_vm2, %v1943_v40, %v1945_v20  ;;  %v4279_v13 = vsel %vm207_vm2, %v1948_v2, %v1914_v60  ;;  %v4282_v4 = vsel %vm207_vm2, %v1951_v6, %v1953_v0 }
0x2d93   :  { %v1923_v17 = vsel %vm207_vm2, %v1912_v46, %v1921_v14  ;;  %v1929_v58 = vsel %vm207_vm2, %v1925_v62, %v1927_v59  ;;  %v4287_v32 = vsel %vm207_vm2, %v1933_v54, %v1935_v3 }
0x2d94   :  { %v2020_v55 = vadd.f32 %v2014_v9, %v1923_v17 }
0x2d96   :  { %3339 = vtanh.f32 %v2020_v55  ;;  %v2693_v35 = vmul.f32 -1.442695, %v2020_v55 }
0x2d98   :  { %3341 = vpow2.f32 %v2693_v35 }
0x2da0   :  { %v3340_v57 = vpop.eup %3339 }
0x2da1   :  { %2030 = vrot.lane.b32.xlu0 %v3340_v57, %s3520_s14 }
0x2da2   :  { %v3342_v63 = vpop.eup %3341 }
0x2da3   :  { %v2024_v61 = vadd.f32 1.0, %v3342_v63 }
0x2da5   :  { %3343 = vrcp.f32 %v2024_v61 }
0x2daf   :  { %v3344_v21 = vpop.eup %3343 }
0x2db0   :  { %v2028_v31 = vmul.f32 0.0, %v3344_v21 }
0x2e13   :  { %v2031_v7 = vpop.permute.xlu0 %2030 }
0x2e14   :  { %v2033_v10 = vmul.f32 %v3344_v21, %v2031_v7 }
0x2e16   :  { %2035 = vrot.lane.b32.xlu1 %v2033_v10, %s3531_s2 }
0x2e88   :  { %v2036_v30 = vpop.permute.xlu1 %2035 }
0x2e89   :  { %v2038_v33 = vadd.f32 %v2036_v30, %v2028_v31 }
0x2e8b   :  { %3345 = vtanh.f32 %v2038_v33 }
0x2e95   :  { %v3346_v19 = vpop.eup %3345 }
0x2e96   :  { %2041 = vrot.lane.b32.xlu0 %v3346_v19, %s3520_s14 }
0x2f08   :  { %v2042_v22 = vpop.permute.xlu0 %2041 }
0x2f09   :  { %v2044_v15 = vmul.f32 %v3344_v21, %v2042_v22 }
0x2f0b   :  { %2049 = vrot.lane.b32.xlu0 %v2044_v15, %s3520_s14  ;;  %2046 = vrot.lane.b32.xlu1 %v2044_v15, %s3531_s2 }
0x2f7d   :  { %v2050_v23 = vpop.permute.xlu0 %2049  ;;  %v2047_v11 = vpop.permute.xlu1 %2046 }
0x2f7e   :  { %v2052_v18 = vsel %vm341_vm8, %v2047_v11, %v2050_v23 }
0x2f7f   :  { %v2053_v24 = vmul.f32 %v3764_v5, %v2052_v18 }
0x2f81   :  { %v2054_v37 = vpack.c.bf16 %v2053_v24, %v2053_v24 }
0x2f83   :  { %3043 = vmatmul.mubr.msk.bf16.vlgmr.msra.gmra.mrb[40].mxu0 %vm265_vm9, %v2054_v37 }
0x2f84   :  { %3059 = vmatpush3.bf16.msra.mxu0 %v4189_v45  ;;  %3066 = vmatprep.mubr.msk.bf16.mxu0 %vm3530_vm0, %v3528_v1 }
0x2f85   :  { %3060 = vmatprep.subr.bf16.mxu0 %v3528_v1 }
0x2f88   :  { %3061 = vmatpush3.bf16.msra.mxu0 %v4199_v39 }
0x2f89   :  { %3062 = vmatprep.subr.bf16.mxu0 %v3528_v1 }
0x2f8c   :  { %3063 = vmatpush3.bf16.msra.mxu0 %v4209_v53 }
0x2f8d   :  { %3064 = vmatprep.subr.bf16.mxu0 %v3528_v1 }
0x2f90   :  { %3065 = vmatpush3.bf16.msra.mxu0 %v4215_v56 }
0x2f91   :  { %3082 = vmatprep.subr.bf16.mxu0 %v3528_v1 }
0x3056   :  { %v2092_v44 = vpop.f32.mrb[40].mxu0 }
0x3057   :  { %v2098_v43 = vadd.f32 %v2092_v44, %v1929_v58  ;;  %v3044_v50 = vpop.f32.mrb[41].mxu0 }
0x3058   :  { %v2095_v47 = vpop.f32.mrb[42].mxu0 }
0x3059   :  { %3347 = vtanh.f32 %v2098_v43  ;;  %v3045_v9 = vpop.f32.mrb[43].mxu0  ;;  %v2695_v41 = vmul.f32 -1.442695, %v2098_v43 }
0x305b   :  { %3349 = vpow2.f32 %v2695_v41 }
0x3063   :  { %v3348_v25 = vpop.eup %3347 }
0x3064   :  { %2108 = vrot.lane.b32.xlu1 %v3348_v25, %s3520_s14 }
0x3065   :  { %v3350_v49 = vpop.eup %3349 }
0x3066   :  { %v2102_v26 = vadd.f32 1.0, %v3350_v49 }
0x3068   :  { %3351 = vrcp.f32 %v2102_v26 }
0x3072   :  { %v3352_v38 = vpop.eup %3351 }
0x3073   :  { %v2106_v46 = vmul.f32 %v3352_v38, %v2038_v33 }
0x30d6   :  { %v2109_v27 = vpop.permute.xlu1 %2108 }
0x30d7   :  { %v2111_v42 = vmul.f32 %v3352_v38, %v2109_v27 }
0x30d9   :  { %2113 = vrot.lane.b32.xlu0 %v2111_v42, %s3531_s2 }
0x314b   :  { %v2114_v28 = vpop.permute.xlu0 %2113 }
0x314c   :  { %v2116_v60 = vadd.f32 %v2114_v28, %v2106_v46 }
0x314e   :  { %3353 = vtanh.f32 %v2116_v60 }
0x3158   :  { %v3354_v29 = vpop.eup %3353 }
0x3159   :  { %2119 = vrot.lane.b32.xlu1 %v3354_v29, %s3520_s14 }
0x31cb   :  { %v2120_v36 = vpop.permute.xlu1 %2119 }
0x31cc   :  { %v2122_v48 = vmul.f32 %v3352_v38, %v2120_v36 }
0x31ce   :  { %2127 = vrot.lane.b32.xlu1 %v2122_v48, %s3520_s14  ;;  %2124 = vrot.lane.b32.xlu0 %v2122_v48, %s3531_s2 }
0x3240   :  { %v2128_v62 = vpop.permute.xlu1 %2127  ;;  %v2125_v34 = vpop.permute.xlu0 %2124 }
0x3241   :  { %v2130_v51 = vsel %vm341_vm8, %v2125_v34, %v2128_v62 }
0x3242   :  { %v2131_v52 = vmul.f32 %v3764_v5, %v2130_v51 }
0x3244   :  { %v2132_v20 = vpack.c.bf16 %v2131_v52, %v2131_v52 }
0x3246   :  { %3055 = vmatmul.mubr.msk.bf16.vlgmr.msra.gmra.mrb[40].mxu1 %vm265_vm9, %v2132_v20 }
0x3247   :  { %3071 = vmatpush3.bf16.msra.mxu1 %v4189_v45  ;;  %3078 = vmatprep.mubr.msk.bf16.mxu1 %vm3530_vm0, %v3528_v1 }
0x3248   :  { %3072 = vmatprep.subr.bf16.mxu1 %v3528_v1 }
0x324b   :  { %3073 = vmatpush3.bf16.msra.mxu1 %v4199_v39 }
0x324c   :  { %3074 = vmatprep.subr.bf16.mxu1 %v3528_v1 }
0x324f   :  { %3075 = vmatpush3.bf16.msra.mxu1 %v4209_v53 }
0x3250   :  { %3076 = vmatprep.subr.bf16.mxu1 %v3528_v1 }
0x3253   :  { %3077 = vmatpush3.bf16.msra.mxu1 %v4215_v56 }
0x3254   :  { %3094 = vmatprep.subr.bf16.mxu1 %v3528_v1 }
0x3319   :  { %v2170_v0 = vpop.f32.mrb[40].mxu1 }
0x331a   :  { %v2176_v54 = vadd.f32 %v2170_v0, %v4270_v16  ;;  %v3056_v40 = vpop.f32.mrb[41].mxu1 }
0x331b   :  { %v2173_v2 = vpop.f32.mrb[42].mxu1 }
0x331c   :  { %3355 = vtanh.f32 %v2176_v54  ;;  %v3057_v6 = vpop.f32.mrb[43].mxu1  ;;  %v2697_v59 = vmul.f32 -1.442695, %v2176_v54 }
0x331e   :  { %3357 = vpow2.f32 %v2697_v59 }
0x3326   :  { %v3356_v14 = vpop.eup %3355 }
0x3327   :  { %2186 = vrot.lane.b32.xlu0 %v3356_v14, %s3520_s14 }
0x3328   :  { %v3358_v3 = vpop.eup %3357 }
0x3329   :  { %v2180_v17 = vadd.f32 1.0, %v3358_v3 }
0x332b   :  { %3359 = vrcp.f32 %v2180_v17 }
0x3335   :  { %v3360_v58 = vpop.eup %3359 }
0x3336   :  { %v2184_v35 = vmul.f32 %v3360_v58, %v2116_v60 }
0x3399   :  { %v2187_v55 = vpop.permute.xlu0 %2186 }
0x339a   :  { %v2189_v57 = vmul.f32 %v3360_v58, %v2187_v55 }
0x339c   :  { %2191 = vrot.lane.b32.xlu1 %v2189_v57, %s3531_s2 }
0x340e   :  { %v2192_v63 = vpop.permute.xlu1 %2191 }
0x340f   :  { %v2194_v16 = vadd.f32 %v2192_v63, %v2184_v35 }
0x3411   :  { %3361 = vtanh.f32 %v2194_v16 }
0x341b   :  { %v3362_v61 = vpop.eup %3361 }
0x341c   :  { %2197 = vrot.lane.b32.xlu0 %v3362_v61, %s3520_s14 }
0x348e   :  { %v2198_v21 = vpop.permute.xlu0 %2197 }
0x348f   :  { %v2200_v7 = vmul.f32 %v3360_v58, %v2198_v21 }
0x3491   :  { %2205 = vrot.lane.b32.xlu0 %v2200_v7, %s3520_s14  ;;  %2202 = vrot.lane.b32.xlu1 %v2200_v7, %s3531_s2 }
0x3503   :  { %v2206_v10 = vpop.permute.xlu0 %2205  ;;  %v2203_v31 = vpop.permute.xlu1 %2202 }
0x3504   :  { %v2208_v30 = vsel %vm341_vm8, %v2203_v31, %v2206_v10 }
0x3505   :  { %v2209_v33 = vmul.f32 %v3764_v5, %v2208_v30 }
0x3507   :  { %v2210_v19 = vpack.c.bf16 %v2209_v33, %v2209_v33 }
0x3509   :  { %3067 = vmatmul.mubr.msk.bf16.vlgmr.msra.gmra.mrb[44].mxu0 %vm265_vm9, %v2210_v19 }
0x350a   :  { %3083 = vmatpush3.bf16.msra.mxu0 %v4189_v45  ;;  %3090 = vmatprep.mubr.msk.bf16.mxu0 %vm3530_vm0, %v3528_v1 }
0x350b   :  { %3084 = vmatprep.subr.bf16.mxu0 %v3528_v1 }
0x350e   :  { %3085 = vmatpush3.bf16.msra.mxu0 %v4199_v39 }
0x350f   :  { %3086 = vmatprep.subr.bf16.mxu0 %v3528_v1 }
0x3512   :  { %3087 = vmatpush3.bf16.msra.mxu0 %v4209_v53 }
0x3513   :  { %3088 = vmatprep.subr.bf16.mxu0 %v3528_v1 }
0x3516   :  { %3089 = vmatpush3.bf16.msra.mxu0 %v4215_v56 }
0x3517   :  { %3106 = vmatprep.subr.bf16.mxu0 %v3528_v1 }
0x35dc   :  { %v2248_v22 = vpop.f32.mrb[44].mxu0 }
0x35dd   :  { %v2254_v15 = vadd.f32 %v2248_v22, %v4287_v32  ;;  %v3068_v23 = vpop.f32.mrb[45].mxu0 }
0x35de   :  { %v2251_v11 = vpop.f32.mrb[46].mxu0 }
0x35df   :  { %3363 = vtanh.f32 %v2254_v15  ;;  %v3069_v18 = vpop.f32.mrb[47].mxu0  ;;  %v2699_v37 = vmul.f32 -1.442695, %v2254_v15 }
0x35e1   :  { %3365 = vpow2.f32 %v2699_v37 }
0x35e9   :  { %v3364_v24 = vpop.eup %3363 }
0x35ea   :  { %2264 = vrot.lane.b32.xlu1 %v3364_v24, %s3520_s14 }
0x35eb   :  { %v3366_v44 = vpop.eup %3365 }
0x35ec   :  { %v2258_v43 = vadd.f32 1.0, %v3366_v44 }
0x35ee   :  { %3367 = vrcp.f32 %v2258_v43 }
0x35f8   :  { %v3368_v50 = vpop.eup %3367 }
0x35f9   :  { %v2262_v25 = vmul.f32 %v3368_v50, %v2194_v16 }
0x365c   :  { %v2265_v47 = vpop.permute.xlu1 %2264 }
0x365d   :  { %v2267_v9 = vmul.f32 %v3368_v50, %v2265_v47 }
0x365f   :  { %2269 = vrot.lane.b32.xlu0 %v2267_v9, %s3531_s2 }
0x36d1   :  { %v2270_v41 = vpop.permute.xlu0 %2269 }
0x36d2   :  { %v2272_v32 = vadd.f32 %v2270_v41, %v2262_v25 }
0x36d4   :  { %3369 = vtanh.f32 %v2272_v32 }
0x36de   :  { %v3370_v49 = vpop.eup %3369 }
0x36df   :  { %2275 = vrot.lane.b32.xlu1 %v3370_v49, %s3520_s14 }
0x3751   :  { %v2276_v26 = vpop.permute.xlu1 %2275 }
0x3752   :  { %v2278_v38 = vmul.f32 %v3368_v50, %v2276_v26 }
0x3754   :  { %2283 = vrot.lane.b32.xlu1 %v2278_v38, %s3520_s14  ;;  %2280 = vrot.lane.b32.xlu0 %v2278_v38, %s3531_s2 }
0x37c6   :  { %v2284_v27 = vpop.permute.xlu1 %2283  ;;  %v2281_v42 = vpop.permute.xlu0 %2280 }
0x37c7   :  { %v2286_v46 = vsel %vm341_vm8, %v2281_v42, %v2284_v27 }
0x37c8   :  { %v2287_v28 = vmul.f32 %v3764_v5, %v2286_v46 }
0x37ca   :  { %v2288_v60 = vpack.c.bf16 %v2287_v28, %v2287_v28 }
0x37cc   :  { %3079 = vmatmul.mubr.msk.bf16.vlgmr.msra.gmra.mrb[44].mxu1 %vm265_vm9, %v2288_v60 }
0x37cd   :  { %3095 = vmatpush3.bf16.msra.mxu1 %v4189_v45  ;;  %3102 = vmatprep.mubr.msk.bf16.mxu1 %vm3530_vm0, %v3528_v1 }
0x37ce   :  { %3096 = vmatprep.subr.bf16.mxu1 %v3528_v1 }
0x37d1   :  { %3097 = vmatpush3.bf16.msra.mxu1 %v4199_v39 }
0x37d2   :  { %3098 = vmatprep.subr.bf16.mxu1 %v3528_v1 }
0x37d5   :  { %3099 = vmatpush3.bf16.msra.mxu1 %v4209_v53 }
0x37d6   :  { %3100 = vmatprep.subr.bf16.mxu1 %v3528_v1 }
0x37d9   :  { %3101 = vmatpush3.bf16.msra.mxu1 %v4215_v56 }
0x389f   :  { %v2326_v29 = vpop.f32.mrb[44].mxu1 }
0x38a0   :  { %v2332_v36 = vadd.f32 %v2326_v29, %v4273_v8  ;;  %v3080_v48 = vpop.f32.mrb[45].mxu1 }
0x38a1   :  { %v2329_v62 = vpop.f32.mrb[46].mxu1 }
0x38a2   :  { %3371 = vtanh.f32 %v2332_v36  ;;  %v3081_v34 = vpop.f32.mrb[47].mxu1  ;;  %v2701_v52 = vmul.f32 -1.442695, %v2332_v36 }
0x38a4   :  { %3373 = vpow2.f32 %v2701_v52 }
0x38ac   :  { %v3372_v51 = vpop.eup %3371 }
0x38ad   :  { %2342 = vrot.lane.b32.xlu0 %v3372_v51, %s3520_s14 }
0x38ae   :  { %v3374_v20 = vpop.eup %3373 }
0x38af   :  { %v2336_v0 = vadd.f32 1.0, %v3374_v20 }
0x38b1   :  { %3375 = vrcp.f32 %v2336_v0 }
0x38bb   :  { %v3376_v54 = vpop.eup %3375 }
0x38bc   :  { %v2340_v6 = vmul.f32 %v3376_v54, %v2272_v32 }
0x391f   :  { %v2343_v40 = vpop.permute.xlu0 %2342 }
0x3920   :  { %v2345_v2 = vmul.f32 %v3376_v54, %v2343_v40 }
0x3922   :  { %2347 = vrot.lane.b32.xlu1 %v2345_v2, %s3531_s2 }
0x3994   :  { %v2348_v14 = vpop.permute.xlu1 %2347 }
0x3995   :  { %v2350_v8 = vadd.f32 %v2348_v14, %v2340_v6 }
0x3997   :  { %3377 = vtanh.f32 %v2350_v8 }
0x39a1   :  { %v3378_v59 = vpop.eup %3377 }
0x39a2   :  { %2353 = vrot.lane.b32.xlu0 %v3378_v59, %s3520_s14 }
0x3a14   :  { %v2354_v3 = vpop.permute.xlu0 %2353 }
0x3a15   :  { %v2356_v17 = vmul.f32 %v3376_v54, %v2354_v3 }
0x3a17   :  { %2361 = vrot.lane.b32.xlu0 %v2356_v17, %s3520_s14  ;;  %2358 = vrot.lane.b32.xlu1 %v2356_v17, %s3531_s2 }
0x3a89   :  { %v2362_v58 = vpop.permute.xlu0 %2361  ;;  %v2359_v55 = vpop.permute.xlu1 %2358 }
0x3a8a   :  { %v2364_v57 = vsel %vm341_vm8, %v2359_v55, %v2362_v58 }
0x3a8b   :  { %v2365_v35 = vmul.f32 %v3764_v5, %v2364_v57 }
0x3a8d   :  { %v2366_v63 = vpack.c.bf16 %v2365_v35, %v2365_v35 }
0x3a8f   :  { %3091 = vmatmul.mubr.msk.bf16.vlgmr.msra.gmra.mrb[48].mxu0 %vm265_vm9, %v2366_v63 }
0x3a90   :  { %3107 = vmatpush3.bf16.msra.mxu0 %v4189_v45  ;;  %3114 = vmatprep.mubr.msk.bf16.mxu0 %vm3530_vm0, %v3528_v1 }
0x3a91   :  { %3108 = vmatprep.subr.bf16.mxu0 %v3528_v1 }
0x3a94   :  { %3109 = vmatpush3.bf16.msra.mxu0 %v4199_v39 }
0x3a95   :  { %3110 = vmatprep.subr.bf16.mxu0 %v3528_v1 }
0x3a98   :  { %3111 = vmatpush3.bf16.msra.mxu0 %v4209_v53 }
0x3a99   :  { %3112 = vmatprep.subr.bf16.mxu0 %v3528_v1 }
0x3a9c   :  { %3113 = vmatpush3.bf16.msra.mxu0 %v4215_v56 }
0x3b62   :  { %v2404_v16 = vpop.f32.mrb[48].mxu0 }
0x3b63   :  { %v2410_v61 = vadd.f32 %v2404_v16, %v4276_v12  ;;  %v3092_v21 = vpop.f32.mrb[49].mxu0 }
0x3b64   :  { %v2407_v45 = vpop.f32.mrb[50].mxu0 }
0x3b65   :  { %3379 = vtanh.f32 %v2410_v61  ;;  %v3093_v7 = vpop.f32.mrb[51].mxu0  ;;  %v2703_v31 = vmul.f32 -1.442695, %v2410_v61  ;;  %v2708_v61 = vld [vmem:[%s4421_s10] ss:$0 sm:$0xff] }
0x3b67   :  { %3381 = vpow2.f32 %v2703_v31 }
0x3b6f   :  { %v3380_v10 = vpop.eup %3379 }
0x3b70   :  { %2420 = vrot.lane.b32.xlu1 %v3380_v10, %s3520_s14 }
0x3b71   :  { %v3382_v39 = vpop.eup %3381 }
0x3b72   :  { %v2414_v30 = vadd.f32 1.0, %v3382_v39  ;;  %v2709_v39 = vld [vmem:[#allocation2] ss:$0 sm:$0xff] }
0x3b74   :  { %3383 = vrcp.f32 %v2414_v30 }
0x3b7e   :  { %v3384_v53 = vpop.eup %3383 }
0x3b7f   :  { %v2418_v56 = vmul.f32 %v3384_v53, %v2350_v8 }
0x3be2   :  { %v2421_v33 = vpop.permute.xlu1 %2420 }
0x3be3   :  { %v2423_v1 = vmul.f32 %v3384_v53, %v2421_v33 }
0x3be5   :  { %2425 = vrot.lane.b32.xlu0 %v2423_v1, %s3531_s2 }
0x3c57   :  { %v2426_v19 = vpop.permute.xlu0 %2425 }
0x3c58   :  { %v2428_v12 = vadd.f32 %v2426_v19, %v2418_v56 }
0x3c5a   :  { %3385 = vtanh.f32 %v2428_v12 }
0x3c64   :  { %v3386_v22 = vpop.eup %3385 }
0x3c65   :  { %2431 = vrot.lane.b32.xlu1 %v3386_v22, %s3520_s14 }
0x3cd7   :  { %v2432_v15 = vpop.permute.xlu1 %2431 }
0x3cd8   :  { %v2434_v23 = vmul.f32 %v3384_v53, %v2432_v15 }
0x3cda   :  { %2439 = vrot.lane.b32.xlu1 %v2434_v23, %s3520_s14  ;;  %2436 = vrot.lane.b32.xlu0 %v2434_v23, %s3531_s2 }
0x3d4c   :  { %v2440_v11 = vpop.permute.xlu1 %2439  ;;  %v2437_v18 = vpop.permute.xlu0 %2436 }
0x3d4d   :  { %v2442_v24 = vsel %vm341_vm8, %v2437_v18, %v2440_v11 }
0x3d4e   :  { %v2443_v37 = vmul.f32 %v3764_v5, %v2442_v24 }
0x3d50   :  { %v2444_v44 = vpack.c.bf16 %v2443_v37, %v2443_v37 }
0x3d52   :  { %3103 = vmatmul.mubr.msk.bf16.vlgmr.msra.gmra.mrb[48].mxu1 %vm265_vm9, %v2444_v44 }
0x3e25   :  { %v2482_v43 = vpop.f32.mrb[48].mxu1 }
0x3e26   :  { %v2488_v50 = vadd.f32 %v2482_v43, %v4279_v13  ;;  %v3104_v47 = vpop.f32.mrb[49].mxu1 }
0x3e27   :  { %v2485_v9 = vpop.f32.mrb[50].mxu1 }
0x3e28   :  { %3387 = vtanh.f32 %v2488_v50  ;;  %v3105_v25 = vpop.f32.mrb[51].mxu1  ;;  %v2705_v32 = vmul.f32 -1.442695, %v2488_v50 }
0x3e2a   :  { %3389 = vpow2.f32 %v2705_v32 }
0x3e32   :  { %v3388_v41 = vpop.eup %3387 }
0x3e33   :  { %2498 = vrot.lane.b32.xlu0 %v3388_v41, %s3520_s14 }
0x3e34   :  { %v3390_v49 = vpop.eup %3389 }
0x3e35   :  { %v2492_v26 = vadd.f32 1.0, %v3390_v49 }
0x3e37   :  { %3391 = vrcp.f32 %v2492_v26 }
0x3e41   :  { %v3392_v38 = vpop.eup %3391 }
0x3e42   :  { %v2496_v46 = vmul.f32 %v3392_v38, %v2428_v12 }
0x3ea5   :  { %v2499_v27 = vpop.permute.xlu0 %2498 }
0x3ea6   :  { %v2501_v42 = vmul.f32 %v3392_v38, %v2499_v27 }
0x3ea8   :  { %2503 = vrot.lane.b32.xlu1 %v2501_v42, %s3531_s2 }
0x3f1a   :  { %v2504_v28 = vpop.permute.xlu1 %2503 }
0x3f1b   :  { %v2506_v13 = vadd.f32 %v2504_v28, %v2496_v46 }
0x3f1d   :  { %3393 = vtanh.f32 %v2506_v13 }
0x3f27   :  { %v3394_v60 = vpop.eup %3393 }
0x3f28   :  { %2509 = vrot.lane.b32.xlu0 %v3394_v60, %s3520_s14 }
0x3f9a   :  { %v2510_v29 = vpop.permute.xlu0 %2509 }
0x3f9b   :  { %v2512_v36 = vmul.f32 %v3392_v38, %v2510_v29 }
0x3f9d   :  { %2517 = vrot.lane.b32.xlu0 %v2512_v36, %s3520_s14  ;;  %2514 = vrot.lane.b32.xlu1 %v2512_v36, %s3531_s2 }
0x400f   :  { %v2518_v48 = vpop.permute.xlu0 %2517  ;;  %v2515_v62 = vpop.permute.xlu1 %2514 }
0x4010   :  { %v2520_v34 = vsel %vm341_vm8, %v2515_v62, %v2518_v48 }
0x4011   :  { %v2521_v51 = vmul.f32 %v3764_v5, %v2520_v34 }
0x4013   :  { %v2522_v52 = vpack.c.bf16 %v2521_v51, %v2521_v51 }
0x4015   :  { %3115 = vmatmul.mubr.msk.bf16.vlgmr.msra.gmra.mrb[52].mxu0 %vm265_vm9, %v2522_v52 }
0x40e8   :  { %v2560_v20 = vpop.f32.mrb[52].mxu0 }
0x40e9   :  { %v2566_v0 = vadd.f32 %v2560_v20, %v4282_v4  ;;  %v3116_v54 = vpop.f32.mrb[53].mxu0 }
0x40ea   :  { %v2563_v40 = vpop.f32.mrb[54].mxu0 }
0x40eb   :  { %3395 = vtanh.f32 %v2566_v0  ;;  %v3117_v2 = vpop.f32.mrb[55].mxu0  ;;  %v2707_v14 = vmul.f32 -1.442695, %v2566_v0 }
0x40ed   :  { %3397 = vpow2.f32 %v2707_v14 }
0x40f5   :  { %v3396_v6 = vpop.eup %3395 }
0x40f6   :  { %2576 = vrot.lane.b32.xlu1 %v3396_v6, %s3520_s14 }
0x40f7   :  { %v3398_v8 = vpop.eup %3397 }
0x40f8   :  { %v2570_v59 = vadd.f32 1.0, %v3398_v8 }
0x40fa   :  { %3399 = vrcp.f32 %v2570_v59 }
0x4104   :  { %v3400_v3 = vpop.eup %3399 }
0x4105   :  { %v2574_v58 = vmul.f32 %v3400_v3, %v2506_v13 }
0x4168   :  { %v2577_v5 = vpop.permute.xlu1 %2576 }
0x4169   :  { %v2579_v17 = vmul.f32 %v3400_v3, %v2577_v5 }
0x416b   :  { %2581 = vrot.lane.b32.xlu0 %v2579_v17, %s3531_s2 }
0x41dd   :  { %v2582_v55 = vpop.permute.xlu0 %2581 }
0x41de   :  { %v2584_v4 = vadd.f32 %v2582_v55, %v2574_v58 }
0x41e0   :  { %3401 = vtanh.f32 %v2584_v4 }
0x41ea   :  { %v3402_v57 = vpop.eup %3401 }
0x41eb   :  { %2587 = vrot.lane.b32.xlu1 %v3402_v57, %s3520_s14 }
0x425d   :  { %v2588_v35 = vpop.permute.xlu1 %2587 }
0x425e   :  { %v2590_v63 = vmul.f32 %v3400_v3, %v2588_v35 }
0x4260   :  { %v2595_v16 = vrot.slane %v2590_v63, 2  ;;  %2592 = vrot.lane.b32.xlu0 %v2590_v63, %s3531_s2 }
0x4262   :  { %2596 = vrot.lane.b32.xlu1 %v2595_v16, %s3520_s14 }
0x42d2   :  { %v2593_v21 = vpop.permute.xlu0 %2592 }
0x42d4   :  { %v2597_v45 = vpop.permute.xlu1 %2596 }
0x42d5   :  { %v2599_v7 = vsel %vm341_vm8, %v2593_v21, %v2597_v45 }
0x42d6   :  { %v2607_v10 = vmul.f32 %v2708_v61, %v2599_v7 }
0x42d8   :  { %v2609_v31 = vsel %vm2608_vm12, %v2607_v10, 0.0 }
0x42d9   :  { %2610 = vadd.xlane.f32.xlu0 %v2609_v31 }
0x4366   :  { %v2611_v30 = vpop.xlane.xlu0 %2610 }
0x4367   :  { %v2619_v53 = vadd.f32 %v2709_v39, %v2611_v30 }
0x4369   :  { %2621 = vst.msk [vmem:[%s4423_s12] sm:$0x3] %vm2620_vm13, %v2619_v53 }
0x436a   :  { %2626 = vsyncpa [#allocation4], 1 }
0x436b   :  { %2627 = vsyncpa [#allocation6], 1 }
0x436c   :  { %2628 = vsyncpa [#allocation9], 1 }

</bundles_post_ra>
